<compile_context>
chip_gen: v5e
topology: v5e:2x2
jax: 0.10.0
libtpu: 0.0.40
codegen_flags: <defaults>
</compile_context>

<pallas_src>
import functools

import jax
import jax.numpy as jnp
from jax import lax
from jax.experimental import pallas as pl
from jax.experimental.pallas import tpu as pltpu


_VMEM_LIMIT = 32 * 1024 * 1024  # safe scoped-VMEM request on v5e / v6e / v7x


def _round_up(x, m):
    return ((x + m - 1) // m) * m


def _pick_tile(dim, align, cap):
    """Pick (tile, padded_dim) with tile | padded_dim, tile % align == 0.

    Avoids large padding blowups: if the aligned dim fits under `cap` it is
    used whole (single block); otherwise tiles in [cap/2, cap] are scanned
    and the one with the least padding wins.
    """
    dp = _round_up(dim, align)
    if dp <= cap:
        return dp, dp
    t0 = cap - (cap % align)
    best_t, best_pad = None, None
    for cand in range(t0, max(t0 // 2, align) - 1, -align):
        pad = _round_up(dp, cand) - dp
        if best_pad is None or pad < best_pad:
            best_t, best_pad = cand, pad
        if pad == 0:
            break
    return best_t, dp + best_pad


# --------------------------------------------------------------------------
# Tiled matmul (+bias, +optional ReLU) Pallas kernels: the conv hot path.
# --------------------------------------------------------------------------
def _matmul_kernel_1k(a_ref, b_ref, bias_ref, o_ref, *, activation):
    """Single K step: no scratch, no init/finalize phases."""
    out = jnp.dot(a_ref[...], b_ref[...], preferred_element_type=jnp.float32)
    out = out + bias_ref[...]
    if activation == "relu":
        out = jnp.maximum(out, 0.0)
    o_ref[...] = out.astype(o_ref.dtype)


def _matmul_kernel_acc(a_ref, b_ref, bias_ref, o_ref, acc_ref, *, activation):
    """Multi K step: f32 VMEM accumulator, epilogue at the last K tile."""
    @pl.when(pl.program_id(2) == 0)
    def _():
        acc_ref[...] = jnp.zeros_like(acc_ref)

    acc_ref[...] += jnp.dot(
        a_ref[...], b_ref[...], preferred_element_type=jnp.float32
    )

    @pl.when(pl.program_id(2) == pl.num_programs(2) - 1)
    def _():
        out = acc_ref[...] + bias_ref[...]
        if activation == "relu":
            out = jnp.maximum(out, 0.0)
        o_ref[...] = out.astype(o_ref.dtype)


def pallas_matmul(a, b, bias=None, activation=None, out_dtype=jnp.float32,
                  tm_cap=512, tn_cap=512, tk_cap=2048):
    """(M,K) @ (K,N) + bias [+ReLU] on the MXU with bf16 operands."""
    M, K = a.shape
    K2, N = b.shape
    assert K == K2
    tm, Mp = _pick_tile(M, 16, tm_cap)    # 16-aligned sublanes for bf16 A
    tn, Np = _pick_tile(N, 128, tn_cap)
    tk, Kp = _pick_tile(K, 128, tk_cap)

    a_p = a if a.dtype == jnp.bfloat16 else a.astype(jnp.bfloat16)
    if (Mp, Kp) != (M, K):
        a_p = jnp.pad(a_p, ((0, Mp - M), (0, Kp - K)))
    b_p = b.astype(jnp.bfloat16)
    if (Kp, Np) != (K, N):
        b_p = jnp.pad(b_p, ((0, Kp - K), (0, Np - N)))
    if bias is None:
        bias_p = jnp.zeros((1, Np), jnp.float32)
    else:
        bias_p = bias.astype(jnp.float32).reshape(1, N)
        if Np != N:
            bias_p = jnp.pad(bias_p, ((0, 0), (0, Np - N)))

    nk = Kp // tk
    if nk == 1:
        kernel = functools.partial(_matmul_kernel_1k, activation=activation)
        out = pl.pallas_call(
            kernel,
            grid=(Mp // tm, Np // tn),
            in_specs=[
                pl.BlockSpec((tm, Kp), lambda i, j: (i, 0)),
                pl.BlockSpec((Kp, tn), lambda i, j: (0, j)),
                pl.BlockSpec((1, tn), lambda i, j: (0, j)),
            ],
            out_specs=pl.BlockSpec((tm, tn), lambda i, j: (i, j)),
            out_shape=jax.ShapeDtypeStruct((Mp, Np), out_dtype),
            compiler_params=pltpu.CompilerParams(
                dimension_semantics=("parallel", "parallel"),
                vmem_limit_bytes=_VMEM_LIMIT,
            ),
        )(a_p, b_p, bias_p)
    else:
        kernel = functools.partial(_matmul_kernel_acc, activation=activation)
        out = pl.pallas_call(
            kernel,
            grid=(Mp // tm, Np // tn, nk),
            in_specs=[
                pl.BlockSpec((tm, tk), lambda i, j, k: (i, k)),
                pl.BlockSpec((tk, tn), lambda i, j, k: (k, j)),
                pl.BlockSpec((1, tn), lambda i, j, k: (0, j)),
            ],
            out_specs=pl.BlockSpec((tm, tn), lambda i, j, k: (i, j)),
            out_shape=jax.ShapeDtypeStruct((Mp, Np), out_dtype),
            scratch_shapes=[pltpu.VMEM((tm, tn), jnp.float32)],
            compiler_params=pltpu.CompilerParams(
                dimension_semantics=("parallel", "parallel", "arbitrary"),
                vmem_limit_bytes=_VMEM_LIMIT,
            ),
        )(a_p, b_p, bias_p)

    if (Mp, Np) != (M, N):
        out = out[:M, :N]
    return out


# --------------------------------------------------------------------------
# Conv2d (NHWC) = bf16 im2col (glue) + tiled Pallas matmul (hot path).
# Weights stay in PyTorch (Cout, Cin, kh, kw) layout.
# --------------------------------------------------------------------------
def conv2d(x, w, b=None, stride=1, dilation=1, padding=0, activation=None,
           out_dtype=jnp.bfloat16):
    B, H, W, Cin = x.shape
    Cout, Cin2, kh, kw = w.shape
    assert Cin == Cin2
    xb = x if x.dtype == jnp.bfloat16 else x.astype(jnp.bfloat16)
    if kh == 1 and kw == 1 and stride == 1 and padding == 0:
        Ho, Wo = H, W
        patches = xb.reshape(B * H * W, Cin)
    else:
        # TODO(synk): patch extraction still materializes in XLA; an
        # implicit-GEMM index_map over the padded NHWC activation would
        # remove this kh*kw-sized intermediate entirely.
        if padding > 0:
            xp = jnp.pad(
                xb, ((0, 0), (padding, padding), (padding, padding), (0, 0))
            )
        else:
            xp = xb
        Hp = H + 2 * padding
        Wp = W + 2 * padding
        Ho = (Hp - dilation * (kh - 1) - 1) // stride + 1
        Wo = (Wp - dilation * (kw - 1) - 1) // stride + 1
        cols = []
        for ky in range(kh):
            for kx in range(kw):
                sl = xp[
                    :,
                    ky * dilation : ky * dilation + (Ho - 1) * stride + 1 : stride,
                    kx * dilation : kx * dilation + (Wo - 1) * stride + 1 : stride,
                    :,
                ]
                cols.append(sl)  # (B, Ho, Wo, Cin) bf16
        # column ordering = cin * (kh*kw) + (ky*kw + kx)  (matches torch weight)
        patches = jnp.stack(cols, axis=4).reshape(B * Ho * Wo, Cin * kh * kw)
    wmat = w.reshape(Cout, Cin * kh * kw).T
    out = pallas_matmul(patches, wmat, b, activation=activation,
                        out_dtype=out_dtype)
    return out.reshape(B, Ho, Wo, Cout)


def pixel_shuffle(x, r):
    """NHWC pixel shuffle matching torch.nn.PixelShuffle channel ordering."""
    B, H, W, C = x.shape
    Co = C // (r * r)
    x = x.reshape(B, H, W, Co, r, r)
    x = x.transpose(0, 1, 4, 2, 5, 3)
    return x.reshape(B, H * r, W * r, Co)


# --------------------------------------------------------------------------
# AttentionFusion: bf16 stats sweep + fully fused (mix + residual + 1x1 conv)
# apply kernel with a per-batch effective weight.
# --------------------------------------------------------------------------
def _afm_stats_kernel(params_ref, x_ref, attn_ref, s_acc, xx_acc, *,
                      n_views, m_true, eps):
    m_idx = pl.program_id(1)

    @pl.when(m_idx == 0)
    def _():
        s_acc[...] = jnp.zeros_like(s_acc)
        xx_acc[...] = jnp.zeros_like(xx_acc)

    x = x_ref[0]  # (n_views, tmm) bf16; M-padding columns are exact zeros
    s_acc[...] += jnp.sum(x.astype(jnp.float32), axis=1, keepdims=True)
    xx_acc[...] += lax.dot_general(
        x, x, (((1,), (1,)), ((), ())), preferred_element_type=jnp.float32
    )

    @pl.when(m_idx == pl.num_programs(1) - 1)
    def _():
        alpha = params_ref[0]
        gamma = params_ref[1]
        beta = params_ref[2]
        # s_acc lanes all hold the same per-view running sum -> outer product
        # via a 128-wide contraction, rescaled by 1/128.
        outer = lax.dot_general(
            s_acc[...], s_acc[...], (((1,), (1,)), ((), ())),
            preferred_element_type=jnp.float32,
        ) * (1.0 / 128.0)
        cov = (xx_acc[...] - outer * (1.0 / m_true)) * (alpha / (m_true - 1.0))
        denom = jnp.sum(cov * cov) * (1.0 / (n_views * n_views)) + eps
        attn_ref[0] = jnp.tanh(gamma * cov * lax.rsqrt(denom) + beta)


def _afm_apply_kernel(x_ref, w_ref, o_ref, *, n_views):
    """out[hw, co] = sum_n x[n, hw, :] @ W_eff[n, :, co]  (mix+resid+1x1 conv)."""
    acc = None
    for n in range(n_views):
        part = jnp.dot(
            x_ref[0, n], w_ref[0, n], preferred_element_type=jnp.float32
        )
        acc = part if acc is None else acc + part
    o_ref[0] = acc


def afm_fused(views, w_afm, alpha, gamma, beta, eps=1e-5):
    """views: list of 5 (B,H,W,C) bf16 tensors (AFM stacking order).

    Returns conv1x1(tanh-attention @ views + views) as (B, H, W, Cout) f32.
    """
    nv = len(views)
    B, H, W, C = views[0].shape
    stacked = jnp.stack(views, axis=1).astype(jnp.bfloat16)  # (B, nv, H, W, C)

    # ---- stats sweep: covariance -> tanh attention (B, nv, nv) ----
    M = H * W * C
    tmm, Mp = _pick_tile(M, 128, 16384)
    x2 = stacked.reshape(B, nv, M)
    if Mp != M:
        x2 = jnp.pad(x2, ((0, 0), (0, 0), (0, Mp - M)))
    params = jnp.stack(
        [alpha.reshape(()), gamma.reshape(()), beta.reshape(())]
    ).astype(jnp.float32)

    stats_kernel = functools.partial(
        _afm_stats_kernel, n_views=float(nv), m_true=float(M), eps=float(eps)
    )
    attn = pl.pallas_call(
        stats_kernel,
        grid=(B, Mp // tmm),
        in_specs=[
            pl.BlockSpec(memory_space=pltpu.MemorySpace.SMEM),
            pl.BlockSpec((1, nv, tmm), lambda b, m: (b, 0, m)),
        ],
        out_specs=pl.BlockSpec((1, nv, nv), lambda b, m: (b, 0, 0)),
        out_shape=jax.ShapeDtypeStruct((B, nv, nv), jnp.float32),
        scratch_shapes=[
            pltpu.VMEM((nv, 128), jnp.float32),  # running per-view sums
            pltpu.VMEM((nv, nv), jnp.float32),   # running x @ x.T
        ],
        compiler_params=pltpu.CompilerParams(
            dimension_semantics=("parallel", "arbitrary"),
            vmem_limit_bytes=_VMEM_LIMIT,
        ),
    )(params, x2)

    # ---- fold attention-mix + "+x" residual + 1x1 conv into W_eff[b] ----
    cout = w_afm.shape[0]
    wr = w_afm.reshape(cout, nv, C)  # [o, n, c] = W_afm[o, n*C + c]
    w_eff = (
        jnp.einsum("bnm,onc->bmco", attn, wr)
        + jnp.transpose(wr, (1, 2, 0))[None]
    ).astype(jnp.bfloat16)           # (B, nv, C, cout)

    # ---- fused apply: one streaming pass over the stacked views ----
    HW = H * W
    thw, HWp = _pick_tile(HW, 8, 2048)
    x4 = stacked.reshape(B, nv, HW, C)
    if HWp != HW:
        x4 = jnp.pad(x4, ((0, 0), (0, 0), (0, HWp - HW), (0, 0)))
    apply_kernel = functools.partial(_afm_apply_kernel, n_views=nv)
    out = pl.pallas_call(
        apply_kernel,
        grid=(B, HWp // thw),
        in_specs=[
            pl.BlockSpec((1, nv, thw, C), lambda b, m: (b, 0, m, 0)),
            pl.BlockSpec((1, nv, C, cout), lambda b, m: (b, 0, 0, 0)),
        ],
        out_specs=pl.BlockSpec((1, thw, cout), lambda b, m: (b, m, 0)),
        out_shape=jax.ShapeDtypeStruct((B, HWp, cout), jnp.float32),
        compiler_params=pltpu.CompilerParams(
            dimension_semantics=("parallel", "parallel"),
            vmem_limit_bytes=_VMEM_LIMIT,
        ),
    )(x4, w_eff)
    if HWp != HW:
        out = out[:, :HW, :]
    return out.reshape(B, H, W, cout)


# --------------------------------------------------------------------------
# HFEM forward (first=False): mirrors the PyTorch module exactly.
# --------------------------------------------------------------------------
def hfem_forward(params, x_nchw, angRes, n_blocks):
    A = angRes
    x = jnp.transpose(x_nchw, (0, 2, 3, 1))  # NHWC internally, f32
    B, H, W, C = x.shape
    xb = x.astype(jnp.bfloat16)               # bf16 activations for all convs
    center = A // 2

    # MacPI2EPI (strided slicing glue; channel ordering matches torch.cat(dim=1))
    d0 = jnp.concatenate([xb[:, center::A, i::A, :] for i in range(A)], axis=3)
    d90 = jnp.concatenate([xb[:, i::A, center::A, :] for i in range(A)], axis=3)
    d45 = jnp.concatenate([xb[:, i::A, i::A, :] for i in range(A)], axis=3)
    d135 = jnp.concatenate(
        [xb[:, i::A, A - i - 1 :: A, :] for i in range(A)], axis=3
    )

    # Four shared-weight EPI head convs fused into ONE matmul (concat along M).
    epi_in = jnp.concatenate([d0, d90, d45, d135], axis=0)      # (4B, h, w, A*C)
    epi_out = conv2d(epi_in, params["head_epi"], padding=1)     # (4B, h, w, C)
    mid = jnp.concatenate(jnp.split(epi_out, 4, axis=0), axis=3)  # (B, h, w, 4C)
    x_epi = pixel_shuffle(conv2d(mid, params["epi2spa"]), A)

    x_s_intra = conv2d(xb, params["spa_intra"], dilation=A, padding=A)
    x_s_inter = conv2d(xb, params["spa_inter"], dilation=1, padding=1)
    x_a_intra = conv2d(xb, params["ang_intra"], stride=A)
    x_a_intra = pixel_shuffle(conv2d(x_a_intra, params["ang2spa_intra"]), A)
    x_a_inter = conv2d(xb, params["ang_inter"], stride=2 * A)
    x_a_inter = pixel_shuffle(conv2d(x_a_inter, params["ang2spa_inter"]), 2 * A)

    # AttentionFusion (stacking order matches the chained torch.cat calls),
    # with the 1x1 fusion conv folded in.  Output is f32 (residual base).
    out = afm_fused(
        [x_epi, x_a_inter, x_a_intra, x_s_inter, x_s_intra],
        params["afm_conv"].reshape(C, 5 * C),
        params["afm_alpha"], params["afm_gamma"], params["afm_beta"],
    )

    # Residual group (SRG)
    res = out
    for blk in params["srg_blocks"]:
        r = conv2d(
            res, blk["conv1_w"], blk["conv1_b"],
            dilation=A, padding=A, activation="relu",   # ReLU fused in epilogue
        )
        r = conv2d(
            r, blk["conv2_w"], blk["conv2_b"],
            dilation=A, padding=A, out_dtype=jnp.float32,
        )
        # CALayer: tiny (B, C) dots -> plain XLA instead of Pallas launches
        cr = blk["ca1_w"].shape[0]
        y = jnp.mean(r, axis=(1, 2))  # (B, C)
        y = jax.nn.relu(y @ blk["ca1_w"].reshape(cr, C).T + blk["ca1_b"])
        y = jax.nn.sigmoid(y @ blk["ca2_w"].reshape(C, cr).T + blk["ca2_b"])
        r = r * y[:, None, None, :]
        res = res + r
    res = conv2d(
        res, params["srg_conv_w"], params["srg_conv_b"],
        dilation=A, padding=A, out_dtype=jnp.float32,
    )
    out = res + out

    out = out + x
    return jnp.transpose(out, (0, 3, 1, 2))  # back to NCHW at the boundary


# --------------------------------------------------------------------------
# Deterministic parameter init (first=False).
# --------------------------------------------------------------------------
def init_params(key, A, C, n_blocks):
    keys = iter(jax.random.split(key, 64))

    def w(shape, scale=0.1):
        return jax.random.normal(next(keys), shape, jnp.float32) * scale

    cr = C // max(C // 4, 1)  # CALayer mid channels (reduction = C // 4)
    params = {
        "head_epi": w((C, A * C, 3, 3)),
        "epi2spa": w((A * A * C, 4 * C, 1, 1)),
        "spa_intra": w((C, C, 3, 3)),
        "spa_inter": w((C, C, 3, 3)),
        "ang_intra": w((C, C, A, A)),
        "ang2spa_intra": w((A * A * C, C, 1, 1)),
        "ang_inter": w((C, C, 2 * A, 2 * A)),
        "ang2spa_inter": w((4 * A * A * C, C, 1, 1)),
        "afm_alpha": jnp.ones((1,), jnp.float32),
        "afm_gamma": jnp.full((1,), 0.1, jnp.float32),
        "afm_beta": jnp.full((1,), 0.05, jnp.float32),
        "afm_conv": w((C, 5 * C, 1, 1)),
        "srg_blocks": [],
        "srg_conv_w": w((C, C, 3, 3)),
        "srg_conv_b": w((C,)),
    }
    for _ in range(n_blocks):
        params["srg_blocks"].append(
            {
                "conv1_w": w((C, C, 3, 3)),
                "conv1_b": w((C,)),
                "conv2_w": w((C, C, 3, 3)),
                "conv2_b": w((C,)),
                "ca1_w": w((cr, C, 1, 1)),
                "ca1_b": w((cr,)),
                "ca2_w": w((C, cr, 1, 1)),
                "ca2_b": w((C,)),
            }
        )
    return params


if __name__ == "__main__":
    angRes = 2
    channels = 4
    n_blocks = 2
    B = 2
    h = w = 8  # per-view spatial size -> MacPI is (angRes*h, angRes*w) = 16x16

    key = jax.random.PRNGKey(0)
    k_x, k_p = jax.random.split(key)
    x = jax.random.normal(
        k_x, (B, channels, angRes * h, angRes * w), jnp.float32
    )
    params = init_params(k_p, angRes, channels, n_blocks)

    fwd = jax.jit(
        functools.partial(hfem_forward, angRes=angRes, n_blocks=n_blocks)
    )
    out = fwd(params, x)
    jax.block_until_ready(out)
    assert out.shape == x.shape and out.dtype == jnp.float32
    print("KERNEL_OK")
</pallas_src>

<mosaic_0001>
module attributes {stable_mosaic.version = 11 : i64} {
  func.func @_matmul_kernel_1k(%arg0: i32, %arg1: i32, %arg2: memref<512x128xbf16, #tpu.memory_space<vmem>>, %arg3: memref<128x128xbf16, #tpu.memory_space<vmem>>, %arg4: memref<1x128xf32, #tpu.memory_space<vmem>>, %arg5: memref<512x128xbf16, #tpu.memory_space<vmem>>) attributes {dimension_semantics = [#tpu.dimension_semantics<parallel>, #tpu.dimension_semantics<parallel>], iteration_bounds = array<i64: 1, 1>, scalar_prefetch = 0 : i64, scratch_operands = 0 : i64, tpu.core_type = #tpu.core_type<tc>, window_params = [{transform_indices = @transform_0, window_bounds = array<i64: 512, 128>}, {transform_indices = @transform_1, window_bounds = array<i64: 128, 128>}, {transform_indices = @transform_2, window_bounds = array<i64: 1, 128>}, {transform_indices = @transform_3, window_bounds = array<i64: 512, 128>}]} {
    %c0 = arith.constant 0 : index
    %c0_0 = arith.constant 0 : index
    %0 = vector.load %arg2[%c0, %c0_0] : memref<512x128xbf16, #tpu.memory_space<vmem>>, vector<512x128xbf16>
    %c0_1 = arith.constant 0 : index
    %c0_2 = arith.constant 0 : index
    %1 = vector.load %arg3[%c0_1, %c0_2] : memref<128x128xbf16, #tpu.memory_space<vmem>>, vector<128x128xbf16>
    %cst = arith.constant dense<0.000000e+00> : vector<512x128xf32>
    %2 = tpu.matmul %0, %1, %cst {dimension_numbers = #tpu.dot_dimension_numbers<[1], [0], [0], [1], [0, 0, 1, 1], [], []>} : vector<512x128xbf16>, vector<128x128xbf16>, vector<512x128xf32> -> vector<512x128xf32>
    %c0_3 = arith.constant 0 : index
    %c0_4 = arith.constant 0 : index
    %3 = vector.load %arg4[%c0_3, %c0_4] : memref<1x128xf32, #tpu.memory_space<vmem>>, vector<1x128xf32>
    %4 = vector.broadcast %3 : vector<1x128xf32> to vector<512x128xf32>
    %5 = arith.addf %2, %4 : vector<512x128xf32>
    %6 = arith.truncf %5 : vector<512x128xf32> to vector<512x128xbf16>
    %c0_5 = arith.constant 0 : index
    %c0_6 = arith.constant 0 : index
    %7 = vector.load %arg5[%c0_5, %c0_6] : memref<512x128xbf16, #tpu.memory_space<vmem>>, vector<512x128xbf16>
    tpu.vector_store %arg5[%c0_5, %c0_6], %6 {strides = array<i32>} : memref<512x128xbf16, #tpu.memory_space<vmem>>, vector<512x128xbf16>,
    return
  }
  func.func @transform_0(%arg0: i32, %arg1: i32) -> (i32, i32) {
    %c0_i32 = arith.constant 0 : i32
    %c0_i32_0 = arith.constant 0 : i32
    return %arg0, %c0_i32 : i32, i32
  }
  func.func @transform_1(%arg0: i32, %arg1: i32) -> (i32, i32) {
    %c0_i32 = arith.constant 0 : i32
    %c0_i32_0 = arith.constant 0 : i32
    return %c0_i32, %arg1 : i32, i32
  }
  func.func @transform_2(%arg0: i32, %arg1: i32) -> (i32, i32) {
    %c0_i32 = arith.constant 0 : i32
    %c0_i32_0 = arith.constant 0 : i32
    return %c0_i32, %arg1 : i32, i32
  }
  func.func @transform_3(%arg0: i32, %arg1: i32) -> (i32, i32) {
    %c0_i32 = arith.constant 0 : i32
    return %arg0, %arg1 : i32, i32
  }
}

module attributes {stable_mosaic.version = 11 : i64} {
  func.func @_matmul_kernel_1k(%arg0: i32, %arg1: i32, %arg2: memref<128x128xbf16, #tpu.memory_space<vmem>>, %arg3: memref<128x128xbf16, #tpu.memory_space<vmem>>, %arg4: memref<1x128xf32, #tpu.memory_space<vmem>>, %arg5: memref<128x128xbf16, #tpu.memory_space<vmem>>) attributes {dimension_semantics = [#tpu.dimension_semantics<parallel>, #tpu.dimension_semantics<parallel>], iteration_bounds = array<i64: 1, 1>, scalar_prefetch = 0 : i64, scratch_operands = 0 : i64, tpu.core_type = #tpu.core_type<tc>, window_params = [{transform_indices = @transform_0, window_bounds = array<i64: 128, 128>}, {transform_indices = @transform_1, window_bounds = array<i64: 128, 128>}, {transform_indices = @transform_2, window_bounds = array<i64: 1, 128>}, {transform_indices = @transform_3, window_bounds = array<i64: 128, 128>}]} {
    %c0 = arith.constant 0 : index
    %c0_0 = arith.constant 0 : index
    %0 = vector.load %arg2[%c0, %c0_0] : memref<128x128xbf16, #tpu.memory_space<vmem>>, vector<128x128xbf16>
    %c0_1 = arith.constant 0 : index
    %c0_2 = arith.constant 0 : index
    %1 = vector.load %arg3[%c0_1, %c0_2] : memref<128x128xbf16, #tpu.memory_space<vmem>>, vector<128x128xbf16>
    %cst = arith.constant dense<0.000000e+00> : vector<128x128xf32>
    %2 = tpu.matmul %0, %1, %cst {dimension_numbers = #tpu.dot_dimension_numbers<[1], [0], [0], [1], [0, 0, 1, 1], [], []>} : vector<128x128xbf16>, vector<128x128xbf16>, vector<128x128xf32> -> vector<128x128xf32>
    %c0_3 = arith.constant 0 : index
    %c0_4 = arith.constant 0 : index
    %3 = vector.load %arg4[%c0_3, %c0_4] : memref<1x128xf32, #tpu.memory_space<vmem>>, vector<1x128xf32>
    %4 = vector.broadcast %3 : vector<1x128xf32> to vector<128x128xf32>
    %5 = arith.addf %2, %4 : vector<128x128xf32>
    %6 = arith.truncf %5 : vector<128x128xf32> to vector<128x128xbf16>
    %c0_5 = arith.constant 0 : index
    %c0_6 = arith.constant 0 : index
    %7 = vector.load %arg5[%c0_5, %c0_6] : memref<128x128xbf16, #tpu.memory_space<vmem>>, vector<128x128xbf16>
    tpu.vector_store %arg5[%c0_5, %c0_6], %6 {strides = array<i32>} : memref<128x128xbf16, #tpu.memory_space<vmem>>, vector<128x128xbf16>,
    return
  }
  func.func @transform_0(%arg0: i32, %arg1: i32) -> (i32, i32) {
    %c0_i32 = arith.constant 0 : i32
    %c0_i32_0 = arith.constant 0 : i32
    return %arg0, %c0_i32 : i32, i32
  }
  func.func @transform_1(%arg0: i32, %arg1: i32) -> (i32, i32) {
    %c0_i32 = arith.constant 0 : i32
    %c0_i32_0 = arith.constant 0 : i32
    return %c0_i32, %arg1 : i32, i32
  }
  func.func @transform_2(%arg0: i32, %arg1: i32) -> (i32, i32) {
    %c0_i32 = arith.constant 0 : i32
    %c0_i32_0 = arith.constant 0 : i32
    return %c0_i32, %arg1 : i32, i32
  }
  func.func @transform_3(%arg0: i32, %arg1: i32) -> (i32, i32) {
    %c0_i32 = arith.constant 0 : i32
    return %arg0, %arg1 : i32, i32
  }
}

module attributes {stable_mosaic.version = 11 : i64} {
  func.func @_matmul_kernel_1k(%arg0: i32, %arg1: i32, %arg2: memref<32x128xbf16, #tpu.memory_space<vmem>>, %arg3: memref<128x128xbf16, #tpu.memory_space<vmem>>, %arg4: memref<1x128xf32, #tpu.memory_space<vmem>>, %arg5: memref<32x128xbf16, #tpu.memory_space<vmem>>) attributes {dimension_semantics = [#tpu.dimension_semantics<parallel>, #tpu.dimension_semantics<parallel>], iteration_bounds = array<i64: 1, 1>, scalar_prefetch = 0 : i64, scratch_operands = 0 : i64, tpu.core_type = #tpu.core_type<tc>, window_params = [{transform_indices = @transform_0, window_bounds = array<i64: 32, 128>}, {transform_indices = @transform_1, window_bounds = array<i64: 128, 128>}, {transform_indices = @transform_2, window_bounds = array<i64: 1, 128>}, {transform_indices = @transform_3, window_bounds = array<i64: 32, 128>}]} {
    %c0 = arith.constant 0 : index
    %c0_0 = arith.constant 0 : index
    %0 = vector.load %arg2[%c0, %c0_0] : memref<32x128xbf16, #tpu.memory_space<vmem>>, vector<32x128xbf16>
    %c0_1 = arith.constant 0 : index
    %c0_2 = arith.constant 0 : index
    %1 = vector.load %arg3[%c0_1, %c0_2] : memref<128x128xbf16, #tpu.memory_space<vmem>>, vector<128x128xbf16>
    %cst = arith.constant dense<0.000000e+00> : vector<32x128xf32>
    %2 = tpu.matmul %0, %1, %cst {dimension_numbers = #tpu.dot_dimension_numbers<[1], [0], [0], [1], [0, 0, 1, 1], [], []>} : vector<32x128xbf16>, vector<128x128xbf16>, vector<32x128xf32> -> vector<32x128xf32>
    %c0_3 = arith.constant 0 : index
    %c0_4 = arith.constant 0 : index
    %3 = vector.load %arg4[%c0_3, %c0_4] : memref<1x128xf32, #tpu.memory_space<vmem>>, vector<1x128xf32>
    %4 = vector.broadcast %3 : vector<1x128xf32> to vector<32x128xf32>
    %5 = arith.addf %2, %4 : vector<32x128xf32>
    %6 = arith.truncf %5 : vector<32x128xf32> to vector<32x128xbf16>
    %c0_5 = arith.constant 0 : index
    %c0_6 = arith.constant 0 : index
    %7 = vector.load %arg5[%c0_5, %c0_6] : memref<32x128xbf16, #tpu.memory_space<vmem>>, vector<32x128xbf16>
    tpu.vector_store %arg5[%c0_5, %c0_6], %6 {strides = array<i32>} : memref<32x128xbf16, #tpu.memory_space<vmem>>, vector<32x128xbf16>,
    return
  }
  func.func @transform_0(%arg0: i32, %arg1: i32) -> (i32, i32) {
    %c0_i32 = arith.constant 0 : i32
    %c0_i32_0 = arith.constant 0 : i32
    return %arg0, %c0_i32 : i32, i32
  }
  func.func @transform_1(%arg0: i32, %arg1: i32) -> (i32, i32) {
    %c0_i32 = arith.constant 0 : i32
    %c0_i32_0 = arith.constant 0 : i32
    return %c0_i32, %arg1 : i32, i32
  }
  func.func @transform_2(%arg0: i32, %arg1: i32) -> (i32, i32) {
    %c0_i32 = arith.constant 0 : i32
    %c0_i32_0 = arith.constant 0 : i32
    return %c0_i32, %arg1 : i32, i32
  }
  func.func @transform_3(%arg0: i32, %arg1: i32) -> (i32, i32) {
    %c0_i32 = arith.constant 0 : i32
    return %arg0, %arg1 : i32, i32
  }
}

module attributes {stable_mosaic.version = 11 : i64} {
  func.func @_afm_stats_kernel(%arg0: i32, %arg1: i32, %arg2: memref<3xf32, #tpu.memory_space<smem>>, %arg3: memref<1x5x1024xbf16, #tpu.memory_space<vmem>>, %arg4: memref<1x5x5xf32, #tpu.memory_space<vmem>>, %arg5: memref<5x128xf32, #tpu.memory_space<vmem>>, %arg6: memref<5x5xf32, #tpu.memory_space<vmem>>) attributes {dimension_semantics = [#tpu.dimension_semantics<parallel>, #tpu.dimension_semantics<arbitrary>], iteration_bounds = array<i64: 2, 1>, scalar_prefetch = 0 : i64, scratch_operands = 2 : i64, tpu.core_type = #tpu.core_type<tc>, window_params = [{transform_indices = @transform_0, window_bounds = array<i64: 3>}, {transform_indices = @transform_1, window_bounds = array<i64: 1, 5, 1024>}, {transform_indices = @transform_2, window_bounds = array<i64: 1, 5, 5>}]} {
    %c0_i32 = arith.constant 0 : i32
    %0 = arith.cmpi eq, %arg1, %c0_i32 : i32
    %1 = arith.extui %0 : i1 to i32
    %c0_i32_0 = arith.constant 0 : i32
    %2 = arith.cmpi ne, %1, %c0_i32_0 : i32
    scf.if %2 {
      %cst_14 = arith.constant 0.000000e+00 : f32
      %19 = vector.broadcast %cst_14 : f32 to vector<5x128xf32>
      %c0_15 = arith.constant 0 : index
      %c0_16 = arith.constant 0 : index
      %20 = vector.load %arg5[%c0_15, %c0_16] : memref<5x128xf32, #tpu.memory_space<vmem>>, vector<5x128xf32>
      tpu.vector_store %arg5[%c0_15, %c0_16], %19 {strides = array<i32>} : memref<5x128xf32, #tpu.memory_space<vmem>>, vector<5x128xf32>,
      %cst_17 = arith.constant 0.000000e+00 : f32
      %21 = vector.broadcast %cst_17 : f32 to vector<5x5xf32>
      %c0_18 = arith.constant 0 : index
      %c0_19 = arith.constant 0 : index
      %22 = vector.load %arg6[%c0_18, %c0_19] : memref<5x5xf32, #tpu.memory_space<vmem>>, vector<5x5xf32>
      tpu.vector_store %arg6[%c0_18, %c0_19], %21 {strides = array<i32>} : memref<5x5xf32, #tpu.memory_space<vmem>>, vector<5x5xf32>,
    } else {
    }
    %c0 = arith.constant 0 : index
    %c0_1 = arith.constant 0 : index
    %c0_2 = arith.constant 0 : index
    %3 = vector.load %arg3[%c0, %c0_1, %c0_2] : memref<1x5x1024xbf16, #tpu.memory_space<vmem>>, vector<1x5x1024xbf16>
    %4 = vector.shape_cast %3 : vector<1x5x1024xbf16> to vector<5x1024xbf16>
    %c0_3 = arith.constant 0 : index
    %c0_4 = arith.constant 0 : index
    %5 = vector.load %arg5[%c0_3, %c0_4] : memref<5x128xf32, #tpu.memory_space<vmem>>, vector<5x128xf32>
    %6 = arith.extf %4 : vector<5x1024xbf16> to vector<5x1024xf32>
    %cst = arith.constant dense<0.000000e+00> : vector<5xf32>
    %7 = vector.multi_reduction <add>, %6, %cst [1] : vector<5x1024xf32> to vector<5xf32>
    %8 = vector.shape_cast %7 : vector<5xf32> to vector<5x1xf32>
    %9 = vector.broadcast %8 : vector<5x1xf32> to vector<5x128xf32>
    %10 = arith.addf %5, %9 : vector<5x128xf32>
    %c0_5 = arith.constant 0 : index
    %c0_6 = arith.constant 0 : index
    %11 = vector.load %arg5[%c0_5, %c0_6] : memref<5x128xf32, #tpu.memory_space<vmem>>, vector<5x128xf32>
    tpu.vector_store %arg5[%c0_5, %c0_6], %10 {strides = array<i32>} : memref<5x128xf32, #tpu.memory_space<vmem>>, vector<5x128xf32>,
    %c0_7 = arith.constant 0 : index
    %c0_8 = arith.constant 0 : index
    %12 = vector.load %arg6[%c0_7, %c0_8] : memref<5x5xf32, #tpu.memory_space<vmem>>, vector<5x5xf32>
    %cst_9 = arith.constant dense<0.000000e+00> : vector<5x5xf32>
    %13 = tpu.matmul %4, %4, %cst_9 {dimension_numbers = #tpu.dot_dimension_numbers<[1], [1], [0], [0], [0, 0, 1, 0], [], []>} : vector<5x1024xbf16>, vector<5x1024xbf16>, vector<5x5xf32> -> vector<5x5xf32>
    %14 = arith.addf %12, %13 : vector<5x5xf32>
    %c0_10 = arith.constant 0 : index
    %c0_11 = arith.constant 0 : index
    %15 = vector.load %arg6[%c0_10, %c0_11] : memref<5x5xf32, #tpu.memory_space<vmem>>, vector<5x5xf32>
    tpu.vector_store %arg6[%c0_10, %c0_11], %14 {strides = array<i32>} : memref<5x5xf32, #tpu.memory_space<vmem>>, vector<5x5xf32>,
    %c0_i32_12 = arith.constant 0 : i32
    %16 = arith.cmpi eq, %arg1, %c0_i32_12 : i32
    %17 = arith.extui %16 : i1 to i32
    %c0_i32_13 = arith.constant 0 : i32
    %18 = arith.cmpi ne, %17, %c0_i32_13 : i32
    scf.if %18 {
      %c0_14 = arith.constant 0 : index
      %19 = memref.load %arg2[%c0_14] : memref<3xf32, #tpu.memory_space<smem>>
      %c1 = arith.constant 1 : index
      %20 = memref.load %arg2[%c1] : memref<3xf32, #tpu.memory_space<smem>>
      %c2 = arith.constant 2 : index
      %21 = memref.load %arg2[%c2] : memref<3xf32, #tpu.memory_space<smem>>
      %c0_15 = arith.constant 0 : index
      %c0_16 = arith.constant 0 : index
      %22 = vector.load %arg5[%c0_15, %c0_16] : memref<5x128xf32, #tpu.memory_space<vmem>>, vector<5x128xf32>
      %c0_17 = arith.constant 0 : index
      %c0_18 = arith.constant 0 : index
      %23 = vector.load %arg5[%c0_17, %c0_18] : memref<5x128xf32, #tpu.memory_space<vmem>>, vector<5x128xf32>
      %cst_19 = arith.constant dense<0.000000e+00> : vector<5x5xf32>
      %24 = tpu.matmul %22, %23, %cst_19 {dimension_numbers = #tpu.dot_dimension_numbers<[1], [1], [0], [0], [0, 0, 1, 0], [], []>} : vector<5x128xf32>, vector<5x128xf32>, vector<5x5xf32> -> vector<5x5xf32>
      %cst_20 = arith.constant 7.812500e-03 : f32
      %25 = vector.broadcast %cst_20 : f32 to vector<5x5xf32>
      %26 = arith.mulf %24, %25 : vector<5x5xf32>
      %c0_21 = arith.constant 0 : index
      %c0_22 = arith.constant 0 : index
      %27 = vector.load %arg6[%c0_21, %c0_22] : memref<5x5xf32, #tpu.memory_space<vmem>>, vector<5x5xf32>
      %cst_23 = arith.constant 9.765625E-4 : f32
      %28 = vector.broadcast %cst_23 : f32 to vector<5x5xf32>
      %29 = arith.mulf %26, %28 : vector<5x5xf32>
      %30 = arith.subf %27, %29 : vector<5x5xf32>
      %cst_24 = arith.constant 1.023000e+03 : f32
      %31 = arith.divf %19, %cst_24 : f32
      %32 = vector.broadcast %31 : f32 to vector<5x5xf32>
      %33 = arith.mulf %30, %32 : vector<5x5xf32>
      %34 = arith.mulf %33, %33 : vector<5x5xf32>
      %35 = vector.shape_cast %34 : vector<5x5xf32> to vector<1x5x5xf32>
      %cst_25 = arith.constant dense<0.000000e+00> : vector<1xf32>
      %36 = vector.multi_reduction <add>, %35, %cst_25 [1, 2] : vector<1x5x5xf32> to vector<1xf32>
      %37 = vector.shape_cast %36 : vector<1xf32> to vector<1x1x1xf32>
      %38 = vector.extract %37[0, 0, 0] : f32 from vector<1x1x1xf32>
      %cst_26 = arith.constant 4.000000e-02 : f32
      %39 = arith.mulf %38, %cst_26 : f32
      %cst_27 = arith.constant 9.99999974E-6 : f32
      %40 = arith.addf %39, %cst_27 : f32
      %41 = vector.broadcast %20 : f32 to vector<5x5xf32>
      %42 = arith.mulf %41, %33 : vector<5x5xf32>
      %43 = math.rsqrt %40 : f32
      %44 = vector.broadcast %43 : f32 to vector<5x5xf32>
      %45 = arith.mulf %42, %44 : vector<5x5xf32>
      %46 = vector.broadcast %21 : f32 to vector<5x5xf32>
      %47 = arith.addf %45, %46 : vector<5x5xf32>
      %48 = math.tanh %47 : vector<5x5xf32>
      %c0_28 = arith.constant 0 : index
      %c0_29 = arith.constant 0 : index
      %c0_30 = arith.constant 0 : index
      %49 = vector.load %arg4[%c0_28, %c0_29, %c0_30] : memref<1x5x5xf32, #tpu.memory_space<vmem>>, vector<1x5x5xf32>
      %50 = vector.shape_cast %49 : vector<1x5x5xf32> to vector<5x5xf32>
      %51 = vector.shape_cast %48 : vector<5x5xf32> to vector<1x5x5xf32>
      tpu.vector_store %arg4[%c0_28, %c0_29, %c0_30], %51 {strides = array<i32>} : memref<1x5x5xf32, #tpu.memory_space<vmem>>, vector<1x5x5xf32>,
    } else {
    }
    return
  }
  func.func @transform_0(%arg0: i32, %arg1: i32) -> i32 {
    %c0_i32 = arith.constant 0 : i32
    %c0_i32_0 = arith.constant 0 : i32
    return %c0_i32 : i32
  }
  func.func @transform_1(%arg0: i32, %arg1: i32) -> (i32, i32, i32) {
    %c0_i32 = arith.constant 0 : i32
    %c0_i32_0 = arith.constant 0 : i32
    return %arg0, %c0_i32, %arg1 : i32, i32, i32
  }
  func.func @transform_2(%arg0: i32, %arg1: i32) -> (i32, i32, i32) {
    %c0_i32 = arith.constant 0 : i32
    %c0_i32_0 = arith.constant 0 : i32
    %c0_i32_1 = arith.constant 0 : i32
    return %arg0, %c0_i32, %c0_i32_0 : i32, i32, i32
  }
}

module attributes {stable_mosaic.version = 11 : i64} {
  func.func @_afm_apply_kernel(%arg0: i32, %arg1: i32, %arg2: memref<1x5x256x4xbf16, #tpu.memory_space<vmem>>, %arg3: memref<1x5x4x4xbf16, #tpu.memory_space<vmem>>, %arg4: memref<1x256x4xf32, #tpu.memory_space<vmem>>) attributes {dimension_semantics = [#tpu.dimension_semantics<parallel>, #tpu.dimension_semantics<parallel>], iteration_bounds = array<i64: 2, 1>, scalar_prefetch = 0 : i64, scratch_operands = 0 : i64, tpu.core_type = #tpu.core_type<tc>, window_params = [{transform_indices = @transform_0, window_bounds = array<i64: 1, 5, 256, 4>}, {transform_indices = @transform_1, window_bounds = array<i64: 1, 5, 4, 4>}, {transform_indices = @transform_2, window_bounds = array<i64: 1, 256, 4>}]} {
    %c0 = arith.constant 0 : index
    %c0_0 = arith.constant 0 : index
    %c0_1 = arith.constant 0 : index
    %c0_2 = arith.constant 0 : index
    %0 = vector.load %arg2[%c0, %c0_0, %c0_1, %c0_2] : memref<1x5x256x4xbf16, #tpu.memory_space<vmem>>, vector<1x1x256x4xbf16>
    %1 = vector.shape_cast %0 : vector<1x1x256x4xbf16> to vector<256x4xbf16>
    %c0_3 = arith.constant 0 : index
    %c0_4 = arith.constant 0 : index
    %c0_5 = arith.constant 0 : index
    %c0_6 = arith.constant 0 : index
    %2 = vector.load %arg3[%c0_3, %c0_4, %c0_5, %c0_6] : memref<1x5x4x4xbf16, #tpu.memory_space<vmem>>, vector<1x1x4x4xbf16>
    %3 = vector.shape_cast %2 : vector<1x1x4x4xbf16> to vector<4x4xbf16>
    %cst = arith.constant dense<0.000000e+00> : vector<256x4xf32>
    %4 = tpu.matmul %1, %3, %cst {dimension_numbers = #tpu.dot_dimension_numbers<[1], [0], [0], [1], [0, 0, 1, 1], [], []>} : vector<256x4xbf16>, vector<4x4xbf16>, vector<256x4xf32> -> vector<256x4xf32>
    %c0_7 = arith.constant 0 : index
    %c1 = arith.constant 1 : index
    %c0_8 = arith.constant 0 : index
    %c0_9 = arith.constant 0 : index
    %5 = vector.load %arg2[%c0_7, %c1, %c0_8, %c0_9] : memref<1x5x256x4xbf16, #tpu.memory_space<vmem>>, vector<1x1x256x4xbf16>
    %6 = vector.shape_cast %5 : vector<1x1x256x4xbf16> to vector<256x4xbf16>
    %c0_10 = arith.constant 0 : index
    %c1_11 = arith.constant 1 : index
    %c0_12 = arith.constant 0 : index
    %c0_13 = arith.constant 0 : index
    %7 = vector.load %arg3[%c0_10, %c1_11, %c0_12, %c0_13] : memref<1x5x4x4xbf16, #tpu.memory_space<vmem>>, vector<1x1x4x4xbf16>
    %8 = vector.shape_cast %7 : vector<1x1x4x4xbf16> to vector<4x4xbf16>
    %cst_14 = arith.constant dense<0.000000e+00> : vector<256x4xf32>
    %9 = tpu.matmul %6, %8, %cst_14 {dimension_numbers = #tpu.dot_dimension_numbers<[1], [0], [0], [1], [0, 0, 1, 1], [], []>} : vector<256x4xbf16>, vector<4x4xbf16>, vector<256x4xf32> -> vector<256x4xf32>
    %10 = arith.addf %4, %9 : vector<256x4xf32>
    %c0_15 = arith.constant 0 : index
    %c2 = arith.constant 2 : index
    %c0_16 = arith.constant 0 : index
    %c0_17 = arith.constant 0 : index
    %11 = vector.load %arg2[%c0_15, %c2, %c0_16, %c0_17] : memref<1x5x256x4xbf16, #tpu.memory_space<vmem>>, vector<1x1x256x4xbf16>
    %12 = vector.shape_cast %11 : vector<1x1x256x4xbf16> to vector<256x4xbf16>
    %c0_18 = arith.constant 0 : index
    %c2_19 = arith.constant 2 : index
    %c0_20 = arith.constant 0 : index
    %c0_21 = arith.constant 0 : index
    %13 = vector.load %arg3[%c0_18, %c2_19, %c0_20, %c0_21] : memref<1x5x4x4xbf16, #tpu.memory_space<vmem>>, vector<1x1x4x4xbf16>
    %14 = vector.shape_cast %13 : vector<1x1x4x4xbf16> to vector<4x4xbf16>
    %cst_22 = arith.constant dense<0.000000e+00> : vector<256x4xf32>
    %15 = tpu.matmul %12, %14, %cst_22 {dimension_numbers = #tpu.dot_dimension_numbers<[1], [0], [0], [1], [0, 0, 1, 1], [], []>} : vector<256x4xbf16>, vector<4x4xbf16>, vector<256x4xf32> -> vector<256x4xf32>
    %16 = arith.addf %10, %15 : vector<256x4xf32>
    %c0_23 = arith.constant 0 : index
    %c3 = arith.constant 3 : index
    %c0_24 = arith.constant 0 : index
    %c0_25 = arith.constant 0 : index
    %17 = vector.load %arg2[%c0_23, %c3, %c0_24, %c0_25] : memref<1x5x256x4xbf16, #tpu.memory_space<vmem>>, vector<1x1x256x4xbf16>
    %18 = vector.shape_cast %17 : vector<1x1x256x4xbf16> to vector<256x4xbf16>
    %c0_26 = arith.constant 0 : index
    %c3_27 = arith.constant 3 : index
    %c0_28 = arith.constant 0 : index
    %c0_29 = arith.constant 0 : index
    %19 = vector.load %arg3[%c0_26, %c3_27, %c0_28, %c0_29] : memref<1x5x4x4xbf16, #tpu.memory_space<vmem>>, vector<1x1x4x4xbf16>
    %20 = vector.shape_cast %19 : vector<1x1x4x4xbf16> to vector<4x4xbf16>
    %cst_30 = arith.constant dense<0.000000e+00> : vector<256x4xf32>
    %21 = tpu.matmul %18, %20, %cst_30 {dimension_numbers = #tpu.dot_dimension_numbers<[1], [0], [0], [1], [0, 0, 1, 1], [], []>} : vector<256x4xbf16>, vector<4x4xbf16>, vector<256x4xf32> -> vector<256x4xf32>
    %22 = arith.addf %16, %21 : vector<256x4xf32>
    %c0_31 = arith.constant 0 : index
    %c4 = arith.constant 4 : index
    %c0_32 = arith.constant 0 : index
    %c0_33 = arith.constant 0 : index
    %23 = vector.load %arg2[%c0_31, %c4, %c0_32, %c0_33] : memref<1x5x256x4xbf16, #tpu.memory_space<vmem>>, vector<1x1x256x4xbf16>
    %24 = vector.shape_cast %23 : vector<1x1x256x4xbf16> to vector<256x4xbf16>
    %c0_34 = arith.constant 0 : index
    %c4_35 = arith.constant 4 : index
    %c0_36 = arith.constant 0 : index
    %c0_37 = arith.constant 0 : index
    %25 = vector.load %arg3[%c0_34, %c4_35, %c0_36, %c0_37] : memref<1x5x4x4xbf16, #tpu.memory_space<vmem>>, vector<1x1x4x4xbf16>
    %26 = vector.shape_cast %25 : vector<1x1x4x4xbf16> to vector<4x4xbf16>
    %cst_38 = arith.constant dense<0.000000e+00> : vector<256x4xf32>
    %27 = tpu.matmul %24, %26, %cst_38 {dimension_numbers = #tpu.dot_dimension_numbers<[1], [0], [0], [1], [0, 0, 1, 1], [], []>} : vector<256x4xbf16>, vector<4x4xbf16>, vector<256x4xf32> -> vector<256x4xf32>
    %28 = arith.addf %22, %27 : vector<256x4xf32>
    %c0_39 = arith.constant 0 : index
    %c0_40 = arith.constant 0 : index
    %c0_41 = arith.constant 0 : index
    %29 = vector.load %arg4[%c0_39, %c0_40, %c0_41] : memref<1x256x4xf32, #tpu.memory_space<vmem>>, vector<1x256x4xf32>
    %30 = vector.shape_cast %29 : vector<1x256x4xf32> to vector<256x4xf32>
    %31 = vector.shape_cast %28 : vector<256x4xf32> to vector<1x256x4xf32>
    tpu.vector_store %arg4[%c0_39, %c0_40, %c0_41], %31 {strides = array<i32>} : memref<1x256x4xf32, #tpu.memory_space<vmem>>, vector<1x256x4xf32>,
    return
  }
  func.func @transform_0(%arg0: i32, %arg1: i32) -> (i32, i32, i32, i32) {
    %c0_i32 = arith.constant 0 : i32
    %c0_i32_0 = arith.constant 0 : i32
    %c0_i32_1 = arith.constant 0 : i32
    return %arg0, %c0_i32, %arg1, %c0_i32_0 : i32, i32, i32, i32
  }
  func.func @transform_1(%arg0: i32, %arg1: i32) -> (i32, i32, i32, i32) {
    %c0_i32 = arith.constant 0 : i32
    %c0_i32_0 = arith.constant 0 : i32
    %c0_i32_1 = arith.constant 0 : i32
    %c0_i32_2 = arith.constant 0 : i32
    return %arg0, %c0_i32, %c0_i32_0, %c0_i32_1 : i32, i32, i32, i32
  }
  func.func @transform_2(%arg0: i32, %arg1: i32) -> (i32, i32, i32) {
    %c0_i32 = arith.constant 0 : i32
    %c0_i32_0 = arith.constant 0 : i32
    return %arg0, %arg1, %c0_i32 : i32, i32, i32
  }
}

module attributes {stable_mosaic.version = 11 : i64} {
  func.func @_matmul_kernel_1k(%arg0: i32, %arg1: i32, %arg2: memref<512x128xbf16, #tpu.memory_space<vmem>>, %arg3: memref<128x128xbf16, #tpu.memory_space<vmem>>, %arg4: memref<1x128xf32, #tpu.memory_space<vmem>>, %arg5: memref<512x128xbf16, #tpu.memory_space<vmem>>) attributes {dimension_semantics = [#tpu.dimension_semantics<parallel>, #tpu.dimension_semantics<parallel>], iteration_bounds = array<i64: 1, 1>, scalar_prefetch = 0 : i64, scratch_operands = 0 : i64, tpu.core_type = #tpu.core_type<tc>, window_params = [{transform_indices = @transform_0, window_bounds = array<i64: 512, 128>}, {transform_indices = @transform_1, window_bounds = array<i64: 128, 128>}, {transform_indices = @transform_2, window_bounds = array<i64: 1, 128>}, {transform_indices = @transform_3, window_bounds = array<i64: 512, 128>}]} {
    %c0 = arith.constant 0 : index
    %c0_0 = arith.constant 0 : index
    %0 = vector.load %arg2[%c0, %c0_0] : memref<512x128xbf16, #tpu.memory_space<vmem>>, vector<512x128xbf16>
    %c0_1 = arith.constant 0 : index
    %c0_2 = arith.constant 0 : index
    %1 = vector.load %arg3[%c0_1, %c0_2] : memref<128x128xbf16, #tpu.memory_space<vmem>>, vector<128x128xbf16>
    %cst = arith.constant dense<0.000000e+00> : vector<512x128xf32>
    %2 = tpu.matmul %0, %1, %cst {dimension_numbers = #tpu.dot_dimension_numbers<[1], [0], [0], [1], [0, 0, 1, 1], [], []>} : vector<512x128xbf16>, vector<128x128xbf16>, vector<512x128xf32> -> vector<512x128xf32>
    %c0_3 = arith.constant 0 : index
    %c0_4 = arith.constant 0 : index
    %3 = vector.load %arg4[%c0_3, %c0_4] : memref<1x128xf32, #tpu.memory_space<vmem>>, vector<1x128xf32>
    %4 = vector.broadcast %3 : vector<1x128xf32> to vector<512x128xf32>
    %5 = arith.addf %2, %4 : vector<512x128xf32>
    %cst_5 = arith.constant 0.000000e+00 : f32
    %6 = vector.broadcast %cst_5 : f32 to vector<512x128xf32>
    %7 = arith.maximumf %5, %6 : vector<512x128xf32>
    %8 = arith.truncf %7 : vector<512x128xf32> to vector<512x128xbf16>
    %c0_6 = arith.constant 0 : index
    %c0_7 = arith.constant 0 : index
    %9 = vector.load %arg5[%c0_6, %c0_7] : memref<512x128xbf16, #tpu.memory_space<vmem>>, vector<512x128xbf16>
    tpu.vector_store %arg5[%c0_6, %c0_7], %8 {strides = array<i32>} : memref<512x128xbf16, #tpu.memory_space<vmem>>, vector<512x128xbf16>,
    return
  }
  func.func @transform_0(%arg0: i32, %arg1: i32) -> (i32, i32) {
    %c0_i32 = arith.constant 0 : i32
    %c0_i32_0 = arith.constant 0 : i32
    return %arg0, %c0_i32 : i32, i32
  }
  func.func @transform_1(%arg0: i32, %arg1: i32) -> (i32, i32) {
    %c0_i32 = arith.constant 0 : i32
    %c0_i32_0 = arith.constant 0 : i32
    return %c0_i32, %arg1 : i32, i32
  }
  func.func @transform_2(%arg0: i32, %arg1: i32) -> (i32, i32) {
    %c0_i32 = arith.constant 0 : i32
    %c0_i32_0 = arith.constant 0 : i32
    return %c0_i32, %arg1 : i32, i32
  }
  func.func @transform_3(%arg0: i32, %arg1: i32) -> (i32, i32) {
    %c0_i32 = arith.constant 0 : i32
    return %arg0, %arg1 : i32, i32
  }
}

module attributes {stable_mosaic.version = 11 : i64} {
  func.func @_matmul_kernel_1k(%arg0: i32, %arg1: i32, %arg2: memref<512x128xbf16, #tpu.memory_space<vmem>>, %arg3: memref<128x128xbf16, #tpu.memory_space<vmem>>, %arg4: memref<1x128xf32, #tpu.memory_space<vmem>>, %arg5: memref<512x128xf32, #tpu.memory_space<vmem>>) attributes {dimension_semantics = [#tpu.dimension_semantics<parallel>, #tpu.dimension_semantics<parallel>], iteration_bounds = array<i64: 1, 1>, scalar_prefetch = 0 : i64, scratch_operands = 0 : i64, tpu.core_type = #tpu.core_type<tc>, window_params = [{transform_indices = @transform_0, window_bounds = array<i64: 512, 128>}, {transform_indices = @transform_1, window_bounds = array<i64: 128, 128>}, {transform_indices = @transform_2, window_bounds = array<i64: 1, 128>}, {transform_indices = @transform_3, window_bounds = array<i64: 512, 128>}]} {
    %c0 = arith.constant 0 : index
    %c0_0 = arith.constant 0 : index
    %0 = vector.load %arg2[%c0, %c0_0] : memref<512x128xbf16, #tpu.memory_space<vmem>>, vector<512x128xbf16>
    %c0_1 = arith.constant 0 : index
    %c0_2 = arith.constant 0 : index
    %1 = vector.load %arg3[%c0_1, %c0_2] : memref<128x128xbf16, #tpu.memory_space<vmem>>, vector<128x128xbf16>
    %cst = arith.constant dense<0.000000e+00> : vector<512x128xf32>
    %2 = tpu.matmul %0, %1, %cst {dimension_numbers = #tpu.dot_dimension_numbers<[1], [0], [0], [1], [0, 0, 1, 1], [], []>} : vector<512x128xbf16>, vector<128x128xbf16>, vector<512x128xf32> -> vector<512x128xf32>
    %c0_3 = arith.constant 0 : index
    %c0_4 = arith.constant 0 : index
    %3 = vector.load %arg4[%c0_3, %c0_4] : memref<1x128xf32, #tpu.memory_space<vmem>>, vector<1x128xf32>
    %4 = vector.broadcast %3 : vector<1x128xf32> to vector<512x128xf32>
    %5 = arith.addf %2, %4 : vector<512x128xf32>
    %c0_5 = arith.constant 0 : index
    %c0_6 = arith.constant 0 : index
    %6 = vector.load %arg5[%c0_5, %c0_6] : memref<512x128xf32, #tpu.memory_space<vmem>>, vector<512x128xf32>
    tpu.vector_store %arg5[%c0_5, %c0_6], %5 {strides = array<i32>} : memref<512x128xf32, #tpu.memory_space<vmem>>, vector<512x128xf32>,
    return
  }
  func.func @transform_0(%arg0: i32, %arg1: i32) -> (i32, i32) {
    %c0_i32 = arith.constant 0 : i32
    %c0_i32_0 = arith.constant 0 : i32
    return %arg0, %c0_i32 : i32, i32
  }
  func.func @transform_1(%arg0: i32, %arg1: i32) -> (i32, i32) {
    %c0_i32 = arith.constant 0 : i32
    %c0_i32_0 = arith.constant 0 : i32
    return %c0_i32, %arg1 : i32, i32
  }
  func.func @transform_2(%arg0: i32, %arg1: i32) -> (i32, i32) {
    %c0_i32 = arith.constant 0 : i32
    %c0_i32_0 = arith.constant 0 : i32
    return %c0_i32, %arg1 : i32, i32
  }
  func.func @transform_3(%arg0: i32, %arg1: i32) -> (i32, i32) {
    %c0_i32 = arith.constant 0 : i32
    return %arg0, %arg1 : i32, i32
  }
}

</mosaic_0001>

<bundles_post_ra>
// kernel: hfem_forward.15
= control target key start
LH: loop header
LB: loop body
LE: loop exit
PB: predicated region body
PF: predicated region fallthrough
CT: control target
= control target key end

     0   :  { %s1360_s1 = inlined_call_operand.vmem [shape: bf16[128,128], index: 1, kind: input, shape index: {}]   ;;  %s1361_s2 = inlined_call_operand.vmem [shape: f32[1,128], index: 2, kind: input, shape index: {}]   ;;  %s1362_s0 = inlined_call_operand.vmem [shape: bf16[512,128], index: 0, kind: input, shape index: {}]   ;;  %s1363_s3 = inlined_call_operand.vmem [shape: bf16[512,128], index: 3, kind: output, shape index: {}]  }
   0x1   :  { %v838_v0 = vld [vmem:[%s1360_s1 + $0x38] sm:$0xff]  ;;  %v837_v1 = vld [vmem:[%s1360_s1 + $0x30] sm:$0xff]  ;;  %v836_v2 = vld [vmem:[%s1360_s1 + $0x28] sm:$0xff] }
   0x2   :  { %338 = vmatpush.bf16.msra.mxu0 %v838_v0  ;;  %1030 = vmatpush.bf16.msra.mxu1 %v838_v0  ;;  %v835_v3 = vld [vmem:[%s1360_s1 + $0x20] sm:$0xff]  ;;  %v834_v4 = vld [vmem:[%s1360_s1 + $0x18] sm:$0xff]  ;;  %v833_v5 = vld [vmem:[%s1360_s1 + $0x10] sm:$0xff] }
   0x3   :  { %1031 = vmatpush.bf16.msra.mxu2 %v838_v0  ;;  %1032 = vmatpush.bf16.msra.mxu3 %v838_v0  ;;  %v832_v6 = vld [vmem:[%s1360_s1 + $0x8] sm:$0xff]  ;;  %v831_v7 = vld [vmem:[%s1360_s1] sm:$0xff]  ;;  %v801_v16 = vld [vmem:[%s1362_s0 + $0x10] sm:$0xff] }
   0x4   :  { %v799_v8 = vld [vmem:[%s1362_s0] sm:$0xff]  ;;  %v800_v12 = vld [vmem:[%s1362_s0 + $0x8] sm:$0xff]  ;;  %v809_v17 = vld [vmem:[%s1362_s0 + $0x50] sm:$0xff] }
   0x5   :  { %v807_v9 = vld [vmem:[%s1362_s0 + $0x40] sm:$0xff]  ;;  %v808_v13 = vld [vmem:[%s1362_s0 + $0x48] sm:$0xff]  ;;  %v817_v18 = vld [vmem:[%s1362_s0 + $0x90] sm:$0xff] }
   0x6   :  { %339 = vmatpush.bf16.msra.mxu0 %v837_v1  ;;  %1033 = vmatpush.bf16.msra.mxu1 %v837_v1  ;;  %v815_v10 = vld [vmem:[%s1362_s0 + $0x80] sm:$0xff]  ;;  %v816_v14 = vld [vmem:[%s1362_s0 + $0x88] sm:$0xff]  ;;  %v825_v19 = vld [vmem:[%s1362_s0 + $0xd0] sm:$0xff] }
   0x7   :  { %1034 = vmatpush.bf16.msra.mxu2 %v837_v1  ;;  %1035 = vmatpush.bf16.msra.mxu3 %v837_v1  ;;  %v823_v11 = vld [vmem:[%s1362_s0 + $0xc0] sm:$0xff]  ;;  %v824_v15 = vld [vmem:[%s1362_s0 + $0xc8] sm:$0xff]  ;;  %v802_v20 = vld [vmem:[%s1362_s0 + $0x18] sm:$0xff] }
   0x8   :  { %v810_v21 = vld [vmem:[%s1362_s0 + $0x58] sm:$0xff]  ;;  %v803_v24 = vld [vmem:[%s1362_s0 + $0x20] sm:$0xff]  ;;  %v804_v28 = vld [vmem:[%s1362_s0 + $0x28] sm:$0xff] }
   0x9   :  { %v818_v22 = vld [vmem:[%s1362_s0 + $0x98] sm:$0xff]  ;;  %v811_v25 = vld [vmem:[%s1362_s0 + $0x60] sm:$0xff]  ;;  %v812_v29 = vld [vmem:[%s1362_s0 + $0x68] sm:$0xff] }
   0xa   :  { %340 = vmatpush.bf16.msra.mxu0 %v836_v2  ;;  %1036 = vmatpush.bf16.msra.mxu1 %v836_v2  ;;  %v826_v23 = vld [vmem:[%s1362_s0 + $0xd8] sm:$0xff]  ;;  %v819_v26 = vld [vmem:[%s1362_s0 + $0xa0] sm:$0xff]  ;;  %v820_v30 = vld [vmem:[%s1362_s0 + $0xa8] sm:$0xff] }
   0xb   :  { %1037 = vmatpush.bf16.msra.mxu2 %v836_v2  ;;  %1038 = vmatpush.bf16.msra.mxu3 %v836_v2  ;;  %v827_v27 = vld [vmem:[%s1362_s0 + $0xe0] sm:$0xff]  ;;  %v828_v31 = vld [vmem:[%s1362_s0 + $0xe8] sm:$0xff]  ;;  %v805_v32 = vld [vmem:[%s1362_s0 + $0x30] sm:$0xff] }
   0xc   :  { %v813_v33 = vld [vmem:[%s1362_s0 + $0x70] sm:$0xff]  ;;  %v806_v36 = vld [vmem:[%s1362_s0 + $0x38] sm:$0xff]  ;;  %v1198_v42 = vld [vmem:[%s1361_s2] ss:$0 sm:$0xff] }
   0xd   :  { %v821_v34 = vld [vmem:[%s1362_s0 + $0xb0] sm:$0xff]  ;;  %v814_v37 = vld [vmem:[%s1362_s0 + $0x78] sm:$0xff] }
   0xe   :  { %341 = vmatpush.bf16.msra.mxu0 %v835_v3  ;;  %1039 = vmatpush.bf16.msra.mxu1 %v835_v3  ;;  %v829_v35 = vld [vmem:[%s1362_s0 + $0xf0] sm:$0xff]  ;;  %v822_v38 = vld [vmem:[%s1362_s0 + $0xb8] sm:$0xff] }
   0xf   :  { %1040 = vmatpush.bf16.msra.mxu2 %v835_v3  ;;  %1041 = vmatpush.bf16.msra.mxu3 %v835_v3  ;;  %v830_v39 = vld [vmem:[%s1362_s0 + $0xf8] sm:$0xff] }
  0x12   :  { %342 = vmatpush.bf16.msra.mxu0 %v834_v4  ;;  %1042 = vmatpush.bf16.msra.mxu1 %v834_v4 }
  0x13   :  { %1043 = vmatpush.bf16.msra.mxu2 %v834_v4  ;;  %1044 = vmatpush.bf16.msra.mxu3 %v834_v4 }
  0x16   :  { %343 = vmatpush.bf16.msra.mxu0 %v833_v5  ;;  %1045 = vmatpush.bf16.msra.mxu1 %v833_v5 }
  0x17   :  { %1046 = vmatpush.bf16.msra.mxu2 %v833_v5  ;;  %1047 = vmatpush.bf16.msra.mxu3 %v833_v5 }
  0x1a   :  { %344 = vmatpush.bf16.msra.mxu0 %v832_v6  ;;  %1048 = vmatpush.bf16.msra.mxu1 %v832_v6 }
  0x1b   :  { %1049 = vmatpush.bf16.msra.mxu2 %v832_v6  ;;  %1050 = vmatpush.bf16.msra.mxu3 %v832_v6 }
  0x1e   :  { %345 = vmatpush.bf16.msra.mxu0 %v831_v7  ;;  %1051 = vmatpush.bf16.msra.mxu1 %v831_v7 }
  0x1f   :  { %1052 = vmatpush.bf16.msra.mxu2 %v831_v7  ;;  %1053 = vmatpush.bf16.msra.mxu3 %v831_v7 }
  0x21   :  { %346 = vmatmul.bf16.vlgmr.msra.gmra.mxu0 %v799_v8  ;;  %386 = vmatmul.bf16.vlgmr.msra.gmra.mxu1 %v807_v9 }
  0x22   :  { %426 = vmatmul.bf16.vlgmr.msra.gmra.mxu2 %v815_v10  ;;  %466 = vmatmul.bf16.vlgmr.msra.gmra.mxu3 %v823_v11 }
  0x31   :  { %351 = vmatmul.bf16.gmra.mxu0 %v800_v12  ;;  %391 = vmatmul.bf16.gmra.mxu1 %v808_v13 }
  0x32   :  { %431 = vmatmul.bf16.gmra.mxu2 %v816_v14  ;;  %471 = vmatmul.bf16.gmra.mxu3 %v824_v15 }
  0x41   :  { %356 = vmatmul.bf16.gmra.mxu0 %v801_v16  ;;  %396 = vmatmul.bf16.gmra.mxu1 %v809_v17 }
  0x42   :  { %436 = vmatmul.bf16.gmra.mxu2 %v817_v18  ;;  %476 = vmatmul.bf16.gmra.mxu3 %v825_v19 }
  0x51   :  { %361 = vmatmul.bf16.gmra.mxu0 %v802_v20  ;;  %401 = vmatmul.bf16.gmra.mxu1 %v810_v21 }
  0x52   :  { %441 = vmatmul.bf16.gmra.mxu2 %v818_v22  ;;  %481 = vmatmul.bf16.gmra.mxu3 %v826_v23 }
  0x61   :  { %366 = vmatmul.bf16.gmra.mxu0 %v803_v24  ;;  %406 = vmatmul.bf16.gmra.mxu1 %v811_v25 }
  0x62   :  { %446 = vmatmul.bf16.gmra.mxu2 %v819_v26  ;;  %486 = vmatmul.bf16.gmra.mxu3 %v827_v27 }
  0x71   :  { %371 = vmatmul.bf16.gmra.mxu0 %v804_v28  ;;  %411 = vmatmul.bf16.gmra.mxu1 %v812_v29 }
  0x72   :  { %451 = vmatmul.bf16.gmra.mxu2 %v820_v30  ;;  %491 = vmatmul.bf16.gmra.mxu3 %v828_v31 }
  0x81   :  { %376 = vmatmul.bf16.gmra.mxu0 %v805_v32  ;;  %416 = vmatmul.bf16.gmra.mxu1 %v813_v33 }
  0x82   :  { %456 = vmatmul.bf16.gmra.mxu2 %v821_v34  ;;  %496 = vmatmul.bf16.gmra.mxu3 %v829_v35 }
  0x91   :  { %381 = vmatmul.bf16.gmra.mxu0 %v806_v36  ;;  %421 = vmatmul.bf16.gmra.mxu1 %v814_v37 }
  0x92   :  { %461 = vmatmul.bf16.gmra.mxu2 %v822_v38  ;;  %501 = vmatmul.bf16.gmra.mxu3 %v830_v39 }
  0x9e   :  { %v347_v40 = vpop.f32.mrf.mxu0  ;;  %v387_v41 = vpop.f32.mrf.mxu1 }
  0x9f   :  { %v348_v47 = vadd.f32 %v1198_v42, %v347_v40  ;;  %v388_v48 = vadd.f32 %v1198_v42, %v387_v41 }
  0xa5   :  { %v427_v43 = vpop.f32.mrf.mxu2  ;;  %v467_v44 = vpop.f32.mrf.mxu3 }
  0xa6   :  { %v349_v45 = vpop.f32.mrf.mxu0  ;;  %v389_v46 = vpop.f32.mrf.mxu1  ;;  %v428_v55 = vadd.f32 %v1198_v42, %v427_v43  ;;  %v468_v56 = vadd.f32 %v1198_v42, %v467_v44 }
  0xa7   :  { %v350_v49 = vadd.f32 %v1198_v42, %v349_v45  ;;  %v390_v50 = vadd.f32 %v1198_v42, %v389_v46 }
  0xa9   :  { %v842_v51 = vpack.c.bf16 %v350_v49, %v348_v47  ;;  %v882_v52 = vpack.c.bf16 %v390_v50, %v388_v48 }
  0xab   :  { %843 = vst [vmem:[%s1363_s3] sm:$0xff] %v842_v51  }
  0xac   :  { %1006 = vst [vmem:[%s1363_s3 + $0x40] sm:$0xff] %v882_v52  }
  0xad   :  { %v429_v53 = vpop.f32.mrf.mxu2  ;;  %v469_v54 = vpop.f32.mrf.mxu3 }
  0xae   :  { %v430_v57 = vadd.f32 %v1198_v42, %v429_v53  ;;  %v470_v58 = vadd.f32 %v1198_v42, %v469_v54  ;;  %v352_v59 = vpop.f32.mrf.mxu0  ;;  %v392_v60 = vpop.f32.mrf.mxu1 }
  0xaf   :  { %v353_v3 = vadd.f32 %v1198_v42, %v352_v59  ;;  %v393_v4 = vadd.f32 %v1198_v42, %v392_v60 }
  0xb0   :  { %v922_v61 = vpack.c.bf16 %v430_v57, %v428_v55  ;;  %v962_v62 = vpack.c.bf16 %v470_v58, %v468_v56 }
  0xb2   :  { %1014 = vst [vmem:[%s1363_s3 + $0x80] sm:$0xff] %v922_v61  }
  0xb3   :  { %1022 = vst [vmem:[%s1363_s3 + $0xc0] sm:$0xff] %v962_v62  }
  0xb5   :  { %v432_v63 = vpop.f32.mrf.mxu2  ;;  %v472_v0 = vpop.f32.mrf.mxu3 }
  0xb6   :  { %v354_v1 = vpop.f32.mrf.mxu0  ;;  %v394_v2 = vpop.f32.mrf.mxu1  ;;  %v433_v11 = vadd.f32 %v1198_v42, %v432_v63  ;;  %v473_v12 = vadd.f32 %v1198_v42, %v472_v0 }
  0xb7   :  { %v355_v5 = vadd.f32 %v1198_v42, %v354_v1  ;;  %v395_v6 = vadd.f32 %v1198_v42, %v394_v2 }
  0xb9   :  { %v847_v7 = vpack.c.bf16 %v355_v5, %v353_v3  ;;  %v887_v8 = vpack.c.bf16 %v395_v6, %v393_v4 }
  0xbb   :  { %999 = vst [vmem:[%s1363_s3 + $0x8] sm:$0xff] %v847_v7  }
  0xbc   :  { %1007 = vst [vmem:[%s1363_s3 + $0x48] sm:$0xff] %v887_v8  }
  0xbd   :  { %v434_v9 = vpop.f32.mrf.mxu2  ;;  %v474_v10 = vpop.f32.mrf.mxu3 }
  0xbe   :  { %v435_v13 = vadd.f32 %v1198_v42, %v434_v9  ;;  %v475_v14 = vadd.f32 %v1198_v42, %v474_v10  ;;  %v357_v15 = vpop.f32.mrf.mxu0  ;;  %v397_v16 = vpop.f32.mrf.mxu1 }
  0xbf   :  { %v358_v23 = vadd.f32 %v1198_v42, %v357_v15  ;;  %v398_v24 = vadd.f32 %v1198_v42, %v397_v16 }
  0xc0   :  { %v927_v17 = vpack.c.bf16 %v435_v13, %v433_v11  ;;  %v967_v18 = vpack.c.bf16 %v475_v14, %v473_v12 }
  0xc2   :  { %1015 = vst [vmem:[%s1363_s3 + $0x88] sm:$0xff] %v927_v17  }
  0xc3   :  { %1023 = vst [vmem:[%s1363_s3 + $0xc8] sm:$0xff] %v967_v18  }
  0xc5   :  { %v437_v19 = vpop.f32.mrf.mxu2  ;;  %v477_v20 = vpop.f32.mrf.mxu3 }
  0xc6   :  { %v359_v21 = vpop.f32.mrf.mxu0  ;;  %v399_v22 = vpop.f32.mrf.mxu1  ;;  %v438_v31 = vadd.f32 %v1198_v42, %v437_v19  ;;  %v478_v32 = vadd.f32 %v1198_v42, %v477_v20 }
  0xc7   :  { %v360_v25 = vadd.f32 %v1198_v42, %v359_v21  ;;  %v400_v26 = vadd.f32 %v1198_v42, %v399_v22 }
  0xc9   :  { %v852_v27 = vpack.c.bf16 %v360_v25, %v358_v23  ;;  %v892_v28 = vpack.c.bf16 %v400_v26, %v398_v24 }
  0xcb   :  { %1000 = vst [vmem:[%s1363_s3 + $0x10] sm:$0xff] %v852_v27  }
  0xcc   :  { %1008 = vst [vmem:[%s1363_s3 + $0x50] sm:$0xff] %v892_v28  }
  0xcd   :  { %v439_v29 = vpop.f32.mrf.mxu2  ;;  %v479_v30 = vpop.f32.mrf.mxu3 }
  0xce   :  { %v440_v33 = vadd.f32 %v1198_v42, %v439_v29  ;;  %v480_v34 = vadd.f32 %v1198_v42, %v479_v30  ;;  %v362_v35 = vpop.f32.mrf.mxu0  ;;  %v402_v36 = vpop.f32.mrf.mxu1 }
  0xcf   :  { %v363_v44 = vadd.f32 %v1198_v42, %v362_v35  ;;  %v403_v45 = vadd.f32 %v1198_v42, %v402_v36 }
  0xd0   :  { %v932_v37 = vpack.c.bf16 %v440_v33, %v438_v31  ;;  %v972_v38 = vpack.c.bf16 %v480_v34, %v478_v32 }
  0xd2   :  { %1016 = vst [vmem:[%s1363_s3 + $0x90] sm:$0xff] %v932_v37  }
  0xd3   :  { %1024 = vst [vmem:[%s1363_s3 + $0xd0] sm:$0xff] %v972_v38  }
  0xd5   :  { %v442_v39 = vpop.f32.mrf.mxu2  ;;  %v482_v40 = vpop.f32.mrf.mxu3 }
  0xd6   :  { %v364_v41 = vpop.f32.mrf.mxu0  ;;  %v404_v43 = vpop.f32.mrf.mxu1  ;;  %v443_v52 = vadd.f32 %v1198_v42, %v442_v39  ;;  %v483_v53 = vadd.f32 %v1198_v42, %v482_v40 }
  0xd7   :  { %v365_v46 = vadd.f32 %v1198_v42, %v364_v41  ;;  %v405_v47 = vadd.f32 %v1198_v42, %v404_v43 }
  0xd9   :  { %v857_v48 = vpack.c.bf16 %v365_v46, %v363_v44  ;;  %v897_v49 = vpack.c.bf16 %v405_v47, %v403_v45 }
  0xdb   :  { %1001 = vst [vmem:[%s1363_s3 + $0x18] sm:$0xff] %v857_v48  }
  0xdc   :  { %1009 = vst [vmem:[%s1363_s3 + $0x58] sm:$0xff] %v897_v49  }
  0xdd   :  { %v444_v50 = vpop.f32.mrf.mxu2  ;;  %v484_v51 = vpop.f32.mrf.mxu3 }
  0xde   :  { %v445_v54 = vadd.f32 %v1198_v42, %v444_v50  ;;  %v485_v55 = vadd.f32 %v1198_v42, %v484_v51  ;;  %v367_v56 = vpop.f32.mrf.mxu0  ;;  %v407_v57 = vpop.f32.mrf.mxu1 }
  0xdf   :  { %v368_v0 = vadd.f32 %v1198_v42, %v367_v56  ;;  %v408_v1 = vadd.f32 %v1198_v42, %v407_v57 }
  0xe0   :  { %v937_v58 = vpack.c.bf16 %v445_v54, %v443_v52  ;;  %v977_v59 = vpack.c.bf16 %v485_v55, %v483_v53 }
  0xe2   :  { %1017 = vst [vmem:[%s1363_s3 + $0x98] sm:$0xff] %v937_v58  }
  0xe3   :  { %1025 = vst [vmem:[%s1363_s3 + $0xd8] sm:$0xff] %v977_v59  }
  0xe5   :  { %v447_v60 = vpop.f32.mrf.mxu2  ;;  %v487_v61 = vpop.f32.mrf.mxu3 }
  0xe6   :  { %v369_v62 = vpop.f32.mrf.mxu0  ;;  %v409_v63 = vpop.f32.mrf.mxu1  ;;  %v448_v8 = vadd.f32 %v1198_v42, %v447_v60  ;;  %v488_v9 = vadd.f32 %v1198_v42, %v487_v61 }
  0xe7   :  { %v370_v2 = vadd.f32 %v1198_v42, %v369_v62  ;;  %v410_v3 = vadd.f32 %v1198_v42, %v409_v63 }
  0xe9   :  { %v862_v4 = vpack.c.bf16 %v370_v2, %v368_v0  ;;  %v902_v5 = vpack.c.bf16 %v410_v3, %v408_v1 }
  0xeb   :  { %1002 = vst [vmem:[%s1363_s3 + $0x20] sm:$0xff] %v862_v4  }
  0xec   :  { %1010 = vst [vmem:[%s1363_s3 + $0x60] sm:$0xff] %v902_v5  }
  0xed   :  { %v449_v6 = vpop.f32.mrf.mxu2  ;;  %v489_v7 = vpop.f32.mrf.mxu3 }
  0xee   :  { %v450_v10 = vadd.f32 %v1198_v42, %v449_v6  ;;  %v490_v11 = vadd.f32 %v1198_v42, %v489_v7  ;;  %v372_v12 = vpop.f32.mrf.mxu0  ;;  %v412_v13 = vpop.f32.mrf.mxu1 }
  0xef   :  { %v373_v20 = vadd.f32 %v1198_v42, %v372_v12  ;;  %v413_v21 = vadd.f32 %v1198_v42, %v412_v13 }
  0xf0   :  { %v942_v14 = vpack.c.bf16 %v450_v10, %v448_v8  ;;  %v982_v15 = vpack.c.bf16 %v490_v11, %v488_v9 }
  0xf2   :  { %1018 = vst [vmem:[%s1363_s3 + $0xa0] sm:$0xff] %v942_v14  }
  0xf3   :  { %1026 = vst [vmem:[%s1363_s3 + $0xe0] sm:$0xff] %v982_v15  }
  0xf5   :  { %v452_v16 = vpop.f32.mrf.mxu2  ;;  %v492_v17 = vpop.f32.mrf.mxu3 }
  0xf6   :  { %v374_v18 = vpop.f32.mrf.mxu0  ;;  %v414_v19 = vpop.f32.mrf.mxu1  ;;  %v453_v28 = vadd.f32 %v1198_v42, %v452_v16  ;;  %v493_v29 = vadd.f32 %v1198_v42, %v492_v17 }
  0xf7   :  { %v375_v22 = vadd.f32 %v1198_v42, %v374_v18  ;;  %v415_v23 = vadd.f32 %v1198_v42, %v414_v19 }
  0xf9   :  { %v867_v24 = vpack.c.bf16 %v375_v22, %v373_v20  ;;  %v907_v25 = vpack.c.bf16 %v415_v23, %v413_v21 }
  0xfb   :  { %1003 = vst [vmem:[%s1363_s3 + $0x28] sm:$0xff] %v867_v24  }
  0xfc   :  { %1011 = vst [vmem:[%s1363_s3 + $0x68] sm:$0xff] %v907_v25  }
  0xfd   :  { %v454_v26 = vpop.f32.mrf.mxu2  ;;  %v494_v27 = vpop.f32.mrf.mxu3 }
  0xfe   :  { %v455_v30 = vadd.f32 %v1198_v42, %v454_v26  ;;  %v495_v31 = vadd.f32 %v1198_v42, %v494_v27  ;;  %v377_v32 = vpop.f32.mrf.mxu0  ;;  %v417_v33 = vpop.f32.mrf.mxu1 }
  0xff   :  { %v378_v40 = vadd.f32 %v1198_v42, %v377_v32  ;;  %v418_v41 = vadd.f32 %v1198_v42, %v417_v33 }
 0x100   :  { %v947_v34 = vpack.c.bf16 %v455_v30, %v453_v28  ;;  %v987_v35 = vpack.c.bf16 %v495_v31, %v493_v29 }
 0x102   :  { %1019 = vst [vmem:[%s1363_s3 + $0xa8] sm:$0xff] %v947_v34  }
 0x103   :  { %1027 = vst [vmem:[%s1363_s3 + $0xe8] sm:$0xff] %v987_v35  }
 0x105   :  { %v457_v36 = vpop.f32.mrf.mxu2  ;;  %v497_v37 = vpop.f32.mrf.mxu3 }
 0x106   :  { %v379_v38 = vpop.f32.mrf.mxu0  ;;  %v419_v39 = vpop.f32.mrf.mxu1  ;;  %v458_v49 = vadd.f32 %v1198_v42, %v457_v36  ;;  %v498_v50 = vadd.f32 %v1198_v42, %v497_v37 }
 0x107   :  { %v380_v43 = vadd.f32 %v1198_v42, %v379_v38  ;;  %v420_v44 = vadd.f32 %v1198_v42, %v419_v39 }
 0x109   :  { %v872_v45 = vpack.c.bf16 %v380_v43, %v378_v40  ;;  %v912_v46 = vpack.c.bf16 %v420_v44, %v418_v41 }
 0x10b   :  { %1004 = vst [vmem:[%s1363_s3 + $0x30] sm:$0xff] %v872_v45  }
 0x10c   :  { %1012 = vst [vmem:[%s1363_s3 + $0x70] sm:$0xff] %v912_v46  }
 0x10d   :  { %v459_v47 = vpop.f32.mrf.mxu2  ;;  %v499_v48 = vpop.f32.mrf.mxu3 }
 0x10e   :  { %v460_v51 = vadd.f32 %v1198_v42, %v459_v47  ;;  %v500_v52 = vadd.f32 %v1198_v42, %v499_v48  ;;  %v382_v53 = vpop.f32.mrf.mxu0  ;;  %v422_v54 = vpop.f32.mrf.mxu1 }
 0x10f   :  { %v383_v61 = vadd.f32 %v1198_v42, %v382_v53  ;;  %v423_v62 = vadd.f32 %v1198_v42, %v422_v54 }
 0x110   :  { %v952_v55 = vpack.c.bf16 %v460_v51, %v458_v49  ;;  %v992_v56 = vpack.c.bf16 %v500_v52, %v498_v50 }
 0x112   :  { %1020 = vst [vmem:[%s1363_s3 + $0xb0] sm:$0xff] %v952_v55  }
 0x113   :  { %1028 = vst [vmem:[%s1363_s3 + $0xf0] sm:$0xff] %v992_v56  }
 0x115   :  { %v462_v57 = vpop.f32.mrf.mxu2  ;;  %v502_v58 = vpop.f32.mrf.mxu3 }
 0x116   :  { %v384_v59 = vpop.f32.mrf.mxu0  ;;  %v424_v60 = vpop.f32.mrf.mxu1  ;;  %v463_v5 = vadd.f32 %v1198_v42, %v462_v57  ;;  %v503_v6 = vadd.f32 %v1198_v42, %v502_v58 }
 0x117   :  { %v385_v63 = vadd.f32 %v1198_v42, %v384_v59  ;;  %v425_v0 = vadd.f32 %v1198_v42, %v424_v60 }
 0x119   :  { %v877_v1 = vpack.c.bf16 %v385_v63, %v383_v61  ;;  %v917_v2 = vpack.c.bf16 %v425_v0, %v423_v62 }
 0x11b   :  { %1005 = vst [vmem:[%s1363_s3 + $0x38] sm:$0xff] %v877_v1  }
 0x11c   :  { %1013 = vst [vmem:[%s1363_s3 + $0x78] sm:$0xff] %v917_v2  }
 0x11d   :  { %v464_v3 = vpop.f32.mrf.mxu2  ;;  %v504_v4 = vpop.f32.mrf.mxu3 }
 0x11e   :  { %v465_v7 = vadd.f32 %v1198_v42, %v464_v3  ;;  %v505_v8 = vadd.f32 %v1198_v42, %v504_v4 }
 0x120   :  { %v957_v9 = vpack.c.bf16 %v465_v7, %v463_v5  ;;  %v997_v10 = vpack.c.bf16 %v505_v8, %v503_v6 }
 0x122   :  { %1021 = vst [vmem:[%s1363_s3 + $0xb8] sm:$0xff] %v957_v9  }
 0x123   :  { %1029 = vst [vmem:[%s1363_s3 + $0xf8] sm:$0xff] %v997_v10  }

// kernel: hfem_forward.16
= control target key start
LH: loop header
LB: loop body
LE: loop exit
PB: predicated region body
PF: predicated region fallthrough
CT: control target
= control target key end

     0   :  { %s478_s1 = inlined_call_operand.vmem [shape: bf16[128,128], index: 1, kind: input, shape index: {}]   ;;  %s479_s2 = inlined_call_operand.vmem [shape: f32[1,128], index: 2, kind: input, shape index: {}]   ;;  %s480_s0 = inlined_call_operand.vmem [shape: bf16[128,128], index: 0, kind: input, shape index: {}]   ;;  %s481_s3 = inlined_call_operand.vmem [shape: bf16[128,128], index: 3, kind: output, shape index: {}]  }
   0x1   :  { %v310_v0 = vld [vmem:[%s478_s1 + $0x38] sm:$0xff]  ;;  %v309_v1 = vld [vmem:[%s478_s1 + $0x30] sm:$0xff]  ;;  %v308_v2 = vld [vmem:[%s478_s1 + $0x28] sm:$0xff] }
   0x2   :  { %146 = vmatpush.bf16.msra.mxu0 %v310_v0  ;;  %358 = vmatpush.bf16.msra.mxu1 %v310_v0  ;;  %v307_v3 = vld [vmem:[%s478_s1 + $0x20] sm:$0xff]  ;;  %v306_v4 = vld [vmem:[%s478_s1 + $0x18] sm:$0xff]  ;;  %v305_v5 = vld [vmem:[%s478_s1 + $0x10] sm:$0xff] }
   0x3   :  { %359 = vmatpush.bf16.msra.mxu2 %v310_v0  ;;  %360 = vmatpush.bf16.msra.mxu3 %v310_v0  ;;  %v304_v6 = vld [vmem:[%s478_s1 + $0x8] sm:$0xff]  ;;  %v303_v7 = vld [vmem:[%s478_s1] sm:$0xff]  ;;  %v297_v9 = vld [vmem:[%s480_s0 + $0x10] sm:$0xff] }
   0x4   :  { %v295_v8 = vld [vmem:[%s480_s0] sm:$0xff]  ;;  %v301_v11 = vld [vmem:[%s480_s0 + $0x30] sm:$0xff]  ;;  %v296_v12 = vld [vmem:[%s480_s0 + $0x8] sm:$0xff] }
   0x5   :  { %v299_v10 = vld [vmem:[%s480_s0 + $0x20] sm:$0xff]  ;;  %v298_v13 = vld [vmem:[%s480_s0 + $0x18] sm:$0xff]  ;;  %v300_v14 = vld [vmem:[%s480_s0 + $0x28] sm:$0xff] }
   0x6   :  { %147 = vmatpush.bf16.msra.mxu0 %v309_v1  ;;  %361 = vmatpush.bf16.msra.mxu1 %v309_v1  ;;  %v302_v15 = vld [vmem:[%s480_s0 + $0x38] sm:$0xff]  ;;  %v382_v18 = vld [vmem:[%s479_s2] ss:$0 sm:$0xff] }
   0x7   :  { %362 = vmatpush.bf16.msra.mxu2 %v309_v1  ;;  %363 = vmatpush.bf16.msra.mxu3 %v309_v1 }
   0xa   :  { %148 = vmatpush.bf16.msra.mxu0 %v308_v2  ;;  %364 = vmatpush.bf16.msra.mxu1 %v308_v2 }
   0xb   :  { %365 = vmatpush.bf16.msra.mxu2 %v308_v2  ;;  %366 = vmatpush.bf16.msra.mxu3 %v308_v2 }
   0xe   :  { %149 = vmatpush.bf16.msra.mxu0 %v307_v3  ;;  %367 = vmatpush.bf16.msra.mxu1 %v307_v3 }
   0xf   :  { %368 = vmatpush.bf16.msra.mxu2 %v307_v3  ;;  %369 = vmatpush.bf16.msra.mxu3 %v307_v3 }
  0x12   :  { %150 = vmatpush.bf16.msra.mxu0 %v306_v4  ;;  %370 = vmatpush.bf16.msra.mxu1 %v306_v4 }
  0x13   :  { %371 = vmatpush.bf16.msra.mxu2 %v306_v4  ;;  %372 = vmatpush.bf16.msra.mxu3 %v306_v4 }
  0x16   :  { %151 = vmatpush.bf16.msra.mxu0 %v305_v5  ;;  %373 = vmatpush.bf16.msra.mxu1 %v305_v5 }
  0x17   :  { %374 = vmatpush.bf16.msra.mxu2 %v305_v5  ;;  %375 = vmatpush.bf16.msra.mxu3 %v305_v5 }
  0x1a   :  { %152 = vmatpush.bf16.msra.mxu0 %v304_v6  ;;  %376 = vmatpush.bf16.msra.mxu1 %v304_v6 }
  0x1b   :  { %377 = vmatpush.bf16.msra.mxu2 %v304_v6  ;;  %378 = vmatpush.bf16.msra.mxu3 %v304_v6 }
  0x1e   :  { %153 = vmatpush.bf16.msra.mxu0 %v303_v7  ;;  %379 = vmatpush.bf16.msra.mxu1 %v303_v7 }
  0x1f   :  { %380 = vmatpush.bf16.msra.mxu2 %v303_v7  ;;  %381 = vmatpush.bf16.msra.mxu3 %v303_v7 }
  0x21   :  { %154 = vmatmul.bf16.vlgmr.msra.gmra.mxu0 %v295_v8  ;;  %164 = vmatmul.bf16.vlgmr.msra.gmra.mxu1 %v297_v9 }
  0x22   :  { %174 = vmatmul.bf16.vlgmr.msra.gmra.mxu2 %v299_v10  ;;  %184 = vmatmul.bf16.vlgmr.msra.gmra.mxu3 %v301_v11 }
  0x31   :  { %159 = vmatmul.bf16.gmra.mxu0 %v296_v12  ;;  %169 = vmatmul.bf16.gmra.mxu1 %v298_v13 }
  0x32   :  { %179 = vmatmul.bf16.gmra.mxu2 %v300_v14  ;;  %189 = vmatmul.bf16.gmra.mxu3 %v302_v15 }
  0x9e   :  { %v155_v16 = vpop.f32.mrf.mxu0  ;;  %v165_v17 = vpop.f32.mrf.mxu1 }
  0x9f   :  { %v156_v23 = vadd.f32 %v382_v18, %v155_v16  ;;  %v166_v24 = vadd.f32 %v382_v18, %v165_v17 }
  0xa5   :  { %v175_v19 = vpop.f32.mrf.mxu2  ;;  %v185_v20 = vpop.f32.mrf.mxu3 }
  0xa6   :  { %v157_v21 = vpop.f32.mrf.mxu0  ;;  %v167_v22 = vpop.f32.mrf.mxu1  ;;  %v176_v31 = vadd.f32 %v382_v18, %v175_v19  ;;  %v186_v32 = vadd.f32 %v382_v18, %v185_v20 }
  0xa7   :  { %v158_v25 = vadd.f32 %v382_v18, %v157_v21  ;;  %v168_v26 = vadd.f32 %v382_v18, %v167_v22 }
  0xa9   :  { %v314_v27 = vpack.c.bf16 %v158_v25, %v156_v23  ;;  %v324_v28 = vpack.c.bf16 %v168_v26, %v166_v24 }
  0xab   :  { %315 = vst [vmem:[%s481_s3] sm:$0xff] %v314_v27  }
  0xac   :  { %352 = vst [vmem:[%s481_s3 + $0x10] sm:$0xff] %v324_v28  }
  0xad   :  { %v177_v29 = vpop.f32.mrf.mxu2  ;;  %v187_v30 = vpop.f32.mrf.mxu3 }
  0xae   :  { %v178_v33 = vadd.f32 %v382_v18, %v177_v29  ;;  %v188_v34 = vadd.f32 %v382_v18, %v187_v30  ;;  %v160_v35 = vpop.f32.mrf.mxu0  ;;  %v170_v36 = vpop.f32.mrf.mxu1 }
  0xaf   :  { %v161_v43 = vadd.f32 %v382_v18, %v160_v35  ;;  %v171_v44 = vadd.f32 %v382_v18, %v170_v36 }
  0xb0   :  { %v334_v37 = vpack.c.bf16 %v178_v33, %v176_v31  ;;  %v344_v38 = vpack.c.bf16 %v188_v34, %v186_v32 }
  0xb2   :  { %354 = vst [vmem:[%s481_s3 + $0x20] sm:$0xff] %v334_v37  }
  0xb3   :  { %356 = vst [vmem:[%s481_s3 + $0x30] sm:$0xff] %v344_v38  }
  0xb5   :  { %v180_v39 = vpop.f32.mrf.mxu2  ;;  %v190_v40 = vpop.f32.mrf.mxu3 }
  0xb6   :  { %v162_v41 = vpop.f32.mrf.mxu0  ;;  %v172_v42 = vpop.f32.mrf.mxu1  ;;  %v181_v51 = vadd.f32 %v382_v18, %v180_v39  ;;  %v191_v52 = vadd.f32 %v382_v18, %v190_v40 }
  0xb7   :  { %v163_v45 = vadd.f32 %v382_v18, %v162_v41  ;;  %v173_v46 = vadd.f32 %v382_v18, %v172_v42 }
  0xb9   :  { %v319_v47 = vpack.c.bf16 %v163_v45, %v161_v43  ;;  %v329_v48 = vpack.c.bf16 %v173_v46, %v171_v44 }
  0xbb   :  { %351 = vst [vmem:[%s481_s3 + $0x8] sm:$0xff] %v319_v47  }
  0xbc   :  { %353 = vst [vmem:[%s481_s3 + $0x18] sm:$0xff] %v329_v48  }
  0xbd   :  { %v182_v49 = vpop.f32.mrf.mxu2  ;;  %v192_v50 = vpop.f32.mrf.mxu3 }
  0xbe   :  { %v183_v53 = vadd.f32 %v382_v18, %v182_v49  ;;  %v193_v54 = vadd.f32 %v382_v18, %v192_v50 }
  0xc0   :  { %v339_v55 = vpack.c.bf16 %v183_v53, %v181_v51  ;;  %v349_v56 = vpack.c.bf16 %v193_v54, %v191_v52 }
  0xc2   :  { %355 = vst [vmem:[%s481_s3 + $0x28] sm:$0xff] %v339_v55  }
  0xc3   :  { %357 = vst [vmem:[%s481_s3 + $0x38] sm:$0xff] %v349_v56  }

// kernel: hfem_forward.21
= control target key start
LH: loop header
LB: loop body
LE: loop exit
PB: predicated region body
PF: predicated region fallthrough
CT: control target
= control target key end

     0   :  { %s258_s1 = inlined_call_operand.vmem [shape: bf16[128,128], index: 1, kind: input, shape index: {}]   ;;  %s259_s2 = inlined_call_operand.vmem [shape: f32[1,128], index: 2, kind: input, shape index: {}]   ;;  %s260_s0 = inlined_call_operand.vmem [shape: bf16[32,128], index: 0, kind: input, shape index: {}]   ;;  %s261_s3 = inlined_call_operand.vmem [shape: bf16[32,128], index: 3, kind: output, shape index: {}]  }
   0x1   :  { %v178_v0 = vld [vmem:[%s258_s1 + $0x38] sm:$0xff]  ;;  %v177_v1 = vld [vmem:[%s258_s1 + $0x30] sm:$0xff]  ;;  %v176_v2 = vld [vmem:[%s258_s1 + $0x28] sm:$0xff] }
   0x2   :  { %98 = vmatpush.bf16.msra.mxu0 %v178_v0  ;;  %190 = vmatpush.bf16.msra.mxu1 %v178_v0  ;;  %v175_v3 = vld [vmem:[%s258_s1 + $0x20] sm:$0xff]  ;;  %v174_v4 = vld [vmem:[%s258_s1 + $0x18] sm:$0xff]  ;;  %v173_v5 = vld [vmem:[%s258_s1 + $0x10] sm:$0xff] }
   0x3   :  { %v172_v6 = vld [vmem:[%s258_s1 + $0x8] sm:$0xff]  ;;  %v171_v7 = vld [vmem:[%s258_s1] sm:$0xff] }
   0x4   :  { %v169_v8 = vld [vmem:[%s260_s0] sm:$0xff]  ;;  %v170_v9 = vld [vmem:[%s260_s0 + $0x8] sm:$0xff] }
   0x5   :  { %v198_v12 = vld [vmem:[%s259_s2] ss:$0 sm:$0xff] }
   0x6   :  { %99 = vmatpush.bf16.msra.mxu0 %v177_v1  ;;  %191 = vmatpush.bf16.msra.mxu1 %v177_v1 }
   0xa   :  { %100 = vmatpush.bf16.msra.mxu0 %v176_v2  ;;  %192 = vmatpush.bf16.msra.mxu1 %v176_v2 }
   0xe   :  { %101 = vmatpush.bf16.msra.mxu0 %v175_v3  ;;  %193 = vmatpush.bf16.msra.mxu1 %v175_v3 }
  0x12   :  { %102 = vmatpush.bf16.msra.mxu0 %v174_v4  ;;  %194 = vmatpush.bf16.msra.mxu1 %v174_v4 }
  0x16   :  { %103 = vmatpush.bf16.msra.mxu0 %v173_v5  ;;  %195 = vmatpush.bf16.msra.mxu1 %v173_v5 }
  0x1a   :  { %104 = vmatpush.bf16.msra.mxu0 %v172_v6  ;;  %196 = vmatpush.bf16.msra.mxu1 %v172_v6 }
  0x1e   :  { %105 = vmatpush.bf16.msra.mxu0 %v171_v7  ;;  %197 = vmatpush.bf16.msra.mxu1 %v171_v7 }
  0x21   :  { %106 = vmatmul.bf16.vlgmr.msra.gmra.mxu0 %v169_v8  ;;  %111 = vmatmul.bf16.vlgmr.msra.gmra.mxu1 %v170_v9 }
  0x9e   :  { %v107_v10 = vpop.f32.mrf.mxu0  ;;  %v112_v11 = vpop.f32.mrf.mxu1 }
  0x9f   :  { %v108_v15 = vadd.f32 %v198_v12, %v107_v10  ;;  %v113_v16 = vadd.f32 %v198_v12, %v112_v11 }
  0xa6   :  { %v109_v13 = vpop.f32.mrf.mxu0  ;;  %v114_v14 = vpop.f32.mrf.mxu1 }
  0xa7   :  { %v110_v17 = vadd.f32 %v198_v12, %v109_v13  ;;  %v115_v18 = vadd.f32 %v198_v12, %v114_v14 }
  0xa9   :  { %v182_v19 = vpack.c.bf16 %v110_v17, %v108_v15  ;;  %v187_v20 = vpack.c.bf16 %v115_v18, %v113_v16 }
  0xab   :  { %183 = vst [vmem:[%s261_s3] sm:$0xff] %v182_v19  }
  0xac   :  { %189 = vst [vmem:[%s261_s3 + $0x8] sm:$0xff] %v187_v20  }

// kernel: hfem_forward.23
= control target key start
LH: loop header
LB: loop body
LE: loop exit
PB: predicated region body
PF: predicated region fallthrough
CT: control target
= control target key end

     0   :  { %7 = vsyncpa [#allocation5], 0  ;;  %s641_s9 = smov 0   ;;  %s643_s10 = smov 0   ;;  %s694_s0 = inlined_call_operand.vmem [shape: f32[3], index: 0, kind: input, shape index: {}]   ;;  %s695_s1 = inlined_call_operand.vmem [shape: bf16[2,5,1024], index: 1, kind: input, shape index: {}]   ;;  %s696_s2 = inlined_call_operand.vmem [shape: f32[2,5,5], index: 2, kind: output, shape index: {}]  }
   0x1   :  { %s645_s11 = smov 0  }
   0x2 LB: > { %s516_s12 = sadd.s32 4294967295, %s621_s11   ;;  %s25_s13 = sadd.s32 1, %s617_s10  ;;  %s621_s11 = sphi %s645_s11, %s13_s11   ;;  %s617_s10 = sphi %s643_s10, %s698_s10   ;;  %s613_s9 = sphi %s641_s9, %s697_s9  }
   0x3   : > { %p27_p0 = scmp.ge.s32.totalorder %s25_s13, 2  ;;  %p518_p1 = scmp.ge.s32.totalorder %s621_s11, 1 }
   0x4   : > { %p105_p2 = scmp.lt.s32.totalorder %s621_s11, 3  ;;  %p545_p4 = scmp.eq.s32.totalorder %s516_s12, 0 }
   0x5   : > { %s700_s13 = smov (%p27_p0, %s25_s13), 0  ;;  %s117_s16 = sshll.u32 %s694_s0, 4  ;;  %s118_s16 = int_to_ptr.vmem [resolvable:$true] %s117_s16 }
   0x6   : > { %p106_p3 = pnand %p518_p1, %p105_p2  ;;  %s623_s17 = smov [#allocation4]  }
   0x8   : > { %p541_p5 = pneg %p106_p3  ;;  %143 = sbr.rel (%p106_p3) target bundleno = 570 (0x23a), region = 28 }
   0xa   : > { %p542_p6 = pnand %p545_p4, %p541_p5 }
   0xc   : > { %544 = dma.vmem_to_smem (!%p542_p6), %s118_s16, 16, %s623_s17, [#allocation5]  }
   0xd   : > { %608 = dma.done.wait (%p545_p4), [#allocation5], 16  }
   0xe   : > { %610 = vsyncadd (%p545_p4), [#allocation5], 4294967280 }
   0xf   : > { %150 = sfence }
  0x10   : > { %p171_p7 = scmp.lt.s32.totalorder %s613_s9, 1  ;;  %vm205_vm0 = vcmask 1044480   ;;  %v624_v37 = vmov 0.0   ;;  %v625_v44 = vmov 1023.0   ;;  %vm190_vm2 = vcmask 36864   ;;  %s364_s22 = sld [smem:[#allocation4]] }
  0x11   : > { %189 = vst [vmem:[#allocation2] sm:$0x1f] %v624_v37  ;;  %574 = vrcp.f32 %v625_v44  ;;  %s526_s28 = sld [smem:[#allocation4 + $0x1]] }
  0x12   : > { %s702_s9 = smov (!%p171_p7, %s613_s9), 1  ;;  %191 = vst.msk [vmem:[#allocation3] sm:$0x1f] %vm190_vm2, %v624_v37  ;;  %s527_s29 = sld [smem:[#allocation4 + $0x2]] }
  0x13   : > { %s530_s18 = sshll.u32 %s702_s9, 5  ;;  %s525_s3 = sshll.u32 %s702_s9, 3 }
  0x14   : > { %s178_s21 = scalar_lea.vmem %s695_s1, %s530_s18  ;;  %s183_s6 = scalar_lea.vmem %s696_s2, %s525_s3 }
  0x15   : > { %v192_v0 = vld [vmem:[%s178_s21] sm:$0x77]  ;;  %v193_v1 = vld [vmem:[%s178_s21 + $0x8] sm:$0x77]  ;;  %v194_v2 = vld [vmem:[%s178_s21 + $0x10] sm:$0x77] }
  0x16   : > { %v195_v3 = vld [vmem:[%s178_s21 + $0x18] sm:$0x77]  ;;  %v197_v4 = vunpack.c.l.bf16 %v192_v0  ;;  %v198_v5 = vunpack.c.h.bf16 %v192_v0  ;;  %v199_v6 = vunpack.c.l.bf16 %v193_v1  ;;  %v200_v7 = vunpack.c.h.bf16 %v193_v1 }
  0x17   : > { %v201_v8 = vunpack.c.l.bf16 %v194_v2  ;;  %v202_v9 = vunpack.c.h.bf16 %v194_v2  ;;  %v203_v13 = vunpack.c.l.bf16 %v195_v3  ;;  %v204_v14 = vunpack.c.h.bf16 %v195_v3  ;;  %v575_v45 = vpop.eup %574 }
  0x18   : > { %v206_v10 = vsel %vm205_vm0, %v197_v4, 0.0  ;;  %v207_v11 = vsel %vm205_vm0, %v198_v5, 0.0  ;;  %v209_v12 = vsel %vm205_vm0, %v199_v6, 0.0  ;;  %v211_v16 = vsel %vm205_vm0, %v200_v7, 0.0  ;;  %v196_v50 = vld [vmem:[#allocation2] sm:$0x1f] }
  0x19   : > { %v208_v15 = vadd.f32 %v207_v11, %v206_v10  ;;  %v213_v17 = vsel %vm205_vm0, %v201_v8, 0.0  ;;  %v230_v18 = vunpack.c.l.b16 %v192_v0  ;;  %v232_v19 = vunpack.c.l.b16 %v193_v1  ;;  %v225_v10 = vld [vmem:[#allocation3] sm:$0x1f] }
  0x1a   : > { %v233_v20 = vunpack.c.h.b16 %v193_v1  ;;  %v231_v22 = vunpack.c.h.b16 %v192_v0  ;;  %v234_v23 = vunpack.c.l.b16 %v194_v2  ;;  %v236_v24 = vunpack.c.l.b16 %v195_v3 }
  0x1b   : > { %v210_v21 = vadd.f32 %v209_v12, %v208_v15  ;;  %v238_v25 = vpack.c.b16 %v230_v18, %v230_v18  ;;  %v240_v26 = vpack.c.b16 %v232_v19, %v232_v19  ;;  %v237_v28 = vunpack.c.h.b16 %v195_v3 }
  0x1c   : > { %v241_v27 = vpack.c.b16 %v233_v20, %v233_v20  ;;  %v239_v30 = vpack.c.b16 %v231_v22, %v231_v22  ;;  %v242_v31 = vpack.c.b16 %v234_v23, %v234_v23  ;;  %v244_v32 = vpack.c.b16 %v236_v24, %v236_v24 }
  0x1d   : > { %v212_v29 = vadd.f32 %v211_v16, %v210_v21  ;;  %v215_v33 = vsel %vm205_vm0, %v202_v9, 0.0  ;;  %261 = vmatpush.bf16.xpose.msra.mxu0 %v238_v25  ;;  %287 = vmatpush.bf16.xpose.msra.mxu2 %v240_v26  ;;  %v245_v34 = vpack.c.b16 %v237_v28, %v237_v28  ;;  %v235_v35 = vunpack.c.h.b16 %v194_v2 }
  0x1e   : > { %300 = vmatpush.bf16.xpose.msra.mxu3 %v241_v27  ;;  %274 = vmatpush.bf16.xpose.msra.mxu1 %v239_v30  ;;  %v217_v38 = vsel %vm205_vm0, %v203_v13, 0.0  ;;  %v219_v41 = vsel %vm205_vm0, %v204_v14, 0.0  ;;  %v393_v46 = vmul.f32 1023.0, %v575_v45  ;;  %vm397_vm1 = vweird.f32 %v575_v45 }
  0x1f   : > { %v214_v36 = vadd.f32 %v213_v17, %v212_v29  ;;  %v243_v39 = vpack.c.b16 %v235_v35, %v235_v35 }
  0x20   : > { %v394_v47 = vsub.f32 1.0, %v393_v46 }
  0x21   : > { %v216_v40 = vadd.f32 %v215_v33, %v214_v36 }
  0x22   : > { %v395_v48 = vmul.f32 %v575_v45, %v394_v47 }
  0x23   : > { %v218_v42 = vadd.f32 %v217_v38, %v216_v40  ;;  %v416_v40 = vstv %s526_s28 }
  0x24   : > { %262 = vmatmul.bf16.vlgmr.msra.gmra.mxu0 %v238_v25  ;;  %288 = vmatmul.bf16.vlgmr.msra.gmra.mxu2 %v240_v26  ;;  %v396_v49 = vadd.f32 %v575_v45, %v395_v48 }
  0x25   : > { %313 = vmatpush.bf16.xpose.msrb.mxu0 %v242_v31  ;;  %339 = vmatpush.bf16.xpose.msrb.mxu2 %v244_v32  ;;  %v220_v43 = vadd.f32 %v219_v41, %v218_v42 }
  0x26   : > { %352 = vmatpush.bf16.xpose.msrb.mxu3 %v245_v34  ;;  %326 = vmatpush.bf16.xpose.msrb.mxu1 %v243_v39  ;;  %v398_v51 = vsel %vm397_vm1, %v575_v45, %v396_v49 }
  0x27   : > { %301 = vmatmul.bf16.vlgmr.msra.gmra.mxu3 %v241_v27  ;;  %275 = vmatmul.bf16.vlgmr.msra.gmra.mxu1 %v239_v30  ;;  %531 = vpush %v398_v51 }
  0x28   : > { %221 = vadd.xlane.f32.xlu0 %v220_v43  ;;  %v432_v43 = vstv %s527_s29 }
  0x34   : > { %314 = vmatmul.bf16.vlgmr.msrb.gmra.mxu0 %v242_v31  ;;  %340 = vmatmul.bf16.vlgmr.msrb.gmra.mxu2 %v244_v32 }
  0x37   : > { %353 = vmatmul.bf16.vlgmr.msrb.gmra.mxu3 %v245_v34  ;;  %327 = vmatmul.bf16.vlgmr.msrb.gmra.mxu1 %v243_v39 }
  0x58   : > { %s532_s23 = spop %531 }
  0x59   : > { %s400_s24 = smul.f32 %s532_s23, %s364_s22 }
  0x5b   : > { %v401_v20 = vstv %s400_s24 }
  0x9b   : > { %v222_v52 = vpop.xlane.xlu0 %221 }
  0x9c   : > { %v223_v53 = vadd.f32 %v222_v52, %v196_v50 }
  0x9e   : > { %224 = vst [vmem:[#allocation2] sm:$0x1f] %v223_v53 }
  0xa1   : > { %v263_v54 = vpop.f32.mrf.mxu0 }
  0xa4   : > { %v276_v55 = vpop.f32.mrf.mxu1 }
  0xa5   : > { %v367_v56 = vld [vmem:[#allocation2] sm:$0x1f]  ;;  %v277_v57 = vadd.f32 %v276_v55, %v263_v54 }
  0xa6   : > { %383 = vmatpush.xpose.msra.mxu0 %v367_v56 }
  0xa7   : > { %v289_v58 = vpop.f32.mrf.mxu2 }
  0xa8   : > { %v290_v61 = vadd.f32 %v289_v58, %v277_v57 }
  0xa9   : > { %384 = vmatmul.f32.vlgmr.msra.gmra.mxu0 %v367_v56  ;;  %v265_v60 = vpop.f32.mrf.mxu0 }
  0xaa   : > { %v302_v59 = vpop.f32.mrf.mxu3 }
  0xab   : > { %v303_v63 = vadd.f32 %v302_v59, %v290_v61 }
  0xac   : > { %v278_v62 = vpop.f32.mrf.mxu1 }
  0xaf   : > { %v291_v0 = vpop.f32.mrf.mxu2 }
  0xb1   : > { %v315_v2 = vpop.f32.mrf.mxu0 }
  0xb2   : > { %v304_v1 = vpop.f32.mrf.mxu3  ;;  %v316_v3 = vadd.f32 %v315_v2, %v303_v63 }
  0xb4   : > { %v328_v4 = vpop.f32.mrf.mxu1 }
  0xb5   : > { %v329_v5 = vadd.f32 %v328_v4, %v316_v3 }
  0xb7   : > { %v341_v6 = vpop.f32.mrf.mxu2 }
  0xb8   : > { %v342_v7 = vadd.f32 %v341_v6, %v329_v5 }
  0xb9   : > { %v317_v9 = vpop.f32.mrf.mxu0 }
  0xba   : > { %v354_v8 = vpop.f32.mrf.mxu3 }
  0xbb   : > { %v355_v11 = vadd.f32 %v354_v8, %v342_v7 }
  0xbc   : > { %v330_v12 = vpop.f32.mrf.mxu1 }
  0xbd   : > { %v358_v13 = vadd.f32 %v355_v11, %v225_v10 }
  0xbf   : > { %360 = vst.msk [vmem:[#allocation3] sm:$0x1f] %vm190_vm2, %v358_v13  ;;  %v343_v14 = vpop.f32.mrf.mxu2 }
  0xc2   : > { %v356_v15 = vpop.f32.mrf.mxu3 }
  0xc6   : > { %v389_v19 = vld [vmem:[#allocation3] sm:$0x1f] }
 0x126   : > { %v385_v16 = vpop.f32.mrf.mxu0 }
 0x127   : > { %v388_v17 = vmul.f32 0.0078125, %v385_v16 }
 0x129   : > { %v390_v18 = vmul.f32 0.0009765625, %v388_v17 }
 0x12b   : > { %v391_v21 = vsub.f32 %v389_v19, %v390_v18 }
 0x12d   : > { %v402_v22 = vmul.f32 %v401_v20, %v391_v21 }
 0x12f   : > { %v403_v23 = vmul.f32 %v402_v22, %v402_v22  ;;  %v417_v41 = vmul.f32 %v416_v40, %v402_v22 }
 0x131   : > { %v404_v24 = vsel %vm190_vm2, %v403_v23, 0.0 }
 0x132   : > { %405 = vadd.xlane.f32.xlu0 %v404_v24 }
 0x1a5   : > { %v406_v25 = vpop.xlane.xlu0 %405 }
 0x1a6   : > { %v407_v26 = vrot.slane %v406_v25, 4 }
 0x1a8   : > { %v408_v27 = vadd.f32 %v407_v26, %v406_v25 }
 0x1aa   : > { %v409_v28 = vrot.slane %v408_v27, 2 }
 0x1ac   : > { %v410_v29 = vadd.f32 %v409_v28, %v408_v27 }
 0x1ae   : > { %v411_v30 = vrot.slane %v410_v29, 1 }
 0x1b0   : > { %v412_v31 = vadd.f32 %v411_v30, %v410_v29 }
 0x1b2   : > { %533 = vpush %v412_v31 }
 0x1e3   : > { %s534_s25 = spop %533 }
 0x1e4   : > { %s414_s26 = smul.f32 0.04, %s534_s25 }
 0x1e6   : > { %s415_s27 = sadd.f32 1e-05, %s414_s26 }
 0x1e8   : > { %v418_v32 = vstv %s415_s27 }
 0x1e9   : > { %576 = vrsqrt.f32 %v418_v32  ;;  %vm425_vm4 = vweird.f32 %v418_v32 }
 0x1ef   : > { %v577_v33 = vpop.eup %576 }
 0x1f0   : > { %v420_v34 = vmul.f32 %v577_v33, %v418_v32  ;;  %vm426_vm3 = vweird.f32 %v577_v33 }
 0x1f1   : > { %vm427_vm5 = vmor %vm425_vm4, %vm426_vm3 }
 0x1f2   : > { %v421_v35 = vmul.f32 %v577_v33, %v420_v34 }
 0x1f4   : > { %v422_v36 = vmul.f32 0.5, %v421_v35 }
 0x1f6   : > { %v423_v37 = vsub.f32 1.5, %v422_v36 }
 0x1f8   : > { %v424_v38 = vmul.f32 %v577_v33, %v423_v37 }
 0x1fa   : > { %v428_v39 = vsel %vm427_vm5, %v577_v33, %v424_v38 }
 0x1fb   : > { %535 = vpush %v428_v39 }
 0x22c   : > { %s536_s30 = spop %535 }
 0x22d   : > { %v430_v42 = vstv %s536_s30 }
 0x22e   : > { %v431_v44 = vmul.f32 %v430_v42, %v417_v41 }
 0x230   : > { %v433_v45 = vadd.f32 %v432_v43, %v431_v44 }
 0x232   : > { %578 = vtanh.f32 %v433_v45 }
 0x238   : > { %v579_v46 = vpop.eup %578 }
 0x239   : > { %435 = vst.msk [vmem:[%s183_s6] sm:$0x1f] %vm190_vm2, %v579_v46 }
 0x23a PF: > { %s13_s11 = sadd.s32 1, %s621_s11   ;;  %s697_s9 = smov %s617_s10 }
 0x23b   : > { %p10_p8 = scmp.ge.s32.totalorder %s13_s11, 4   ;;  %s698_s10 = smov %s700_s13 }
 0x23d   :  { %12 = sbr.rel (!%p10_p8) target bundleno = 2 (0x2), region = 71 }
 0x242   :  { %455 = vsyncpa [#allocation5], 1 }
 0x243   :  { %457 = vsyncpa [#allocation5 + $0x1], 1 }

// kernel: hfem_forward.24
= control target key start
LH: loop header
LB: loop body
LE: loop exit
PB: predicated region body
PF: predicated region fallthrough
CT: control target
= control target key end

     0   :  { %s2398_s9 = smov 0   ;;  %s2400_s10 = smov 0   ;;  %s2768_s0 = inlined_call_operand.vmem [shape: bf16[2,5,256,4], index: 0, kind: input, shape index: {}]   ;;  %s2769_s1 = inlined_call_operand.vmem [shape: bf16[2,5,4,4], index: 1, kind: input, shape index: {}]   ;;  %s2770_s2 = inlined_call_operand.vmem [shape: f32[2,256,4], index: 2, kind: output, shape index: {}]  }
   0x1   :  { %s2402_s11 = smov 0  }
   0x2 LB: > { %s24_s12 = sadd.s32 1, %s2377_s10  ;;  %p1710_p0 = scmp.ge.s32.totalorder %s2381_s11, 1  ;;  %s2381_s11 = sphi %s2402_s11, %s12_s11   ;;  %s2377_s10 = sphi %s2400_s10, %s2772_s10   ;;  %s2373_s9 = sphi %s2398_s9, %s2771_s9  }
   0x3   : > { %p26_p1 = scmp.ge.s32.totalorder %s24_s12, 2  ;;  %p143_p2 = scmp.lt.s32.totalorder %s2381_s11, 3 }
   0x5   : > { %s2774_s12 = smov (%p26_p1, %s24_s12), 0  ;;  %p144_p3 = pnand %p1710_p0, %p143_p2 }
   0x6   : > { %p179_p4 = scmp.lt.s32.totalorder (!%p144_p3), %s2373_s9, 1 }
   0x7   : > { %147 = sbr.rel (%p144_p3) target bundleno = 473 (0x1d9), region = 28 }
   0xc   : > { %s2776_s9 = smov (!%p179_p4, %s2373_s9), 1  ;;  %vm401_vm0 = vcmask 1041408   ;;  %vm352_vm1 = vcmask 31744  }
   0xd   : > { %s2333_s13 = smul.u32 640, %s2776_s9  ;;  %s2249_s21 = sshll.u32 %s2776_s9, 8 }
   0xe   : > { %s2334_s14 = smul.u32 10, %s2776_s9  ;;  %s2606_s24 = scalar_lea.vmem %s2770_s2, %s2249_s21 }
   0xf   : > { %s2423_s17 = scalar_lea.vmem %s2768_s0, %s2333_s13 }
  0x10   : > { %s192_s20 = scalar_lea.vmem %s2769_s1, %s2334_s14  ;;  %v2270_v0 = vld [vmem:[%s2423_s17 + $0xa0] sm:$0xff]  ;;  %v2271_v14 = vld [vmem:[%s2423_s17 + $0xa8] sm:$0xff]  ;;  %v2272_v18 = vld [vmem:[%s2423_s17 + $0xb0] sm:$0xff] }
  0x11   : > { %v1747_v1 = vld [vmem:[%s192_s20 + $0x2] sm:$0x3]  ;;  %v1940_v3 = vld [vmem:[%s192_s20 + $0x4] sm:$0x3]  ;;  %v2053_v6 = vld [vmem:[%s192_s20 + $0x6] sm:$0x3] }
  0x12   : > { %v2274_v2 = vld [vmem:[%s2423_s17 + $0xc0] sm:$0xff]  ;;  %v403_v4 = vsel %vm401_vm0, %v1747_v1, 0  ;;  %v878_v5 = vsel %vm401_vm0, %v1940_v3, 0  ;;  %v1165_v10 = vsel %vm401_vm0, %v2053_v6, 0  ;;  %v2166_v11 = vld [vmem:[%s192_s20 + $0x8] sm:$0x3] }
  0x13   : > { %v236_v7 = vld [vmem:[%s192_s20] sm:$0x3]  ;;  %2330 = vmatpush.bf16.msra.mxu1 %v403_v4  ;;  %2331 = vmatpush.bf16.msra.mxu2 %v403_v4  ;;  %v1452_v13 = vsel %vm401_vm0, %v2166_v11, 0  ;;  %v2275_v15 = vld [vmem:[%s2423_s17 + $0xc8] sm:$0xff]  ;;  %v2276_v19 = vld [vmem:[%s2423_s17 + $0xd0] sm:$0xff] }
  0x14   : > { %v2278_v8 = vld [vmem:[%s2423_s17 + $0xe0] sm:$0xff]  ;;  %2332 = vmatpush.bf16.msra.mxu3 %v403_v4  ;;  %412 = vmatpush.bf16.msra.mxu0 %v403_v4  ;;  %v623_v12 = vsel %vm401_vm0, %v236_v7, 0  ;;  %v2279_v16 = vld [vmem:[%s2423_s17 + $0xe8] sm:$0xff]  ;;  %v2280_v20 = vld [vmem:[%s2423_s17 + $0xf0] sm:$0xff] }
  0x15   : > { %v2266_v9 = vld [vmem:[%s2423_s17 + $0x80] sm:$0xff]  ;;  %v2267_v17 = vld [vmem:[%s2423_s17 + $0x88] sm:$0xff]  ;;  %v2268_v21 = vld [vmem:[%s2423_s17 + $0x90] sm:$0xff] }
  0x16   : > { %1816 = vmatmul.msk.bf16.vlgmr.msra.gmra.mxu1 %vm352_vm1, %v2270_v0  ;;  %1820 = vmatmul.msk.bf16.vlgmr.msra.gmra.mxu2 %vm352_vm1, %v2274_v2  ;;  %v2273_v22 = vld [vmem:[%s2423_s17 + $0xb8] sm:$0xff]  ;;  %v2250_v26 = vld [vmem:[%s2423_s17] sm:$0xff]  ;;  %v2251_v30 = vld [vmem:[%s2423_s17 + $0x8] sm:$0xff] }
  0x17   : > { %887 = vmatpush.bf16.msrb.mxu2 %v878_v5  ;;  %1824 = vmatmul.msk.bf16.vlgmr.msra.gmra.mxu3 %vm352_vm1, %v2278_v8  ;;  %v2277_v23 = vld [vmem:[%s2423_s17 + $0xd8] sm:$0xff]  ;;  %v2282_v27 = vld [vmem:[%s2423_s17 + $0x100] sm:$0xff]  ;;  %v2283_v31 = vld [vmem:[%s2423_s17 + $0x108] sm:$0xff] }
  0x18   : > { %1174 = vmatpush.bf16.msrb.mxu3 %v1165_v10  ;;  %1812 = vmatmul.msk.bf16.vlgmr.msra.gmra.mxu0 %vm352_vm1, %v2266_v9  ;;  %v2281_v24 = vld [vmem:[%s2423_s17 + $0xf8] sm:$0xff]  ;;  %v2298_v28 = vld [vmem:[%s2423_s17 + $0x180] sm:$0xff]  ;;  %v2299_v32 = vld [vmem:[%s2423_s17 + $0x188] sm:$0xff] }
  0x19   : > { %632 = vmatpush.bf16.msrb.mxu1 %v623_v12  ;;  %1461 = vmatpush.bf16.msrb.mxu0 %v1452_v13  ;;  %v2269_v25 = vld [vmem:[%s2423_s17 + $0x98] sm:$0xff]  ;;  %v2314_v29 = vld [vmem:[%s2423_s17 + $0x200] sm:$0xff]  ;;  %v2315_v33 = vld [vmem:[%s2423_s17 + $0x208] sm:$0xff] }
  0x1a   : > { %v2252_v34 = vld [vmem:[%s2423_s17 + $0x10] sm:$0xff]  ;;  %v2253_v38 = vld [vmem:[%s2423_s17 + $0x18] sm:$0xff]  ;;  %v2254_v42 = vld [vmem:[%s2423_s17 + $0x20] sm:$0xff] }
  0x1b   : > { %v2284_v35 = vld [vmem:[%s2423_s17 + $0x110] sm:$0xff]  ;;  %v2285_v39 = vld [vmem:[%s2423_s17 + $0x118] sm:$0xff]  ;;  %v2286_v43 = vld [vmem:[%s2423_s17 + $0x120] sm:$0xff] }
  0x1c   : > { %v2300_v36 = vld [vmem:[%s2423_s17 + $0x190] sm:$0xff]  ;;  %v2301_v40 = vld [vmem:[%s2423_s17 + $0x198] sm:$0xff]  ;;  %v2302_v45 = vld [vmem:[%s2423_s17 + $0x1a0] sm:$0xff] }
  0x1d   : > { %v2316_v37 = vld [vmem:[%s2423_s17 + $0x210] sm:$0xff]  ;;  %v2317_v41 = vld [vmem:[%s2423_s17 + $0x218] sm:$0xff]  ;;  %v2318_v46 = vld [vmem:[%s2423_s17 + $0x220] sm:$0xff] }
  0x1e   : > { %v2255_v54 = vld [vmem:[%s2423_s17 + $0x28] sm:$0xff]  ;;  %v2256_v2 = vld [vmem:[%s2423_s17 + $0x30] sm:$0xff] }
  0x1f   : > { %v2287_v55 = vld [vmem:[%s2423_s17 + $0x128] sm:$0xff]  ;;  %v2288_v3 = vld [vmem:[%s2423_s17 + $0x130] sm:$0xff] }
  0x20   : > { %v2303_v57 = vld [vmem:[%s2423_s17 + $0x1a8] sm:$0xff]  ;;  %v2304_v5 = vld [vmem:[%s2423_s17 + $0x1b0] sm:$0xff] }
  0x21   : > { %v2319_v58 = vld [vmem:[%s2423_s17 + $0x228] sm:$0xff]  ;;  %v2320_v6 = vld [vmem:[%s2423_s17 + $0x230] sm:$0xff] }
  0x26   : > { %1817 = vmatmul.msk.bf16.gmra.mxu1 %vm352_vm1, %v2271_v14  ;;  %1821 = vmatmul.msk.bf16.gmra.mxu2 %vm352_vm1, %v2275_v15  ;;  %v2257_v14 = vld [vmem:[%s2423_s17 + $0x38] sm:$0xff] }
  0x27   : > { %1825 = vmatmul.msk.bf16.gmra.mxu3 %vm352_vm1, %v2279_v16  ;;  %v2289_v15 = vld [vmem:[%s2423_s17 + $0x138] sm:$0xff] }
  0x28   : > { %1813 = vmatmul.msk.bf16.gmra.mxu0 %vm352_vm1, %v2267_v17  ;;  %v2305_v17 = vld [vmem:[%s2423_s17 + $0x1b8] sm:$0xff] }
  0x36   : > { %1818 = vmatmul.msk.bf16.gmra.mxu1 %vm352_vm1, %v2272_v18  ;;  %1822 = vmatmul.msk.bf16.gmra.mxu2 %vm352_vm1, %v2276_v19  ;;  %v2321_v18 = vld [vmem:[%s2423_s17 + $0x238] sm:$0xff] }
  0x37   : > { %1826 = vmatmul.msk.bf16.gmra.mxu3 %vm352_vm1, %v2280_v20 }
  0x38   : > { %1814 = vmatmul.msk.bf16.gmra.mxu0 %vm352_vm1, %v2268_v21 }
  0x46   : > { %1819 = vmatmul.msk.bf16.gmra.mxu1 %vm352_vm1, %v2273_v22  ;;  %1823 = vmatmul.msk.bf16.gmra.mxu2 %vm352_vm1, %v2277_v23 }
  0x47   : > { %1827 = vmatmul.msk.bf16.gmra.mxu3 %vm352_vm1, %v2281_v24 }
  0x48   : > { %1815 = vmatmul.msk.bf16.gmra.mxu0 %vm352_vm1, %v2269_v25 }
  0x56   : > { %1892 = vmatmul.msk.bf16.vlgmr.msrb.gmra.mxu1 %vm352_vm1, %v2250_v26  ;;  %2005 = vmatmul.msk.bf16.vlgmr.msrb.gmra.mxu2 %vm352_vm1, %v2282_v27  ;;  %v2258_v26 = vld [vmem:[%s2423_s17 + $0x40] sm:$0xff] }
  0x57   : > { %2118 = vmatmul.msk.bf16.vlgmr.msrb.gmra.mxu3 %vm352_vm1, %v2298_v28  ;;  %v2290_v27 = vld [vmem:[%s2423_s17 + $0x140] sm:$0xff] }
  0x58   : > { %2231 = vmatmul.msk.bf16.vlgmr.msrb.gmra.mxu0 %vm352_vm1, %v2314_v29  ;;  %v2306_v29 = vld [vmem:[%s2423_s17 + $0x1c0] sm:$0xff] }
  0x66   : > { %1893 = vmatmul.msk.bf16.gmra.mxu1 %vm352_vm1, %v2251_v30  ;;  %2006 = vmatmul.msk.bf16.gmra.mxu2 %vm352_vm1, %v2283_v31  ;;  %v2322_v30 = vld [vmem:[%s2423_s17 + $0x240] sm:$0xff] }
  0x67   : > { %2119 = vmatmul.msk.bf16.gmra.mxu3 %vm352_vm1, %v2299_v32 }
  0x68   : > { %2232 = vmatmul.msk.bf16.gmra.mxu0 %vm352_vm1, %v2315_v33 }
  0x76   : > { %1894 = vmatmul.msk.bf16.gmra.mxu1 %vm352_vm1, %v2252_v34  ;;  %2007 = vmatmul.msk.bf16.gmra.mxu2 %vm352_vm1, %v2284_v35 }
  0x77   : > { %2120 = vmatmul.msk.bf16.gmra.mxu3 %vm352_vm1, %v2300_v36 }
  0x78   : > { %2233 = vmatmul.msk.bf16.gmra.mxu0 %vm352_vm1, %v2316_v37 }
  0x86   : > { %1895 = vmatmul.msk.bf16.gmra.mxu1 %vm352_vm1, %v2253_v38  ;;  %2008 = vmatmul.msk.bf16.gmra.mxu2 %vm352_vm1, %v2285_v39 }
  0x87   : > { %2121 = vmatmul.msk.bf16.gmra.mxu3 %vm352_vm1, %v2301_v40 }
  0x88   : > { %2234 = vmatmul.msk.bf16.gmra.mxu0 %vm352_vm1, %v2317_v41 }
  0x93   : > { %v2499_v44 = vpop.f32.mrf.mxu1 }
  0x95   : > { %v2503_v47 = vpop.f32.mrf.mxu0 }
  0x96   : > { %1896 = vmatmul.msk.bf16.gmra.mxu1 %vm352_vm1, %v2254_v42  ;;  %2009 = vmatmul.msk.bf16.gmra.mxu2 %vm352_vm1, %v2286_v43 }
  0x97   : > { %2122 = vmatmul.msk.bf16.gmra.mxu3 %vm352_vm1, %v2302_v45  ;;  %v2259_v45 = vld [vmem:[%s2423_s17 + $0x48] sm:$0xff] }
  0x98   : > { %2235 = vmatmul.msk.bf16.gmra.mxu0 %vm352_vm1, %v2318_v46  ;;  %v2291_v46 = vld [vmem:[%s2423_s17 + $0x148] sm:$0xff] }
  0x99   : > { %v2509_v48 = vpop.f32.mrf.mxu2 }
  0x9a   : > { %v2511_v49 = vpop.f32.mrf.mxu3 }
  0x9b   : > { %v2513_v50 = vpop.f32.mrf.mxu1 }
  0x9d   : > { %v2515_v51 = vpop.f32.mrf.mxu0 }
  0xa1   : > { %v2517_v52 = vpop.f32.mrf.mxu2 }
  0xa2   : > { %v2519_v53 = vpop.f32.mrf.mxu3 }
  0xa3   : > { %v2523_v56 = vpop.f32.mrf.mxu1 }
  0xa5   : > { %v2527_v59 = vpop.f32.mrf.mxu0 }
  0xa6   : > { %1897 = vmatmul.msk.bf16.gmra.mxu1 %vm352_vm1, %v2255_v54  ;;  %2010 = vmatmul.msk.bf16.gmra.mxu2 %vm352_vm1, %v2287_v55  ;;  %v2307_v54 = vld [vmem:[%s2423_s17 + $0x1c8] sm:$0xff] }
  0xa7   : > { %2123 = vmatmul.msk.bf16.gmra.mxu3 %vm352_vm1, %v2303_v57  ;;  %v2323_v55 = vld [vmem:[%s2423_s17 + $0x248] sm:$0xff] }
  0xa8   : > { %2236 = vmatmul.msk.bf16.gmra.mxu0 %vm352_vm1, %v2319_v58 }
  0xa9   : > { %v2533_v60 = vpop.f32.mrf.mxu2 }
  0xaa   : > { %v2535_v61 = vpop.f32.mrf.mxu3 }
  0xab   : > { %v2537_v62 = vpop.f32.mrf.mxu1 }
  0xad   : > { %v2539_v63 = vpop.f32.mrf.mxu0 }
  0xb1   : > { %v2541_v0 = vpop.f32.mrf.mxu2 }
  0xb2   : > { %v2543_v1 = vpop.f32.mrf.mxu3 }
  0xb3   : > { %v2547_v4 = vpop.f32.mrf.mxu1 }
  0xb5   : > { %v2551_v7 = vpop.f32.mrf.mxu0 }
  0xb6   : > { %1898 = vmatmul.msk.bf16.gmra.mxu1 %vm352_vm1, %v2256_v2  ;;  %2011 = vmatmul.msk.bf16.gmra.mxu2 %vm352_vm1, %v2288_v3 }
  0xb7   : > { %2124 = vmatmul.msk.bf16.gmra.mxu3 %vm352_vm1, %v2304_v5 }
  0xb8   : > { %2237 = vmatmul.msk.bf16.gmra.mxu0 %vm352_vm1, %v2320_v6 }
  0xb9   : > { %v2557_v8 = vpop.f32.mrf.mxu2 }
  0xba   : > { %v2559_v9 = vpop.f32.mrf.mxu3 }
  0xbb   : > { %v2561_v10 = vpop.f32.mrf.mxu1 }
  0xbd   : > { %v2563_v11 = vpop.f32.mrf.mxu0 }
  0xc1   : > { %v2565_v12 = vpop.f32.mrf.mxu2 }
  0xc2   : > { %v2567_v13 = vpop.f32.mrf.mxu3 }
  0xc3   : > { %v2571_v16 = vpop.f32.mrf.mxu1 }
  0xc5   : > { %v2575_v19 = vpop.f32.mrf.mxu0 }
  0xc6   : > { %1899 = vmatmul.msk.bf16.gmra.mxu1 %vm352_vm1, %v2257_v14  ;;  %2012 = vmatmul.msk.bf16.gmra.mxu2 %vm352_vm1, %v2289_v15 }
  0xc7   : > { %2125 = vmatmul.msk.bf16.gmra.mxu3 %vm352_vm1, %v2305_v17 }
  0xc8   : > { %2238 = vmatmul.msk.bf16.gmra.mxu0 %vm352_vm1, %v2321_v18 }
  0xc9   : > { %v2581_v20 = vpop.f32.mrf.mxu2 }
  0xca   : > { %v2583_v21 = vpop.f32.mrf.mxu3 }
  0xcb   : > { %v2585_v22 = vpop.f32.mrf.mxu1 }
  0xcd   : > { %v2587_v23 = vpop.f32.mrf.mxu0 }
  0xd1   : > { %v2589_v24 = vpop.f32.mrf.mxu2 }
  0xd2   : > { %v2591_v25 = vpop.f32.mrf.mxu3 }
  0xd3   : > { %v634_v28 = vpop.f32.mrf.mxu1 }
  0xd4   : > { %v635_v32 = vadd.f32 %v634_v28, %v2503_v47 }
  0xd5   : > { %v1463_v31 = vpop.f32.mrf.mxu0 }
  0xd6   : > { %1900 = vmatmul.msk.bf16.gmra.mxu1 %vm352_vm1, %v2258_v26  ;;  %2013 = vmatmul.msk.bf16.gmra.mxu2 %vm352_vm1, %v2290_v27 }
  0xd7   : > { %2126 = vmatmul.msk.bf16.gmra.mxu3 %vm352_vm1, %v2306_v29 }
  0xd8   : > { %2239 = vmatmul.msk.bf16.gmra.mxu0 %vm352_vm1, %v2322_v30  ;;  %v2260_v30 = vld [vmem:[%s2423_s17 + $0x50] sm:$0xff] }
  0xd9   : > { %v889_v33 = vpop.f32.mrf.mxu2 }
  0xda   : > { %v969_v34 = vadd.f32 %v889_v33, %v635_v32  ;;  %v1176_v35 = vpop.f32.mrf.mxu3  ;;  %v2308_v32 = vld [vmem:[%s2423_s17 + $0x1d0] sm:$0xff] }
  0xdb   : > { %v636_v36 = vpop.f32.mrf.mxu1  ;;  %v2324_v33 = vld [vmem:[%s2423_s17 + $0x250] sm:$0xff] }
  0xdc   : > { %v1256_v37 = vadd.f32 %v1176_v35, %v969_v34  ;;  %v637_v40 = vadd.f32 %v636_v36, %v2515_v51 }
  0xdd   : > { %v1465_v38 = vpop.f32.mrf.mxu0 }
  0xde   : > { %v1543_v39 = vadd.f32 %v1463_v31, %v1256_v37  ;;  %v2292_v31 = vld [vmem:[%s2423_s17 + $0x150] sm:$0xff] }
  0xe0   : > { %1575 = vst.msk [vmem:[%s2606_s24] sm:$0xff] %vm352_vm1, %v1543_v39 }
  0xe1   : > { %v891_v41 = vpop.f32.mrf.mxu2 }
  0xe2   : > { %v970_v42 = vadd.f32 %v891_v41, %v637_v40  ;;  %v1178_v43 = vpop.f32.mrf.mxu3 }
  0xe3   : > { %v639_v47 = vpop.f32.mrf.mxu1 }
  0xe4   : > { %v1257_v57 = vadd.f32 %v1178_v43, %v970_v42  ;;  %v640_v51 = vadd.f32 %v639_v47, %v2527_v59 }
  0xe5   : > { %v1468_v58 = vpop.f32.mrf.mxu0 }
  0xe6   : > { %v1544_v2 = vadd.f32 %v1465_v38, %v1257_v57  ;;  %1901 = vmatmul.msk.bf16.gmra.mxu1 %vm352_vm1, %v2259_v45  ;;  %2014 = vmatmul.msk.bf16.gmra.mxu2 %vm352_vm1, %v2291_v46  ;;  %v2293_v57 = vld [vmem:[%s2423_s17 + $0x158] sm:$0xff] }
  0xe7   : > { %2127 = vmatmul.msk.bf16.gmra.mxu3 %vm352_vm1, %v2307_v54 }
  0xe8   : > { %2240 = vmatmul.msk.bf16.gmra.mxu0 %vm352_vm1, %v2323_v55  ;;  %1576 = vst.msk [vmem:[%s2606_s24 + $0x8] sm:$0xff] %vm352_vm1, %v1544_v2  ;;  %v2261_v55 = vld [vmem:[%s2423_s17 + $0x58] sm:$0xff] }
  0xe9   : > { %v894_v3 = vpop.f32.mrf.mxu2  ;;  %v2325_v2 = vld [vmem:[%s2423_s17 + $0x258] sm:$0xff] }
  0xea   : > { %v971_v5 = vadd.f32 %v894_v3, %v640_v51  ;;  %v1181_v6 = vpop.f32.mrf.mxu3 }
  0xeb   : > { %v641_v14 = vpop.f32.mrf.mxu1 }
  0xec   : > { %v1258_v15 = vadd.f32 %v1181_v6, %v971_v5  ;;  %v642_v26 = vadd.f32 %v641_v14, %v2539_v63 }
  0xed   : > { %v1470_v17 = vpop.f32.mrf.mxu0 }
  0xee   : > { %v1545_v18 = vadd.f32 %v1468_v58, %v1258_v15  ;;  %v2309_v58 = vld [vmem:[%s2423_s17 + $0x1d8] sm:$0xff] }
  0xf0   : > { %1577 = vst.msk [vmem:[%s2606_s24 + $0x10] sm:$0xff] %vm352_vm1, %v1545_v18 }
  0xf1   : > { %v896_v27 = vpop.f32.mrf.mxu2 }
  0xf2   : > { %v972_v28 = vadd.f32 %v896_v27, %v642_v26  ;;  %v1183_v29 = vpop.f32.mrf.mxu3 }
  0xf3   : > { %v644_v59 = vpop.f32.mrf.mxu1 }
  0xf4   : > { %v1259_v34 = vadd.f32 %v1183_v29, %v972_v28  ;;  %v645_v63 = vadd.f32 %v644_v59, %v2551_v7  ;;  %v2262_v59 = vld [vmem:[%s2423_s17 + $0x60] sm:$0xff] }
  0xf5   : > { %v1473_v35 = vpop.f32.mrf.mxu0 }
  0xf6   : > { %v1546_v36 = vadd.f32 %v1470_v17, %v1259_v34  ;;  %1902 = vmatmul.msk.bf16.gmra.mxu1 %vm352_vm1, %v2260_v30  ;;  %2015 = vmatmul.msk.bf16.gmra.mxu2 %vm352_vm1, %v2292_v31  ;;  %v2326_v34 = vld [vmem:[%s2423_s17 + $0x260] sm:$0xff] }
  0xf7   : > { %2128 = vmatmul.msk.bf16.gmra.mxu3 %vm352_vm1, %v2308_v32  ;;  %v2294_v32 = vld [vmem:[%s2423_s17 + $0x160] sm:$0xff] }
  0xf8   : > { %2241 = vmatmul.msk.bf16.gmra.mxu0 %vm352_vm1, %v2324_v33  ;;  %1578 = vst.msk [vmem:[%s2606_s24 + $0x18] sm:$0xff] %vm352_vm1, %v1546_v36  ;;  %v2310_v33 = vld [vmem:[%s2423_s17 + $0x1e0] sm:$0xff] }
  0xf9   : > { %v899_v37 = vpop.f32.mrf.mxu2 }
  0xfa   : > { %v973_v38 = vadd.f32 %v899_v37, %v645_v63  ;;  %v1186_v39 = vpop.f32.mrf.mxu3 }
  0xfb   : > { %v646_v40 = vpop.f32.mrf.mxu1 }
  0xfc   : > { %v1260_v41 = vadd.f32 %v1186_v39, %v973_v38  ;;  %v647_v45 = vadd.f32 %v646_v40, %v2563_v11 }
  0xfd   : > { %v1475_v42 = vpop.f32.mrf.mxu0 }
  0xfe   : > { %v1547_v43 = vadd.f32 %v1473_v35, %v1260_v41 }
 0x100   : > { %1579 = vst.msk [vmem:[%s2606_s24 + $0x20] sm:$0xff] %vm352_vm1, %v1547_v43 }
 0x101   : > { %v901_v46 = vpop.f32.mrf.mxu2 }
 0x102   : > { %v974_v47 = vadd.f32 %v901_v46, %v647_v45  ;;  %v1188_v54 = vpop.f32.mrf.mxu3 }
 0x103   : > { %v649_v7 = vpop.f32.mrf.mxu1 }
 0x104   : > { %v1261_v51 = vadd.f32 %v1188_v54, %v974_v47  ;;  %v650_v11 = vadd.f32 %v649_v7, %v2575_v19  ;;  %v2311_v7 = vld [vmem:[%s2423_s17 + $0x1e8] sm:$0xff] }
 0x105   : > { %v1478_v3 = vpop.f32.mrf.mxu0 }
 0x106   : > { %v1548_v5 = vadd.f32 %v1475_v42, %v1261_v51  ;;  %1903 = vmatmul.msk.bf16.gmra.mxu1 %vm352_vm1, %v2261_v55  ;;  %2016 = vmatmul.msk.bf16.gmra.mxu2 %vm352_vm1, %v2293_v57  ;;  %v2263_v55 = vld [vmem:[%s2423_s17 + $0x68] sm:$0xff] }
 0x107   : > { %2129 = vmatmul.msk.bf16.gmra.mxu3 %vm352_vm1, %v2309_v58  ;;  %v2295_v57 = vld [vmem:[%s2423_s17 + $0x168] sm:$0xff] }
 0x108   : > { %2242 = vmatmul.msk.bf16.gmra.mxu0 %vm352_vm1, %v2325_v2  ;;  %1580 = vst.msk [vmem:[%s2606_s24 + $0x28] sm:$0xff] %vm352_vm1, %v1548_v5  ;;  %v2327_v58 = vld [vmem:[%s2423_s17 + $0x268] sm:$0xff] }
 0x109   : > { %v904_v6 = vpop.f32.mrf.mxu2 }
 0x10a   : > { %v975_v14 = vadd.f32 %v904_v6, %v650_v11  ;;  %v1191_v15 = vpop.f32.mrf.mxu3 }
 0x10b   : > { %v651_v17 = vpop.f32.mrf.mxu1 }
 0x10c   : > { %v1262_v18 = vadd.f32 %v1191_v15, %v975_v14  ;;  %v652_v28 = vadd.f32 %v651_v17, %v2587_v23 }
 0x10d   : > { %v1480_v26 = vpop.f32.mrf.mxu0 }
 0x10e   : > { %v1549_v27 = vadd.f32 %v1478_v3, %v1262_v18 }
 0x110   : > { %1581 = vst.msk [vmem:[%s2606_s24 + $0x30] sm:$0xff] %vm352_vm1, %v1549_v27 }
 0x111   : > { %v906_v29 = vpop.f32.mrf.mxu2 }
 0x112   : > { %v976_v30 = vadd.f32 %v906_v29, %v652_v28  ;;  %v1193_v31 = vpop.f32.mrf.mxu3 }
 0x113   : > { %v654_v19 = vpop.f32.mrf.mxu1 }
 0x114   : > { %v1263_v35 = vadd.f32 %v1193_v31, %v976_v30  ;;  %v655_v23 = vadd.f32 %v654_v19, %v2499_v44  ;;  %v2264_v30 = vld [vmem:[%s2423_s17 + $0x70] sm:$0xff] }
 0x115   : > { %v1483_v36 = vpop.f32.mrf.mxu0  ;;  %v2296_v31 = vld [vmem:[%s2423_s17 + $0x170] sm:$0xff] }
 0x116   : > { %v1550_v63 = vadd.f32 %v1480_v26, %v1263_v35  ;;  %1904 = vmatmul.msk.bf16.gmra.mxu1 %vm352_vm1, %v2262_v59  ;;  %2017 = vmatmul.msk.bf16.gmra.mxu2 %vm352_vm1, %v2294_v32  ;;  %v2312_v59 = vld [vmem:[%s2423_s17 + $0x1f0] sm:$0xff] }
 0x117   : > { %2130 = vmatmul.msk.bf16.gmra.mxu3 %vm352_vm1, %v2310_v33  ;;  %v2328_v32 = vld [vmem:[%s2423_s17 + $0x270] sm:$0xff] }
 0x118   : > { %2243 = vmatmul.msk.bf16.gmra.mxu0 %vm352_vm1, %v2326_v34  ;;  %1582 = vst.msk [vmem:[%s2606_s24 + $0x38] sm:$0xff] %vm352_vm1, %v1550_v63 }
 0x119   : > { %v909_v37 = vpop.f32.mrf.mxu2 }
 0x11a   : > { %v977_v38 = vadd.f32 %v909_v37, %v655_v23  ;;  %v1196_v39 = vpop.f32.mrf.mxu3 }
 0x11b   : > { %v656_v40 = vpop.f32.mrf.mxu1 }
 0x11c   : > { %v1264_v41 = vadd.f32 %v1196_v39, %v977_v38  ;;  %v657_v45 = vadd.f32 %v656_v40, %v2513_v50 }
 0x11d   : > { %v1485_v42 = vpop.f32.mrf.mxu0 }
 0x11e   : > { %v1551_v43 = vadd.f32 %v1483_v36, %v1264_v41 }
 0x120   : > { %1583 = vst.msk [vmem:[%s2606_s24 + $0x40] sm:$0xff] %vm352_vm1, %v1551_v43 }
 0x121   : > { %v911_v46 = vpop.f32.mrf.mxu2 }
 0x122   : > { %v978_v47 = vadd.f32 %v911_v46, %v657_v45  ;;  %v1198_v54 = vpop.f32.mrf.mxu3  ;;  %v2265_v45 = vld [vmem:[%s2423_s17 + $0x78] sm:$0xff] }
 0x123   : > { %v659_v44 = vpop.f32.mrf.mxu1  ;;  %v2297_v46 = vld [vmem:[%s2423_s17 + $0x178] sm:$0xff] }
 0x124   : > { %v1265_v2 = vadd.f32 %v1198_v54, %v978_v47  ;;  %v660_v50 = vadd.f32 %v659_v44, %v2523_v56  ;;  %v2313_v47 = vld [vmem:[%s2423_s17 + $0x1f8] sm:$0xff] }
 0x125   : > { %v1488_v51 = vpop.f32.mrf.mxu0  ;;  %v2329_v54 = vld [vmem:[%s2423_s17 + $0x278] sm:$0xff] }
 0x126   : > { %v1552_v3 = vadd.f32 %v1485_v42, %v1265_v2  ;;  %1905 = vmatmul.msk.bf16.gmra.mxu1 %vm352_vm1, %v2263_v55  ;;  %2018 = vmatmul.msk.bf16.gmra.mxu2 %vm352_vm1, %v2295_v57 }
 0x127   : > { %2131 = vmatmul.msk.bf16.gmra.mxu3 %vm352_vm1, %v2311_v7 }
 0x128   : > { %2244 = vmatmul.msk.bf16.gmra.mxu0 %vm352_vm1, %v2327_v58  ;;  %1584 = vst.msk [vmem:[%s2606_s24 + $0x48] sm:$0xff] %vm352_vm1, %v1552_v3 }
 0x129   : > { %v914_v5 = vpop.f32.mrf.mxu2 }
 0x12a   : > { %v979_v11 = vadd.f32 %v914_v5, %v660_v50  ;;  %v1201_v6 = vpop.f32.mrf.mxu3 }
 0x12b   : > { %v661_v14 = vpop.f32.mrf.mxu1 }
 0x12c   : > { %v1266_v15 = vadd.f32 %v1201_v6, %v979_v11  ;;  %v662_v26 = vadd.f32 %v661_v14, %v2537_v62 }
 0x12d   : > { %v1490_v17 = vpop.f32.mrf.mxu0 }
 0x12e   : > { %v1553_v18 = vadd.f32 %v1488_v51, %v1266_v15 }
 0x130   : > { %1585 = vst.msk [vmem:[%s2606_s24 + $0x50] sm:$0xff] %vm352_vm1, %v1553_v18 }
 0x131   : > { %v916_v27 = vpop.f32.mrf.mxu2 }
 0x132   : > { %v980_v28 = vadd.f32 %v916_v27, %v662_v26  ;;  %v1203_v29 = vpop.f32.mrf.mxu3 }
 0x133   : > { %v664_v56 = vpop.f32.mrf.mxu1 }
 0x134   : > { %v1267_v19 = vadd.f32 %v1203_v29, %v980_v28  ;;  %v665_v62 = vadd.f32 %v664_v56, %v2547_v4 }
 0x135   : > { %v1493_v33 = vpop.f32.mrf.mxu0 }
 0x136   : > { %v1554_v34 = vadd.f32 %v1490_v17, %v1267_v19  ;;  %1906 = vmatmul.msk.bf16.gmra.mxu1 %vm352_vm1, %v2264_v30  ;;  %2019 = vmatmul.msk.bf16.gmra.mxu2 %vm352_vm1, %v2296_v31 }
 0x137   : > { %2132 = vmatmul.msk.bf16.gmra.mxu3 %vm352_vm1, %v2312_v59 }
 0x138   : > { %2245 = vmatmul.msk.bf16.gmra.mxu0 %vm352_vm1, %v2328_v32  ;;  %1586 = vst.msk [vmem:[%s2606_s24 + $0x58] sm:$0xff] %vm352_vm1, %v1554_v34 }
 0x139   : > { %v919_v35 = vpop.f32.mrf.mxu2 }
 0x13a   : > { %v981_v36 = vadd.f32 %v919_v35, %v665_v62  ;;  %v1206_v63 = vpop.f32.mrf.mxu3 }
 0x13b   : > { %v666_v23 = vpop.f32.mrf.mxu1 }
 0x13c   : > { %v1268_v37 = vadd.f32 %v1206_v63, %v981_v36  ;;  %v667_v40 = vadd.f32 %v666_v23, %v2561_v10 }
 0x13d   : > { %v1495_v38 = vpop.f32.mrf.mxu0 }
 0x13e   : > { %v1555_v39 = vadd.f32 %v1493_v33, %v1268_v37 }
 0x140   : > { %1587 = vst.msk [vmem:[%s2606_s24 + $0x60] sm:$0xff] %vm352_vm1, %v1555_v39 }
 0x141   : > { %v921_v41 = vpop.f32.mrf.mxu2 }
 0x142   : > { %v982_v42 = vadd.f32 %v921_v41, %v667_v40  ;;  %v1208_v43 = vpop.f32.mrf.mxu3 }
 0x143   : > { %v669_v4 = vpop.f32.mrf.mxu1 }
 0x144   : > { %v1269_v55 = vadd.f32 %v1208_v43, %v982_v42  ;;  %v670_v10 = vadd.f32 %v669_v4, %v2571_v16 }
 0x145   : > { %v1498_v57 = vpop.f32.mrf.mxu0 }
 0x146   : > { %v1556_v44 = vadd.f32 %v1495_v38, %v1269_v55  ;;  %1907 = vmatmul.msk.bf16.gmra.mxu1 %vm352_vm1, %v2265_v45  ;;  %2020 = vmatmul.msk.bf16.gmra.mxu2 %vm352_vm1, %v2297_v46 }
 0x147   : > { %2133 = vmatmul.msk.bf16.gmra.mxu3 %vm352_vm1, %v2313_v47 }
 0x148   : > { %2246 = vmatmul.msk.bf16.gmra.mxu0 %vm352_vm1, %v2329_v54  ;;  %1588 = vst.msk [vmem:[%s2606_s24 + $0x68] sm:$0xff] %vm352_vm1, %v1556_v44 }
 0x149   : > { %v924_v7 = vpop.f32.mrf.mxu2 }
 0x14a   : > { %v983_v58 = vadd.f32 %v924_v7, %v670_v10  ;;  %v1211_v2 = vpop.f32.mrf.mxu3 }
 0x14b   : > { %v671_v51 = vpop.f32.mrf.mxu1 }
 0x14c   : > { %v1270_v3 = vadd.f32 %v1211_v2, %v983_v58  ;;  %v672_v11 = vadd.f32 %v671_v51, %v2585_v22 }
 0x14d   : > { %v1500_v50 = vpop.f32.mrf.mxu0 }
 0x14e   : > { %v1557_v5 = vadd.f32 %v1498_v57, %v1270_v3 }
 0x150   : > { %1589 = vst.msk [vmem:[%s2606_s24 + $0x70] sm:$0xff] %vm352_vm1, %v1557_v5 }
 0x151   : > { %v926_v6 = vpop.f32.mrf.mxu2 }
 0x152   : > { %v984_v14 = vadd.f32 %v926_v6, %v672_v11  ;;  %v1213_v15 = vpop.f32.mrf.mxu3 }
 0x153   : > { %v674_v17 = vpop.f32.mrf.mxu1 }
 0x154   : > { %v1271_v18 = vadd.f32 %v1213_v15, %v984_v14  ;;  %v675_v27 = vadd.f32 %v674_v17, %v2509_v48 }
 0x155   : > { %v1503_v26 = vpop.f32.mrf.mxu0 }
 0x156   : > { %v1558_v16 = vadd.f32 %v1500_v50, %v1271_v18 }
 0x158   : > { %1590 = vst.msk [vmem:[%s2606_s24 + $0x78] sm:$0xff] %vm352_vm1, %v1558_v16 }
 0x159   : > { %v929_v28 = vpop.f32.mrf.mxu2 }
 0x15a   : > { %v985_v29 = vadd.f32 %v929_v28, %v675_v27  ;;  %v1216_v30 = vpop.f32.mrf.mxu3 }
 0x15b   : > { %v676_v31 = vpop.f32.mrf.mxu1 }
 0x15c   : > { %v1272_v56 = vadd.f32 %v1216_v30, %v985_v29  ;;  %v677_v32 = vadd.f32 %v676_v31, %v2517_v52 }
 0x15d   : > { %v1505_v59 = vpop.f32.mrf.mxu0 }
 0x15e   : > { %v1559_v22 = vadd.f32 %v1503_v26, %v1272_v56 }
 0x160   : > { %1591 = vst.msk [vmem:[%s2606_s24 + $0x80] sm:$0xff] %vm352_vm1, %v1559_v22 }
 0x161   : > { %v931_v19 = vpop.f32.mrf.mxu2 }
 0x162   : > { %v986_v33 = vadd.f32 %v931_v19, %v677_v32  ;;  %v1218_v34 = vpop.f32.mrf.mxu3 }
 0x163   : > { %v679_v62 = vpop.f32.mrf.mxu1 }
 0x164   : > { %v1273_v35 = vadd.f32 %v1218_v34, %v986_v33  ;;  %v680_v63 = vadd.f32 %v679_v62, %v2533_v60 }
 0x165   : > { %v1508_v36 = vpop.f32.mrf.mxu0 }
 0x166   : > { %v1560_v48 = vadd.f32 %v1505_v59, %v1273_v35 }
 0x168   : > { %1592 = vst.msk [vmem:[%s2606_s24 + $0x88] sm:$0xff] %vm352_vm1, %v1560_v48 }
 0x169   : > { %v934_v23 = vpop.f32.mrf.mxu2 }
 0x16a   : > { %v987_v37 = vadd.f32 %v934_v23, %v680_v63  ;;  %v1221_v38 = vpop.f32.mrf.mxu3 }
 0x16b   : > { %v681_v39 = vpop.f32.mrf.mxu1 }
 0x16c   : > { %v1274_v40 = vadd.f32 %v1221_v38, %v987_v37  ;;  %v682_v42 = vadd.f32 %v681_v39, %v2541_v0 }
 0x16d   : > { %v1510_v41 = vpop.f32.mrf.mxu0 }
 0x16e   : > { %v1561_v52 = vadd.f32 %v1508_v36, %v1274_v40 }
 0x170   : > { %1593 = vst.msk [vmem:[%s2606_s24 + $0x90] sm:$0xff] %vm352_vm1, %v1561_v52 }
 0x171   : > { %v936_v43 = vpop.f32.mrf.mxu2 }
 0x172   : > { %v988_v45 = vadd.f32 %v936_v43, %v682_v42  ;;  %v1223_v46 = vpop.f32.mrf.mxu3 }
 0x173   : > { %v684_v4 = vpop.f32.mrf.mxu1 }
 0x174   : > { %v1275_v47 = vadd.f32 %v1223_v46, %v988_v45  ;;  %v685_v55 = vadd.f32 %v684_v4, %v2557_v8 }
 0x175   : > { %v1513_v54 = vpop.f32.mrf.mxu0 }
 0x176   : > { %v1562_v60 = vadd.f32 %v1510_v41, %v1275_v47 }
 0x178   : > { %1594 = vst.msk [vmem:[%s2606_s24 + $0x98] sm:$0xff] %vm352_vm1, %v1562_v60 }
 0x179   : > { %v939_v57 = vpop.f32.mrf.mxu2 }
 0x17a   : > { %v989_v44 = vadd.f32 %v939_v57, %v685_v55  ;;  %v1226_v10 = vpop.f32.mrf.mxu3 }
 0x17b   : > { %v686_v7 = vpop.f32.mrf.mxu1 }
 0x17c   : > { %v1276_v58 = vadd.f32 %v1226_v10, %v989_v44  ;;  %v687_v51 = vadd.f32 %v686_v7, %v2565_v12 }
 0x17d   : > { %v1515_v2 = vpop.f32.mrf.mxu0 }
 0x17e   : > { %v1563_v0 = vadd.f32 %v1513_v54, %v1276_v58 }
 0x180   : > { %1595 = vst.msk [vmem:[%s2606_s24 + $0xa0] sm:$0xff] %vm352_vm1, %v1563_v0 }
 0x181   : > { %v941_v3 = vpop.f32.mrf.mxu2 }
 0x182   : > { %v990_v50 = vadd.f32 %v941_v3, %v687_v51  ;;  %v1228_v5 = vpop.f32.mrf.mxu3 }
 0x183   : > { %v689_v11 = vpop.f32.mrf.mxu1 }
 0x184   : > { %v1277_v6 = vadd.f32 %v1228_v5, %v990_v50  ;;  %v690_v15 = vadd.f32 %v689_v11, %v2581_v20 }
 0x185   : > { %v1518_v14 = vpop.f32.mrf.mxu0 }
 0x186   : > { %v1564_v8 = vadd.f32 %v1515_v2, %v1277_v6 }
 0x188   : > { %1596 = vst.msk [vmem:[%s2606_s24 + $0xa8] sm:$0xff] %vm352_vm1, %v1564_v8 }
 0x189   : > { %v944_v17 = vpop.f32.mrf.mxu2 }
 0x18a   : > { %v991_v18 = vadd.f32 %v944_v17, %v690_v15  ;;  %v1231_v26 = vpop.f32.mrf.mxu3 }
 0x18b   : > { %v691_v16 = vpop.f32.mrf.mxu1 }
 0x18c   : > { %v1278_v27 = vadd.f32 %v1231_v26, %v991_v18  ;;  %v692_v29 = vadd.f32 %v691_v16, %v2589_v24 }
 0x18d   : > { %v1520_v28 = vpop.f32.mrf.mxu0 }
 0x18e   : > { %v1565_v12 = vadd.f32 %v1518_v14, %v1278_v27 }
 0x190   : > { %1597 = vst.msk [vmem:[%s2606_s24 + $0xb0] sm:$0xff] %vm352_vm1, %v1565_v12 }
 0x191   : > { %v946_v30 = vpop.f32.mrf.mxu2 }
 0x192   : > { %v992_v31 = vadd.f32 %v946_v30, %v692_v29  ;;  %v1233_v56 = vpop.f32.mrf.mxu3 }
 0x193   : > { %v694_v59 = vpop.f32.mrf.mxu1 }
 0x194   : > { %v1279_v22 = vadd.f32 %v1233_v56, %v992_v31  ;;  %v695_v19 = vadd.f32 %v694_v59, %v2511_v49 }
 0x195   : > { %v1523_v32 = vpop.f32.mrf.mxu0 }
 0x196   : > { %v1566_v20 = vadd.f32 %v1520_v28, %v1279_v22 }
 0x198   : > { %1598 = vst.msk [vmem:[%s2606_s24 + $0xb8] sm:$0xff] %vm352_vm1, %v1566_v20 }
 0x199   : > { %v949_v33 = vpop.f32.mrf.mxu2 }
 0x19a   : > { %v993_v34 = vadd.f32 %v949_v33, %v695_v19  ;;  %v1236_v62 = vpop.f32.mrf.mxu3 }
 0x19b   : > { %v696_v35 = vpop.f32.mrf.mxu1 }
 0x19c   : > { %v1280_v36 = vadd.f32 %v1236_v62, %v993_v34  ;;  %v697_v63 = vadd.f32 %v696_v35, %v2519_v53 }
 0x19d   : > { %v1525_v48 = vpop.f32.mrf.mxu0 }
 0x19e   : > { %v1567_v24 = vadd.f32 %v1523_v32, %v1280_v36 }
 0x1a0   : > { %1599 = vst.msk [vmem:[%s2606_s24 + $0xc0] sm:$0xff] %vm352_vm1, %v1567_v24 }
 0x1a1   : > { %v951_v23 = vpop.f32.mrf.mxu2 }
 0x1a2   : > { %v994_v37 = vadd.f32 %v951_v23, %v697_v63  ;;  %v1238_v38 = vpop.f32.mrf.mxu3 }
 0x1a3   : > { %v699_v39 = vpop.f32.mrf.mxu1 }
 0x1a4   : > { %v1281_v40 = vadd.f32 %v1238_v38, %v994_v37  ;;  %v700_v52 = vadd.f32 %v699_v39, %v2535_v61 }
 0x1a5   : > { %v1528_v41 = vpop.f32.mrf.mxu0 }
 0x1a6   : > { %v1568_v49 = vadd.f32 %v1525_v48, %v1281_v40 }
 0x1a8   : > { %1600 = vst.msk [vmem:[%s2606_s24 + $0xc8] sm:$0xff] %vm352_vm1, %v1568_v49 }
 0x1a9   : > { %v954_v42 = vpop.f32.mrf.mxu2 }
 0x1aa   : > { %v995_v43 = vadd.f32 %v954_v42, %v700_v52  ;;  %v1241_v45 = vpop.f32.mrf.mxu3 }
 0x1ab   : > { %v701_v46 = vpop.f32.mrf.mxu1 }
 0x1ac   : > { %v1282_v4 = vadd.f32 %v1241_v45, %v995_v43  ;;  %v702_v54 = vadd.f32 %v701_v46, %v2543_v1 }
 0x1ad   : > { %v1530_v47 = vpop.f32.mrf.mxu0 }
 0x1ae   : > { %v1569_v53 = vadd.f32 %v1528_v41, %v1282_v4 }
 0x1b0   : > { %1601 = vst.msk [vmem:[%s2606_s24 + $0xd0] sm:$0xff] %vm352_vm1, %v1569_v53 }
 0x1b1   : > { %v956_v60 = vpop.f32.mrf.mxu2 }
 0x1b2   : > { %v996_v55 = vadd.f32 %v956_v60, %v702_v54  ;;  %v1243_v57 = vpop.f32.mrf.mxu3 }
 0x1b3   : > { %v704_v44 = vpop.f32.mrf.mxu1 }
 0x1b4   : > { %v1283_v10 = vadd.f32 %v1243_v57, %v996_v55  ;;  %v705_v58 = vadd.f32 %v704_v44, %v2559_v9 }
 0x1b5   : > { %v1533_v61 = vpop.f32.mrf.mxu0 }
 0x1b6   : > { %v1570_v7 = vadd.f32 %v1530_v47, %v1283_v10 }
 0x1b8   : > { %1602 = vst.msk [vmem:[%s2606_s24 + $0xd8] sm:$0xff] %vm352_vm1, %v1570_v7 }
 0x1b9   : > { %v959_v2 = vpop.f32.mrf.mxu2 }
 0x1ba   : > { %v997_v0 = vadd.f32 %v959_v2, %v705_v58  ;;  %v1246_v51 = vpop.f32.mrf.mxu3 }
 0x1bb   : > { %v706_v3 = vpop.f32.mrf.mxu1 }
 0x1bc   : > { %v1284_v50 = vadd.f32 %v1246_v51, %v997_v0  ;;  %v707_v1 = vadd.f32 %v706_v3, %v2567_v13 }
 0x1bd   : > { %v1535_v11 = vpop.f32.mrf.mxu0 }
 0x1be   : > { %v1571_v5 = vadd.f32 %v1533_v61, %v1284_v50 }
 0x1c0   : > { %1603 = vst.msk [vmem:[%s2606_s24 + $0xe0] sm:$0xff] %vm352_vm1, %v1571_v5 }
 0x1c1   : > { %v961_v6 = vpop.f32.mrf.mxu2 }
 0x1c2   : > { %v998_v14 = vadd.f32 %v961_v6, %v707_v1  ;;  %v1248_v8 = vpop.f32.mrf.mxu3 }
 0x1c3   : > { %v709_v15 = vpop.f32.mrf.mxu1 }
 0x1c4   : > { %v1285_v17 = vadd.f32 %v1248_v8, %v998_v14  ;;  %v710_v9 = vadd.f32 %v709_v15, %v2583_v21 }
 0x1c5   : > { %v1538_v28 = vpop.f32.mrf.mxu0 }
 0x1c6   : > { %v1572_v18 = vadd.f32 %v1535_v11, %v1285_v17 }
 0x1c8   : > { %1604 = vst.msk [vmem:[%s2606_s24 + $0xe8] sm:$0xff] %vm352_vm1, %v1572_v18 }
 0x1c9   : > { %v964_v26 = vpop.f32.mrf.mxu2 }
 0x1ca   : > { %v999_v16 = vadd.f32 %v964_v26, %v710_v9  ;;  %v1251_v27 = vpop.f32.mrf.mxu3 }
 0x1cb   : > { %v711_v29 = vpop.f32.mrf.mxu1 }
 0x1cc   : > { %v1286_v12 = vadd.f32 %v1251_v27, %v999_v16  ;;  %v712_v30 = vadd.f32 %v711_v29, %v2591_v25 }
 0x1cd   : > { %v1540_v32 = vpop.f32.mrf.mxu0 }
 0x1ce   : > { %v1573_v13 = vadd.f32 %v1538_v28, %v1286_v12 }
 0x1d0   : > { %1605 = vst.msk [vmem:[%s2606_s24 + $0xf0] sm:$0xff] %vm352_vm1, %v1573_v13 }
 0x1d1   : > { %v966_v31 = vpop.f32.mrf.mxu2 }
 0x1d2   : > { %v1000_v56 = vadd.f32 %v966_v31, %v712_v30  ;;  %v1253_v59 = vpop.f32.mrf.mxu3 }
 0x1d4   : > { %v1287_v22 = vadd.f32 %v1253_v59, %v1000_v56 }
 0x1d6   : > { %v1574_v20 = vadd.f32 %v1540_v32, %v1287_v22 }
 0x1d8   : > { %1606 = vst.msk [vmem:[%s2606_s24 + $0xf8] sm:$0xff] %vm352_vm1, %v1574_v20 }
 0x1d9 PF: > { %s12_s11 = sadd.s32 1, %s2381_s11   ;;  %s2771_s9 = smov %s2377_s10 }
 0x1da   : > { %p9_p5 = scmp.ge.s32.totalorder %s12_s11, 4   ;;  %s2772_s10 = smov %s2774_s12 }
 0x1dc   :  { %11 = sbr.rel (!%p9_p5) target bundleno = 2 (0x2), region = 69 }

// kernel: hfem_forward.25
= control target key start
LH: loop header
LB: loop body
LE: loop exit
PB: predicated region body
PF: predicated region fallthrough
CT: control target
= control target key end

     0   :  { %s1424_s1 = inlined_call_operand.vmem [shape: bf16[128,128], index: 1, kind: input, shape index: {}]   ;;  %s1425_s2 = inlined_call_operand.vmem [shape: f32[1,128], index: 2, kind: input, shape index: {}]   ;;  %s1426_s0 = inlined_call_operand.vmem [shape: bf16[512,128], index: 0, kind: input, shape index: {}]   ;;  %s1427_s3 = inlined_call_operand.vmem [shape: bf16[512,128], index: 3, kind: output, shape index: {}]  }
   0x1   :  { %v902_v0 = vld [vmem:[%s1424_s1 + $0x38] sm:$0xff]  ;;  %v901_v1 = vld [vmem:[%s1424_s1 + $0x30] sm:$0xff]  ;;  %v900_v2 = vld [vmem:[%s1424_s1 + $0x28] sm:$0xff] }
   0x2   :  { %338 = vmatpush.bf16.msra.mxu0 %v902_v0  ;;  %1094 = vmatpush.bf16.msra.mxu1 %v902_v0  ;;  %v899_v3 = vld [vmem:[%s1424_s1 + $0x20] sm:$0xff]  ;;  %v898_v4 = vld [vmem:[%s1424_s1 + $0x18] sm:$0xff]  ;;  %v897_v5 = vld [vmem:[%s1424_s1 + $0x10] sm:$0xff] }
   0x3   :  { %1095 = vmatpush.bf16.msra.mxu2 %v902_v0  ;;  %1096 = vmatpush.bf16.msra.mxu3 %v902_v0  ;;  %v896_v6 = vld [vmem:[%s1424_s1 + $0x8] sm:$0xff]  ;;  %v895_v7 = vld [vmem:[%s1424_s1] sm:$0xff]  ;;  %v865_v16 = vld [vmem:[%s1426_s0 + $0x10] sm:$0xff] }
   0x4   :  { %v863_v8 = vld [vmem:[%s1426_s0] sm:$0xff]  ;;  %v864_v12 = vld [vmem:[%s1426_s0 + $0x8] sm:$0xff]  ;;  %v873_v17 = vld [vmem:[%s1426_s0 + $0x50] sm:$0xff] }
   0x5   :  { %v871_v9 = vld [vmem:[%s1426_s0 + $0x40] sm:$0xff]  ;;  %v872_v13 = vld [vmem:[%s1426_s0 + $0x48] sm:$0xff]  ;;  %v881_v18 = vld [vmem:[%s1426_s0 + $0x90] sm:$0xff] }
   0x6   :  { %339 = vmatpush.bf16.msra.mxu0 %v901_v1  ;;  %1097 = vmatpush.bf16.msra.mxu1 %v901_v1  ;;  %v879_v10 = vld [vmem:[%s1426_s0 + $0x80] sm:$0xff]  ;;  %v880_v14 = vld [vmem:[%s1426_s0 + $0x88] sm:$0xff]  ;;  %v889_v19 = vld [vmem:[%s1426_s0 + $0xd0] sm:$0xff] }
   0x7   :  { %1098 = vmatpush.bf16.msra.mxu2 %v901_v1  ;;  %1099 = vmatpush.bf16.msra.mxu3 %v901_v1  ;;  %v887_v11 = vld [vmem:[%s1426_s0 + $0xc0] sm:$0xff]  ;;  %v888_v15 = vld [vmem:[%s1426_s0 + $0xc8] sm:$0xff]  ;;  %v866_v20 = vld [vmem:[%s1426_s0 + $0x18] sm:$0xff] }
   0x8   :  { %v874_v21 = vld [vmem:[%s1426_s0 + $0x58] sm:$0xff]  ;;  %v867_v24 = vld [vmem:[%s1426_s0 + $0x20] sm:$0xff]  ;;  %v868_v28 = vld [vmem:[%s1426_s0 + $0x28] sm:$0xff] }
   0x9   :  { %v882_v22 = vld [vmem:[%s1426_s0 + $0x98] sm:$0xff]  ;;  %v875_v25 = vld [vmem:[%s1426_s0 + $0x60] sm:$0xff]  ;;  %v876_v29 = vld [vmem:[%s1426_s0 + $0x68] sm:$0xff] }
   0xa   :  { %340 = vmatpush.bf16.msra.mxu0 %v900_v2  ;;  %1100 = vmatpush.bf16.msra.mxu1 %v900_v2  ;;  %v890_v23 = vld [vmem:[%s1426_s0 + $0xd8] sm:$0xff]  ;;  %v883_v26 = vld [vmem:[%s1426_s0 + $0xa0] sm:$0xff]  ;;  %v884_v30 = vld [vmem:[%s1426_s0 + $0xa8] sm:$0xff] }
   0xb   :  { %1101 = vmatpush.bf16.msra.mxu2 %v900_v2  ;;  %1102 = vmatpush.bf16.msra.mxu3 %v900_v2  ;;  %v891_v27 = vld [vmem:[%s1426_s0 + $0xe0] sm:$0xff]  ;;  %v892_v31 = vld [vmem:[%s1426_s0 + $0xe8] sm:$0xff]  ;;  %v869_v32 = vld [vmem:[%s1426_s0 + $0x30] sm:$0xff] }
   0xc   :  { %v877_v33 = vld [vmem:[%s1426_s0 + $0x70] sm:$0xff]  ;;  %v870_v36 = vld [vmem:[%s1426_s0 + $0x38] sm:$0xff]  ;;  %v1262_v42 = vld [vmem:[%s1425_s2] ss:$0 sm:$0xff] }
   0xd   :  { %v885_v34 = vld [vmem:[%s1426_s0 + $0xb0] sm:$0xff]  ;;  %v878_v37 = vld [vmem:[%s1426_s0 + $0x78] sm:$0xff] }
   0xe   :  { %341 = vmatpush.bf16.msra.mxu0 %v899_v3  ;;  %1103 = vmatpush.bf16.msra.mxu1 %v899_v3  ;;  %v893_v35 = vld [vmem:[%s1426_s0 + $0xf0] sm:$0xff]  ;;  %v886_v38 = vld [vmem:[%s1426_s0 + $0xb8] sm:$0xff] }
   0xf   :  { %1104 = vmatpush.bf16.msra.mxu2 %v899_v3  ;;  %1105 = vmatpush.bf16.msra.mxu3 %v899_v3  ;;  %v894_v39 = vld [vmem:[%s1426_s0 + $0xf8] sm:$0xff] }
  0x12   :  { %342 = vmatpush.bf16.msra.mxu0 %v898_v4  ;;  %1106 = vmatpush.bf16.msra.mxu1 %v898_v4 }
  0x13   :  { %1107 = vmatpush.bf16.msra.mxu2 %v898_v4  ;;  %1108 = vmatpush.bf16.msra.mxu3 %v898_v4 }
  0x16   :  { %343 = vmatpush.bf16.msra.mxu0 %v897_v5  ;;  %1109 = vmatpush.bf16.msra.mxu1 %v897_v5 }
  0x17   :  { %1110 = vmatpush.bf16.msra.mxu2 %v897_v5  ;;  %1111 = vmatpush.bf16.msra.mxu3 %v897_v5 }
  0x1a   :  { %344 = vmatpush.bf16.msra.mxu0 %v896_v6  ;;  %1112 = vmatpush.bf16.msra.mxu1 %v896_v6 }
  0x1b   :  { %1113 = vmatpush.bf16.msra.mxu2 %v896_v6  ;;  %1114 = vmatpush.bf16.msra.mxu3 %v896_v6 }
  0x1e   :  { %345 = vmatpush.bf16.msra.mxu0 %v895_v7  ;;  %1115 = vmatpush.bf16.msra.mxu1 %v895_v7 }
  0x1f   :  { %1116 = vmatpush.bf16.msra.mxu2 %v895_v7  ;;  %1117 = vmatpush.bf16.msra.mxu3 %v895_v7 }
  0x21   :  { %346 = vmatmul.bf16.vlgmr.msra.gmra.mxu0 %v863_v8  ;;  %386 = vmatmul.bf16.vlgmr.msra.gmra.mxu1 %v871_v9 }
  0x22   :  { %426 = vmatmul.bf16.vlgmr.msra.gmra.mxu2 %v879_v10  ;;  %466 = vmatmul.bf16.vlgmr.msra.gmra.mxu3 %v887_v11 }
  0x31   :  { %351 = vmatmul.bf16.gmra.mxu0 %v864_v12  ;;  %391 = vmatmul.bf16.gmra.mxu1 %v872_v13 }
  0x32   :  { %431 = vmatmul.bf16.gmra.mxu2 %v880_v14  ;;  %471 = vmatmul.bf16.gmra.mxu3 %v888_v15 }
  0x41   :  { %356 = vmatmul.bf16.gmra.mxu0 %v865_v16  ;;  %396 = vmatmul.bf16.gmra.mxu1 %v873_v17 }
  0x42   :  { %436 = vmatmul.bf16.gmra.mxu2 %v881_v18  ;;  %476 = vmatmul.bf16.gmra.mxu3 %v889_v19 }
  0x51   :  { %361 = vmatmul.bf16.gmra.mxu0 %v866_v20  ;;  %401 = vmatmul.bf16.gmra.mxu1 %v874_v21 }
  0x52   :  { %441 = vmatmul.bf16.gmra.mxu2 %v882_v22  ;;  %481 = vmatmul.bf16.gmra.mxu3 %v890_v23 }
  0x61   :  { %366 = vmatmul.bf16.gmra.mxu0 %v867_v24  ;;  %406 = vmatmul.bf16.gmra.mxu1 %v875_v25 }
  0x62   :  { %446 = vmatmul.bf16.gmra.mxu2 %v883_v26  ;;  %486 = vmatmul.bf16.gmra.mxu3 %v891_v27 }
  0x71   :  { %371 = vmatmul.bf16.gmra.mxu0 %v868_v28  ;;  %411 = vmatmul.bf16.gmra.mxu1 %v876_v29 }
  0x72   :  { %451 = vmatmul.bf16.gmra.mxu2 %v884_v30  ;;  %491 = vmatmul.bf16.gmra.mxu3 %v892_v31 }
  0x81   :  { %376 = vmatmul.bf16.gmra.mxu0 %v869_v32  ;;  %416 = vmatmul.bf16.gmra.mxu1 %v877_v33 }
  0x82   :  { %456 = vmatmul.bf16.gmra.mxu2 %v885_v34  ;;  %496 = vmatmul.bf16.gmra.mxu3 %v893_v35 }
  0x91   :  { %381 = vmatmul.bf16.gmra.mxu0 %v870_v36  ;;  %421 = vmatmul.bf16.gmra.mxu1 %v878_v37 }
  0x92   :  { %461 = vmatmul.bf16.gmra.mxu2 %v886_v38  ;;  %501 = vmatmul.bf16.gmra.mxu3 %v894_v39 }
  0x9e   :  { %v347_v40 = vpop.f32.mrf.mxu0  ;;  %v387_v41 = vpop.f32.mrf.mxu1 }
  0x9f   :  { %v348_v43 = vadd.f32 %v1262_v42, %v347_v40  ;;  %v388_v44 = vadd.f32 %v1262_v42, %v387_v41 }
  0xa1   :  { %v507_v51 = vmax.f32 %v348_v43, 0.0  ;;  %v523_v52 = vmax.f32 %v388_v44, 0.0 }
  0xa5   :  { %v427_v45 = vpop.f32.mrf.mxu2  ;;  %v467_v46 = vpop.f32.mrf.mxu3 }
  0xa6   :  { %v349_v47 = vpop.f32.mrf.mxu0  ;;  %v389_v48 = vpop.f32.mrf.mxu1  ;;  %v428_v57 = vadd.f32 %v1262_v42, %v427_v45  ;;  %v468_v58 = vadd.f32 %v1262_v42, %v467_v46 }
  0xa7   :  { %v350_v49 = vadd.f32 %v1262_v42, %v349_v47  ;;  %v390_v50 = vadd.f32 %v1262_v42, %v389_v48 }
  0xa8   :  { %v539_v1 = vmax.f32 %v428_v57, 0.0  ;;  %v555_v2 = vmax.f32 %v468_v58, 0.0 }
  0xa9   :  { %v508_v53 = vmax.f32 %v350_v49, 0.0  ;;  %v524_v54 = vmax.f32 %v390_v50, 0.0 }
  0xab   :  { %v906_v55 = vpack.c.bf16 %v508_v53, %v507_v51  ;;  %v946_v56 = vpack.c.bf16 %v524_v54, %v523_v52 }
  0xad   :  { %907 = vst [vmem:[%s1427_s3] sm:$0xff] %v906_v55   ;;  %v429_v59 = vpop.f32.mrf.mxu2  ;;  %v469_v60 = vpop.f32.mrf.mxu3 }
  0xae   :  { %1070 = vst [vmem:[%s1427_s3 + $0x40] sm:$0xff] %v946_v56   ;;  %v430_v61 = vadd.f32 %v1262_v42, %v429_v59  ;;  %v470_v62 = vadd.f32 %v1262_v42, %v469_v60  ;;  %v352_v63 = vpop.f32.mrf.mxu0  ;;  %v392_v0 = vpop.f32.mrf.mxu1 }
  0xaf   :  { %v353_v7 = vadd.f32 %v1262_v42, %v352_v63  ;;  %v393_v8 = vadd.f32 %v1262_v42, %v392_v0 }
  0xb0   :  { %v540_v3 = vmax.f32 %v430_v61, 0.0  ;;  %v556_v4 = vmax.f32 %v470_v62, 0.0 }
  0xb1   :  { %v509_v15 = vmax.f32 %v353_v7, 0.0  ;;  %v525_v16 = vmax.f32 %v393_v8, 0.0 }
  0xb2   :  { %v986_v5 = vpack.c.bf16 %v540_v3, %v539_v1  ;;  %v1026_v6 = vpack.c.bf16 %v556_v4, %v555_v2 }
  0xb4   :  { %1078 = vst [vmem:[%s1427_s3 + $0x80] sm:$0xff] %v986_v5  }
  0xb5   :  { %1086 = vst [vmem:[%s1427_s3 + $0xc0] sm:$0xff] %v1026_v6   ;;  %v432_v9 = vpop.f32.mrf.mxu2  ;;  %v472_v10 = vpop.f32.mrf.mxu3 }
  0xb6   :  { %v354_v11 = vpop.f32.mrf.mxu0  ;;  %v394_v12 = vpop.f32.mrf.mxu1  ;;  %v433_v21 = vadd.f32 %v1262_v42, %v432_v9  ;;  %v473_v22 = vadd.f32 %v1262_v42, %v472_v10 }
  0xb7   :  { %v355_v13 = vadd.f32 %v1262_v42, %v354_v11  ;;  %v395_v14 = vadd.f32 %v1262_v42, %v394_v12 }
  0xb8   :  { %v541_v29 = vmax.f32 %v433_v21, 0.0  ;;  %v557_v30 = vmax.f32 %v473_v22, 0.0 }
  0xb9   :  { %v510_v17 = vmax.f32 %v355_v13, 0.0  ;;  %v526_v18 = vmax.f32 %v395_v14, 0.0 }
  0xbb   :  { %v911_v19 = vpack.c.bf16 %v510_v17, %v509_v15  ;;  %v951_v20 = vpack.c.bf16 %v526_v18, %v525_v16 }
  0xbd   :  { %1063 = vst [vmem:[%s1427_s3 + $0x8] sm:$0xff] %v911_v19   ;;  %v434_v23 = vpop.f32.mrf.mxu2  ;;  %v474_v24 = vpop.f32.mrf.mxu3 }
  0xbe   :  { %1071 = vst [vmem:[%s1427_s3 + $0x48] sm:$0xff] %v951_v20   ;;  %v435_v25 = vadd.f32 %v1262_v42, %v434_v23  ;;  %v475_v26 = vadd.f32 %v1262_v42, %v474_v24  ;;  %v357_v27 = vpop.f32.mrf.mxu0  ;;  %v397_v28 = vpop.f32.mrf.mxu1 }
  0xbf   :  { %v358_v35 = vadd.f32 %v1262_v42, %v357_v27  ;;  %v398_v36 = vadd.f32 %v1262_v42, %v397_v28 }
  0xc0   :  { %v542_v31 = vmax.f32 %v435_v25, 0.0  ;;  %v558_v32 = vmax.f32 %v475_v26, 0.0 }
  0xc1   :  { %v511_v44 = vmax.f32 %v358_v35, 0.0  ;;  %v527_v45 = vmax.f32 %v398_v36, 0.0 }
  0xc2   :  { %v991_v33 = vpack.c.bf16 %v542_v31, %v541_v29  ;;  %v1031_v34 = vpack.c.bf16 %v558_v32, %v557_v30 }
  0xc4   :  { %1079 = vst [vmem:[%s1427_s3 + $0x88] sm:$0xff] %v991_v33  }
  0xc5   :  { %1087 = vst [vmem:[%s1427_s3 + $0xc8] sm:$0xff] %v1031_v34   ;;  %v437_v37 = vpop.f32.mrf.mxu2  ;;  %v477_v38 = vpop.f32.mrf.mxu3 }
  0xc6   :  { %v359_v39 = vpop.f32.mrf.mxu0  ;;  %v399_v40 = vpop.f32.mrf.mxu1  ;;  %v438_v50 = vadd.f32 %v1262_v42, %v437_v37  ;;  %v478_v51 = vadd.f32 %v1262_v42, %v477_v38 }
  0xc7   :  { %v360_v41 = vadd.f32 %v1262_v42, %v359_v39  ;;  %v400_v43 = vadd.f32 %v1262_v42, %v399_v40 }
  0xc8   :  { %v543_v58 = vmax.f32 %v438_v50, 0.0  ;;  %v559_v59 = vmax.f32 %v478_v51, 0.0 }
  0xc9   :  { %v512_v46 = vmax.f32 %v360_v41, 0.0  ;;  %v528_v47 = vmax.f32 %v400_v43, 0.0 }
  0xcb   :  { %v916_v48 = vpack.c.bf16 %v512_v46, %v511_v44  ;;  %v956_v49 = vpack.c.bf16 %v528_v47, %v527_v45 }
  0xcd   :  { %1064 = vst [vmem:[%s1427_s3 + $0x10] sm:$0xff] %v916_v48   ;;  %v439_v52 = vpop.f32.mrf.mxu2  ;;  %v479_v53 = vpop.f32.mrf.mxu3 }
  0xce   :  { %1072 = vst [vmem:[%s1427_s3 + $0x50] sm:$0xff] %v956_v49   ;;  %v440_v54 = vadd.f32 %v1262_v42, %v439_v52  ;;  %v480_v55 = vadd.f32 %v1262_v42, %v479_v53  ;;  %v362_v56 = vpop.f32.mrf.mxu0  ;;  %v402_v57 = vpop.f32.mrf.mxu1 }
  0xcf   :  { %v363_v0 = vadd.f32 %v1262_v42, %v362_v56  ;;  %v403_v1 = vadd.f32 %v1262_v42, %v402_v57 }
  0xd0   :  { %v544_v60 = vmax.f32 %v440_v54, 0.0  ;;  %v560_v61 = vmax.f32 %v480_v55, 0.0 }
  0xd1   :  { %v513_v8 = vmax.f32 %v363_v0, 0.0  ;;  %v529_v9 = vmax.f32 %v403_v1, 0.0 }
  0xd2   :  { %v996_v62 = vpack.c.bf16 %v544_v60, %v543_v58  ;;  %v1036_v63 = vpack.c.bf16 %v560_v61, %v559_v59 }
  0xd4   :  { %1080 = vst [vmem:[%s1427_s3 + $0x90] sm:$0xff] %v996_v62  }
  0xd5   :  { %1088 = vst [vmem:[%s1427_s3 + $0xd0] sm:$0xff] %v1036_v63   ;;  %v442_v2 = vpop.f32.mrf.mxu2  ;;  %v482_v3 = vpop.f32.mrf.mxu3 }
  0xd6   :  { %v364_v4 = vpop.f32.mrf.mxu0  ;;  %v404_v5 = vpop.f32.mrf.mxu1  ;;  %v443_v14 = vadd.f32 %v1262_v42, %v442_v2  ;;  %v483_v15 = vadd.f32 %v1262_v42, %v482_v3 }
  0xd7   :  { %v365_v6 = vadd.f32 %v1262_v42, %v364_v4  ;;  %v405_v7 = vadd.f32 %v1262_v42, %v404_v5 }
  0xd8   :  { %v545_v22 = vmax.f32 %v443_v14, 0.0  ;;  %v561_v23 = vmax.f32 %v483_v15, 0.0 }
  0xd9   :  { %v514_v10 = vmax.f32 %v365_v6, 0.0  ;;  %v530_v11 = vmax.f32 %v405_v7, 0.0 }
  0xdb   :  { %v921_v12 = vpack.c.bf16 %v514_v10, %v513_v8  ;;  %v961_v13 = vpack.c.bf16 %v530_v11, %v529_v9 }
  0xdd   :  { %1065 = vst [vmem:[%s1427_s3 + $0x18] sm:$0xff] %v921_v12   ;;  %v444_v16 = vpop.f32.mrf.mxu2  ;;  %v484_v17 = vpop.f32.mrf.mxu3 }
  0xde   :  { %1073 = vst [vmem:[%s1427_s3 + $0x58] sm:$0xff] %v961_v13   ;;  %v445_v18 = vadd.f32 %v1262_v42, %v444_v16  ;;  %v485_v19 = vadd.f32 %v1262_v42, %v484_v17  ;;  %v367_v20 = vpop.f32.mrf.mxu0  ;;  %v407_v21 = vpop.f32.mrf.mxu1 }
  0xdf   :  { %v368_v28 = vadd.f32 %v1262_v42, %v367_v20  ;;  %v408_v29 = vadd.f32 %v1262_v42, %v407_v21 }
  0xe0   :  { %v546_v24 = vmax.f32 %v445_v18, 0.0  ;;  %v562_v25 = vmax.f32 %v485_v19, 0.0 }
  0xe1   :  { %v515_v36 = vmax.f32 %v368_v28, 0.0  ;;  %v531_v37 = vmax.f32 %v408_v29, 0.0 }
  0xe2   :  { %v1001_v26 = vpack.c.bf16 %v546_v24, %v545_v22  ;;  %v1041_v27 = vpack.c.bf16 %v562_v25, %v561_v23 }
  0xe4   :  { %1081 = vst [vmem:[%s1427_s3 + $0x98] sm:$0xff] %v1001_v26  }
  0xe5   :  { %1089 = vst [vmem:[%s1427_s3 + $0xd8] sm:$0xff] %v1041_v27   ;;  %v447_v30 = vpop.f32.mrf.mxu2  ;;  %v487_v31 = vpop.f32.mrf.mxu3 }
  0xe6   :  { %v369_v32 = vpop.f32.mrf.mxu0  ;;  %v409_v33 = vpop.f32.mrf.mxu1  ;;  %v448_v43 = vadd.f32 %v1262_v42, %v447_v30  ;;  %v488_v44 = vadd.f32 %v1262_v42, %v487_v31 }
  0xe7   :  { %v370_v34 = vadd.f32 %v1262_v42, %v369_v32  ;;  %v410_v35 = vadd.f32 %v1262_v42, %v409_v33 }
  0xe8   :  { %v547_v51 = vmax.f32 %v448_v43, 0.0  ;;  %v563_v52 = vmax.f32 %v488_v44, 0.0 }
  0xe9   :  { %v516_v38 = vmax.f32 %v370_v34, 0.0  ;;  %v532_v39 = vmax.f32 %v410_v35, 0.0 }
  0xeb   :  { %v926_v40 = vpack.c.bf16 %v516_v38, %v515_v36  ;;  %v966_v41 = vpack.c.bf16 %v532_v39, %v531_v37 }
  0xed   :  { %1066 = vst [vmem:[%s1427_s3 + $0x20] sm:$0xff] %v926_v40   ;;  %v449_v45 = vpop.f32.mrf.mxu2  ;;  %v489_v46 = vpop.f32.mrf.mxu3 }
  0xee   :  { %1074 = vst [vmem:[%s1427_s3 + $0x60] sm:$0xff] %v966_v41   ;;  %v450_v47 = vadd.f32 %v1262_v42, %v449_v45  ;;  %v490_v48 = vadd.f32 %v1262_v42, %v489_v46  ;;  %v372_v49 = vpop.f32.mrf.mxu0  ;;  %v412_v50 = vpop.f32.mrf.mxu1 }
  0xef   :  { %v373_v57 = vadd.f32 %v1262_v42, %v372_v49  ;;  %v413_v58 = vadd.f32 %v1262_v42, %v412_v50 }
  0xf0   :  { %v548_v53 = vmax.f32 %v450_v47, 0.0  ;;  %v564_v54 = vmax.f32 %v490_v48, 0.0 }
  0xf1   :  { %v517_v1 = vmax.f32 %v373_v57, 0.0  ;;  %v533_v2 = vmax.f32 %v413_v58, 0.0 }
  0xf2   :  { %v1006_v55 = vpack.c.bf16 %v548_v53, %v547_v51  ;;  %v1046_v56 = vpack.c.bf16 %v564_v54, %v563_v52 }
  0xf4   :  { %1082 = vst [vmem:[%s1427_s3 + $0xa0] sm:$0xff] %v1006_v55  }
  0xf5   :  { %1090 = vst [vmem:[%s1427_s3 + $0xe0] sm:$0xff] %v1046_v56   ;;  %v452_v59 = vpop.f32.mrf.mxu2  ;;  %v492_v60 = vpop.f32.mrf.mxu3 }
  0xf6   :  { %v374_v61 = vpop.f32.mrf.mxu0  ;;  %v414_v62 = vpop.f32.mrf.mxu1  ;;  %v453_v7 = vadd.f32 %v1262_v42, %v452_v59  ;;  %v493_v8 = vadd.f32 %v1262_v42, %v492_v60 }
  0xf7   :  { %v375_v63 = vadd.f32 %v1262_v42, %v374_v61  ;;  %v415_v0 = vadd.f32 %v1262_v42, %v414_v62 }
  0xf8   :  { %v549_v15 = vmax.f32 %v453_v7, 0.0  ;;  %v565_v16 = vmax.f32 %v493_v8, 0.0 }
  0xf9   :  { %v518_v3 = vmax.f32 %v375_v63, 0.0  ;;  %v534_v4 = vmax.f32 %v415_v0, 0.0 }
  0xfb   :  { %v931_v5 = vpack.c.bf16 %v518_v3, %v517_v1  ;;  %v971_v6 = vpack.c.bf16 %v534_v4, %v533_v2 }
  0xfd   :  { %1067 = vst [vmem:[%s1427_s3 + $0x28] sm:$0xff] %v931_v5   ;;  %v454_v9 = vpop.f32.mrf.mxu2  ;;  %v494_v10 = vpop.f32.mrf.mxu3 }
  0xfe   :  { %1075 = vst [vmem:[%s1427_s3 + $0x68] sm:$0xff] %v971_v6   ;;  %v455_v11 = vadd.f32 %v1262_v42, %v454_v9  ;;  %v495_v12 = vadd.f32 %v1262_v42, %v494_v10  ;;  %v377_v13 = vpop.f32.mrf.mxu0  ;;  %v417_v14 = vpop.f32.mrf.mxu1 }
  0xff   :  { %v378_v21 = vadd.f32 %v1262_v42, %v377_v13  ;;  %v418_v22 = vadd.f32 %v1262_v42, %v417_v14 }
 0x100   :  { %v550_v17 = vmax.f32 %v455_v11, 0.0  ;;  %v566_v18 = vmax.f32 %v495_v12, 0.0 }
 0x101   :  { %v519_v29 = vmax.f32 %v378_v21, 0.0  ;;  %v535_v30 = vmax.f32 %v418_v22, 0.0 }
 0x102   :  { %v1011_v19 = vpack.c.bf16 %v550_v17, %v549_v15  ;;  %v1051_v20 = vpack.c.bf16 %v566_v18, %v565_v16 }
 0x104   :  { %1083 = vst [vmem:[%s1427_s3 + $0xa8] sm:$0xff] %v1011_v19  }
 0x105   :  { %1091 = vst [vmem:[%s1427_s3 + $0xe8] sm:$0xff] %v1051_v20   ;;  %v457_v23 = vpop.f32.mrf.mxu2  ;;  %v497_v24 = vpop.f32.mrf.mxu3 }
 0x106   :  { %v379_v25 = vpop.f32.mrf.mxu0  ;;  %v419_v26 = vpop.f32.mrf.mxu1  ;;  %v458_v35 = vadd.f32 %v1262_v42, %v457_v23  ;;  %v498_v36 = vadd.f32 %v1262_v42, %v497_v24 }
 0x107   :  { %v380_v27 = vadd.f32 %v1262_v42, %v379_v25  ;;  %v420_v28 = vadd.f32 %v1262_v42, %v419_v26 }
 0x108   :  { %v551_v44 = vmax.f32 %v458_v35, 0.0  ;;  %v567_v45 = vmax.f32 %v498_v36, 0.0 }
 0x109   :  { %v520_v31 = vmax.f32 %v380_v27, 0.0  ;;  %v536_v32 = vmax.f32 %v420_v28, 0.0 }
 0x10b   :  { %v936_v33 = vpack.c.bf16 %v520_v31, %v519_v29  ;;  %v976_v34 = vpack.c.bf16 %v536_v32, %v535_v30 }
 0x10d   :  { %1068 = vst [vmem:[%s1427_s3 + $0x30] sm:$0xff] %v936_v33   ;;  %v459_v37 = vpop.f32.mrf.mxu2  ;;  %v499_v38 = vpop.f32.mrf.mxu3 }
 0x10e   :  { %1076 = vst [vmem:[%s1427_s3 + $0x70] sm:$0xff] %v976_v34   ;;  %v460_v39 = vadd.f32 %v1262_v42, %v459_v37  ;;  %v500_v40 = vadd.f32 %v1262_v42, %v499_v38  ;;  %v382_v41 = vpop.f32.mrf.mxu0  ;;  %v422_v43 = vpop.f32.mrf.mxu1 }
 0x10f   :  { %v383_v50 = vadd.f32 %v1262_v42, %v382_v41  ;;  %v423_v51 = vadd.f32 %v1262_v42, %v422_v43 }
 0x110   :  { %v552_v46 = vmax.f32 %v460_v39, 0.0  ;;  %v568_v47 = vmax.f32 %v500_v40, 0.0 }
 0x111   :  { %v521_v58 = vmax.f32 %v383_v50, 0.0  ;;  %v537_v59 = vmax.f32 %v423_v51, 0.0 }
 0x112   :  { %v1016_v48 = vpack.c.bf16 %v552_v46, %v551_v44  ;;  %v1056_v49 = vpack.c.bf16 %v568_v47, %v567_v45 }
 0x114   :  { %1084 = vst [vmem:[%s1427_s3 + $0xb0] sm:$0xff] %v1016_v48  }
 0x115   :  { %1092 = vst [vmem:[%s1427_s3 + $0xf0] sm:$0xff] %v1056_v49   ;;  %v462_v52 = vpop.f32.mrf.mxu2  ;;  %v502_v53 = vpop.f32.mrf.mxu3 }
 0x116   :  { %v384_v54 = vpop.f32.mrf.mxu0  ;;  %v424_v55 = vpop.f32.mrf.mxu1  ;;  %v463_v0 = vadd.f32 %v1262_v42, %v462_v52  ;;  %v503_v1 = vadd.f32 %v1262_v42, %v502_v53 }
 0x117   :  { %v385_v56 = vadd.f32 %v1262_v42, %v384_v54  ;;  %v425_v57 = vadd.f32 %v1262_v42, %v424_v55 }
 0x118   :  { %v553_v6 = vmax.f32 %v463_v0, 0.0  ;;  %v569_v7 = vmax.f32 %v503_v1, 0.0 }
 0x119   :  { %v522_v60 = vmax.f32 %v385_v56, 0.0  ;;  %v538_v61 = vmax.f32 %v425_v57, 0.0 }
 0x11b   :  { %v941_v62 = vpack.c.bf16 %v522_v60, %v521_v58  ;;  %v981_v63 = vpack.c.bf16 %v538_v61, %v537_v59 }
 0x11d   :  { %1069 = vst [vmem:[%s1427_s3 + $0x38] sm:$0xff] %v941_v62   ;;  %v464_v2 = vpop.f32.mrf.mxu2  ;;  %v504_v3 = vpop.f32.mrf.mxu3 }
 0x11e   :  { %1077 = vst [vmem:[%s1427_s3 + $0x78] sm:$0xff] %v981_v63   ;;  %v465_v4 = vadd.f32 %v1262_v42, %v464_v2  ;;  %v505_v5 = vadd.f32 %v1262_v42, %v504_v3 }
 0x120   :  { %v554_v8 = vmax.f32 %v465_v4, 0.0  ;;  %v570_v9 = vmax.f32 %v505_v5, 0.0 }
 0x122   :  { %v1021_v10 = vpack.c.bf16 %v554_v8, %v553_v6  ;;  %v1061_v11 = vpack.c.bf16 %v570_v9, %v569_v7 }
 0x124   :  { %1085 = vst [vmem:[%s1427_s3 + $0xb8] sm:$0xff] %v1021_v10  }
 0x125   :  { %1093 = vst [vmem:[%s1427_s3 + $0xf8] sm:$0xff] %v1061_v11  }

// kernel: hfem_forward.26
= control target key start
LH: loop header
LB: loop body
LE: loop exit
PB: predicated region body
PF: predicated region fallthrough
CT: control target
= control target key end

     0   :  { %s1201_s1 = inlined_call_operand.vmem [shape: bf16[128,128], index: 1, kind: input, shape index: {}]   ;;  %s1202_s2 = inlined_call_operand.vmem [shape: f32[1,128], index: 2, kind: input, shape index: {}]   ;;  %s1203_s0 = inlined_call_operand.vmem [shape: bf16[512,128], index: 0, kind: input, shape index: {}]   ;;  %s1204_s3 = inlined_call_operand.vmem [shape: f32[512,128], index: 3, kind: output, shape index: {}]  }
   0x1   :  { %v774_v0 = vld [vmem:[%s1201_s1 + $0x38] sm:$0xff]  ;;  %v773_v1 = vld [vmem:[%s1201_s1 + $0x30] sm:$0xff]  ;;  %v772_v2 = vld [vmem:[%s1201_s1 + $0x28] sm:$0xff] }
   0x2   :  { %338 = vmatpush.bf16.msra.mxu0 %v774_v0  ;;  %775 = vmatpush.bf16.msra.mxu1 %v774_v0  ;;  %v771_v3 = vld [vmem:[%s1201_s1 + $0x20] sm:$0xff]  ;;  %v770_v4 = vld [vmem:[%s1201_s1 + $0x18] sm:$0xff]  ;;  %v769_v5 = vld [vmem:[%s1201_s1 + $0x10] sm:$0xff] }
   0x3   :  { %776 = vmatpush.bf16.msra.mxu2 %v774_v0  ;;  %777 = vmatpush.bf16.msra.mxu3 %v774_v0  ;;  %v768_v6 = vld [vmem:[%s1201_s1 + $0x8] sm:$0xff]  ;;  %v767_v7 = vld [vmem:[%s1201_s1] sm:$0xff]  ;;  %v737_v16 = vld [vmem:[%s1203_s0 + $0x10] sm:$0xff] }
   0x4   :  { %v735_v8 = vld [vmem:[%s1203_s0] sm:$0xff]  ;;  %v736_v12 = vld [vmem:[%s1203_s0 + $0x8] sm:$0xff]  ;;  %v745_v17 = vld [vmem:[%s1203_s0 + $0x50] sm:$0xff] }
   0x5   :  { %v743_v9 = vld [vmem:[%s1203_s0 + $0x40] sm:$0xff]  ;;  %v744_v13 = vld [vmem:[%s1203_s0 + $0x48] sm:$0xff]  ;;  %v753_v18 = vld [vmem:[%s1203_s0 + $0x90] sm:$0xff] }
   0x6   :  { %339 = vmatpush.bf16.msra.mxu0 %v773_v1  ;;  %778 = vmatpush.bf16.msra.mxu1 %v773_v1  ;;  %v751_v10 = vld [vmem:[%s1203_s0 + $0x80] sm:$0xff]  ;;  %v752_v14 = vld [vmem:[%s1203_s0 + $0x88] sm:$0xff]  ;;  %v761_v19 = vld [vmem:[%s1203_s0 + $0xd0] sm:$0xff] }
   0x7   :  { %779 = vmatpush.bf16.msra.mxu2 %v773_v1  ;;  %780 = vmatpush.bf16.msra.mxu3 %v773_v1  ;;  %v759_v11 = vld [vmem:[%s1203_s0 + $0xc0] sm:$0xff]  ;;  %v760_v15 = vld [vmem:[%s1203_s0 + $0xc8] sm:$0xff]  ;;  %v738_v20 = vld [vmem:[%s1203_s0 + $0x18] sm:$0xff] }
   0x8   :  { %v746_v21 = vld [vmem:[%s1203_s0 + $0x58] sm:$0xff]  ;;  %v739_v24 = vld [vmem:[%s1203_s0 + $0x20] sm:$0xff]  ;;  %v740_v28 = vld [vmem:[%s1203_s0 + $0x28] sm:$0xff] }
   0x9   :  { %v754_v22 = vld [vmem:[%s1203_s0 + $0x98] sm:$0xff]  ;;  %v747_v25 = vld [vmem:[%s1203_s0 + $0x60] sm:$0xff]  ;;  %v748_v29 = vld [vmem:[%s1203_s0 + $0x68] sm:$0xff] }
   0xa   :  { %340 = vmatpush.bf16.msra.mxu0 %v772_v2  ;;  %781 = vmatpush.bf16.msra.mxu1 %v772_v2  ;;  %v762_v23 = vld [vmem:[%s1203_s0 + $0xd8] sm:$0xff]  ;;  %v755_v26 = vld [vmem:[%s1203_s0 + $0xa0] sm:$0xff]  ;;  %v756_v30 = vld [vmem:[%s1203_s0 + $0xa8] sm:$0xff] }
   0xb   :  { %782 = vmatpush.bf16.msra.mxu2 %v772_v2  ;;  %783 = vmatpush.bf16.msra.mxu3 %v772_v2  ;;  %v763_v27 = vld [vmem:[%s1203_s0 + $0xe0] sm:$0xff]  ;;  %v764_v31 = vld [vmem:[%s1203_s0 + $0xe8] sm:$0xff]  ;;  %v741_v32 = vld [vmem:[%s1203_s0 + $0x30] sm:$0xff] }
   0xc   :  { %v749_v33 = vld [vmem:[%s1203_s0 + $0x70] sm:$0xff]  ;;  %v742_v36 = vld [vmem:[%s1203_s0 + $0x38] sm:$0xff]  ;;  %v943_v40 = vld [vmem:[%s1202_s2] ss:$0 sm:$0xff] }
   0xd   :  { %v757_v34 = vld [vmem:[%s1203_s0 + $0xb0] sm:$0xff]  ;;  %v750_v37 = vld [vmem:[%s1203_s0 + $0x78] sm:$0xff] }
   0xe   :  { %341 = vmatpush.bf16.msra.mxu0 %v771_v3  ;;  %784 = vmatpush.bf16.msra.mxu1 %v771_v3  ;;  %v765_v35 = vld [vmem:[%s1203_s0 + $0xf0] sm:$0xff]  ;;  %v758_v38 = vld [vmem:[%s1203_s0 + $0xb8] sm:$0xff] }
   0xf   :  { %785 = vmatpush.bf16.msra.mxu2 %v771_v3  ;;  %786 = vmatpush.bf16.msra.mxu3 %v771_v3  ;;  %v766_v39 = vld [vmem:[%s1203_s0 + $0xf8] sm:$0xff] }
  0x12   :  { %342 = vmatpush.bf16.msra.mxu0 %v770_v4  ;;  %787 = vmatpush.bf16.msra.mxu1 %v770_v4 }
  0x13   :  { %788 = vmatpush.bf16.msra.mxu2 %v770_v4  ;;  %789 = vmatpush.bf16.msra.mxu3 %v770_v4 }
  0x16   :  { %343 = vmatpush.bf16.msra.mxu0 %v769_v5  ;;  %790 = vmatpush.bf16.msra.mxu1 %v769_v5 }
  0x17   :  { %791 = vmatpush.bf16.msra.mxu2 %v769_v5  ;;  %792 = vmatpush.bf16.msra.mxu3 %v769_v5 }
  0x1a   :  { %344 = vmatpush.bf16.msra.mxu0 %v768_v6  ;;  %793 = vmatpush.bf16.msra.mxu1 %v768_v6 }
  0x1b   :  { %794 = vmatpush.bf16.msra.mxu2 %v768_v6  ;;  %795 = vmatpush.bf16.msra.mxu3 %v768_v6 }
  0x1e   :  { %345 = vmatpush.bf16.msra.mxu0 %v767_v7  ;;  %796 = vmatpush.bf16.msra.mxu1 %v767_v7 }
  0x1f   :  { %797 = vmatpush.bf16.msra.mxu2 %v767_v7  ;;  %798 = vmatpush.bf16.msra.mxu3 %v767_v7 }
  0x21   :  { %346 = vmatmul.bf16.vlgmr.msra.gmra.mxu0 %v735_v8  ;;  %386 = vmatmul.bf16.vlgmr.msra.gmra.mxu1 %v743_v9 }
  0x22   :  { %426 = vmatmul.bf16.vlgmr.msra.gmra.mxu2 %v751_v10  ;;  %466 = vmatmul.bf16.vlgmr.msra.gmra.mxu3 %v759_v11 }
  0x31   :  { %351 = vmatmul.bf16.gmra.mxu0 %v736_v12  ;;  %391 = vmatmul.bf16.gmra.mxu1 %v744_v13 }
  0x32   :  { %431 = vmatmul.bf16.gmra.mxu2 %v752_v14  ;;  %471 = vmatmul.bf16.gmra.mxu3 %v760_v15 }
  0x41   :  { %356 = vmatmul.bf16.gmra.mxu0 %v737_v16  ;;  %396 = vmatmul.bf16.gmra.mxu1 %v745_v17 }
  0x42   :  { %436 = vmatmul.bf16.gmra.mxu2 %v753_v18  ;;  %476 = vmatmul.bf16.gmra.mxu3 %v761_v19 }
  0x51   :  { %361 = vmatmul.bf16.gmra.mxu0 %v738_v20  ;;  %401 = vmatmul.bf16.gmra.mxu1 %v746_v21 }
  0x52   :  { %441 = vmatmul.bf16.gmra.mxu2 %v754_v22  ;;  %481 = vmatmul.bf16.gmra.mxu3 %v762_v23 }
  0x61   :  { %366 = vmatmul.bf16.gmra.mxu0 %v739_v24  ;;  %406 = vmatmul.bf16.gmra.mxu1 %v747_v25 }
  0x62   :  { %446 = vmatmul.bf16.gmra.mxu2 %v755_v26  ;;  %486 = vmatmul.bf16.gmra.mxu3 %v763_v27 }
  0x71   :  { %371 = vmatmul.bf16.gmra.mxu0 %v740_v28  ;;  %411 = vmatmul.bf16.gmra.mxu1 %v748_v29 }
  0x72   :  { %451 = vmatmul.bf16.gmra.mxu2 %v756_v30  ;;  %491 = vmatmul.bf16.gmra.mxu3 %v764_v31 }
  0x81   :  { %376 = vmatmul.bf16.gmra.mxu0 %v741_v32  ;;  %416 = vmatmul.bf16.gmra.mxu1 %v749_v33 }
  0x82   :  { %456 = vmatmul.bf16.gmra.mxu2 %v757_v34  ;;  %496 = vmatmul.bf16.gmra.mxu3 %v765_v35 }
  0x91   :  { %381 = vmatmul.bf16.gmra.mxu0 %v742_v36  ;;  %421 = vmatmul.bf16.gmra.mxu1 %v750_v37 }
  0x92   :  { %461 = vmatmul.bf16.gmra.mxu2 %v758_v38  ;;  %501 = vmatmul.bf16.gmra.mxu3 %v766_v39 }
  0x9e   :  { %v347_v41 = vpop.f32.mrf.mxu0  ;;  %v387_v42 = vpop.f32.mrf.mxu1 }
  0x9f   :  { %v348_v43 = vadd.f32 %v943_v40, %v347_v41  ;;  %v388_v44 = vadd.f32 %v943_v40, %v387_v42 }
  0xa1   :  { %507 = vst [vmem:[%s1204_s3] sm:$0xff] %v348_v43 }
  0xa2   :  { %523 = vst [vmem:[%s1204_s3 + $0x80] sm:$0xff] %v388_v44 }
  0xa5   :  { %v427_v45 = vpop.f32.mrf.mxu2  ;;  %v467_v46 = vpop.f32.mrf.mxu3 }
  0xa6   :  { %v428_v47 = vadd.f32 %v943_v40, %v427_v45  ;;  %v468_v48 = vadd.f32 %v943_v40, %v467_v46  ;;  %v349_v49 = vpop.f32.mrf.mxu0  ;;  %v389_v50 = vpop.f32.mrf.mxu1 }
  0xa7   :  { %v350_v51 = vadd.f32 %v943_v40, %v349_v49  ;;  %v390_v52 = vadd.f32 %v943_v40, %v389_v50 }
  0xa8   :  { %539 = vst [vmem:[%s1204_s3 + $0x100] sm:$0xff] %v428_v47 }
  0xa9   :  { %555 = vst [vmem:[%s1204_s3 + $0x180] sm:$0xff] %v468_v48 }
  0xaa   :  { %508 = vst [vmem:[%s1204_s3 + $0x8] sm:$0xff] %v350_v51 }
  0xab   :  { %524 = vst [vmem:[%s1204_s3 + $0x88] sm:$0xff] %v390_v52 }
  0xad   :  { %v429_v53 = vpop.f32.mrf.mxu2  ;;  %v469_v54 = vpop.f32.mrf.mxu3 }
  0xae   :  { %v430_v55 = vadd.f32 %v943_v40, %v429_v53  ;;  %v470_v56 = vadd.f32 %v943_v40, %v469_v54  ;;  %v352_v57 = vpop.f32.mrf.mxu0  ;;  %v392_v58 = vpop.f32.mrf.mxu1 }
  0xaf   :  { %v353_v59 = vadd.f32 %v943_v40, %v352_v57  ;;  %v393_v60 = vadd.f32 %v943_v40, %v392_v58 }
  0xb0   :  { %540 = vst [vmem:[%s1204_s3 + $0x108] sm:$0xff] %v430_v55 }
  0xb1   :  { %556 = vst [vmem:[%s1204_s3 + $0x188] sm:$0xff] %v470_v56 }
  0xb2   :  { %509 = vst [vmem:[%s1204_s3 + $0x10] sm:$0xff] %v353_v59 }
  0xb3   :  { %525 = vst [vmem:[%s1204_s3 + $0x90] sm:$0xff] %v393_v60 }
  0xb5   :  { %v432_v61 = vpop.f32.mrf.mxu2  ;;  %v472_v62 = vpop.f32.mrf.mxu3 }
  0xb6   :  { %v433_v63 = vadd.f32 %v943_v40, %v432_v61  ;;  %v473_v0 = vadd.f32 %v943_v40, %v472_v62  ;;  %v354_v1 = vpop.f32.mrf.mxu0  ;;  %v394_v2 = vpop.f32.mrf.mxu1 }
  0xb7   :  { %v355_v3 = vadd.f32 %v943_v40, %v354_v1  ;;  %v395_v4 = vadd.f32 %v943_v40, %v394_v2 }
  0xb8   :  { %541 = vst [vmem:[%s1204_s3 + $0x110] sm:$0xff] %v433_v63 }
  0xb9   :  { %557 = vst [vmem:[%s1204_s3 + $0x190] sm:$0xff] %v473_v0 }
  0xba   :  { %510 = vst [vmem:[%s1204_s3 + $0x18] sm:$0xff] %v355_v3 }
  0xbb   :  { %526 = vst [vmem:[%s1204_s3 + $0x98] sm:$0xff] %v395_v4 }
  0xbd   :  { %v434_v5 = vpop.f32.mrf.mxu2  ;;  %v474_v6 = vpop.f32.mrf.mxu3 }
  0xbe   :  { %v435_v7 = vadd.f32 %v943_v40, %v434_v5  ;;  %v475_v8 = vadd.f32 %v943_v40, %v474_v6  ;;  %v357_v9 = vpop.f32.mrf.mxu0  ;;  %v397_v10 = vpop.f32.mrf.mxu1 }
  0xbf   :  { %v358_v11 = vadd.f32 %v943_v40, %v357_v9  ;;  %v398_v12 = vadd.f32 %v943_v40, %v397_v10 }
  0xc0   :  { %542 = vst [vmem:[%s1204_s3 + $0x118] sm:$0xff] %v435_v7 }
  0xc1   :  { %558 = vst [vmem:[%s1204_s3 + $0x198] sm:$0xff] %v475_v8 }
  0xc2   :  { %511 = vst [vmem:[%s1204_s3 + $0x20] sm:$0xff] %v358_v11 }
  0xc3   :  { %527 = vst [vmem:[%s1204_s3 + $0xa0] sm:$0xff] %v398_v12 }
  0xc5   :  { %v437_v13 = vpop.f32.mrf.mxu2  ;;  %v477_v14 = vpop.f32.mrf.mxu3 }
  0xc6   :  { %v438_v15 = vadd.f32 %v943_v40, %v437_v13  ;;  %v478_v16 = vadd.f32 %v943_v40, %v477_v14  ;;  %v359_v17 = vpop.f32.mrf.mxu0  ;;  %v399_v18 = vpop.f32.mrf.mxu1 }
  0xc7   :  { %v360_v19 = vadd.f32 %v943_v40, %v359_v17  ;;  %v400_v20 = vadd.f32 %v943_v40, %v399_v18 }
  0xc8   :  { %543 = vst [vmem:[%s1204_s3 + $0x120] sm:$0xff] %v438_v15 }
  0xc9   :  { %559 = vst [vmem:[%s1204_s3 + $0x1a0] sm:$0xff] %v478_v16 }
  0xca   :  { %512 = vst [vmem:[%s1204_s3 + $0x28] sm:$0xff] %v360_v19 }
  0xcb   :  { %528 = vst [vmem:[%s1204_s3 + $0xa8] sm:$0xff] %v400_v20 }
  0xcd   :  { %v439_v21 = vpop.f32.mrf.mxu2  ;;  %v479_v22 = vpop.f32.mrf.mxu3 }
  0xce   :  { %v440_v23 = vadd.f32 %v943_v40, %v439_v21  ;;  %v480_v24 = vadd.f32 %v943_v40, %v479_v22  ;;  %v362_v25 = vpop.f32.mrf.mxu0  ;;  %v402_v26 = vpop.f32.mrf.mxu1 }
  0xcf   :  { %v363_v27 = vadd.f32 %v943_v40, %v362_v25  ;;  %v403_v28 = vadd.f32 %v943_v40, %v402_v26 }
  0xd0   :  { %544 = vst [vmem:[%s1204_s3 + $0x128] sm:$0xff] %v440_v23 }
  0xd1   :  { %560 = vst [vmem:[%s1204_s3 + $0x1a8] sm:$0xff] %v480_v24 }
  0xd2   :  { %513 = vst [vmem:[%s1204_s3 + $0x30] sm:$0xff] %v363_v27 }
  0xd3   :  { %529 = vst [vmem:[%s1204_s3 + $0xb0] sm:$0xff] %v403_v28 }
  0xd5   :  { %v442_v29 = vpop.f32.mrf.mxu2  ;;  %v482_v30 = vpop.f32.mrf.mxu3 }
  0xd6   :  { %v443_v31 = vadd.f32 %v943_v40, %v442_v29  ;;  %v483_v32 = vadd.f32 %v943_v40, %v482_v30  ;;  %v364_v33 = vpop.f32.mrf.mxu0  ;;  %v404_v34 = vpop.f32.mrf.mxu1 }
  0xd7   :  { %v365_v35 = vadd.f32 %v943_v40, %v364_v33  ;;  %v405_v36 = vadd.f32 %v943_v40, %v404_v34 }
  0xd8   :  { %545 = vst [vmem:[%s1204_s3 + $0x130] sm:$0xff] %v443_v31 }
  0xd9   :  { %561 = vst [vmem:[%s1204_s3 + $0x1b0] sm:$0xff] %v483_v32 }
  0xda   :  { %514 = vst [vmem:[%s1204_s3 + $0x38] sm:$0xff] %v365_v35 }
  0xdb   :  { %530 = vst [vmem:[%s1204_s3 + $0xb8] sm:$0xff] %v405_v36 }
  0xdd   :  { %v444_v37 = vpop.f32.mrf.mxu2  ;;  %v484_v38 = vpop.f32.mrf.mxu3 }
  0xde   :  { %v445_v39 = vadd.f32 %v943_v40, %v444_v37  ;;  %v485_v41 = vadd.f32 %v943_v40, %v484_v38  ;;  %v367_v42 = vpop.f32.mrf.mxu0  ;;  %v407_v43 = vpop.f32.mrf.mxu1 }
  0xdf   :  { %v368_v44 = vadd.f32 %v943_v40, %v367_v42  ;;  %v408_v45 = vadd.f32 %v943_v40, %v407_v43 }
  0xe0   :  { %546 = vst [vmem:[%s1204_s3 + $0x138] sm:$0xff] %v445_v39 }
  0xe1   :  { %562 = vst [vmem:[%s1204_s3 + $0x1b8] sm:$0xff] %v485_v41 }
  0xe2   :  { %515 = vst [vmem:[%s1204_s3 + $0x40] sm:$0xff] %v368_v44 }
  0xe3   :  { %531 = vst [vmem:[%s1204_s3 + $0xc0] sm:$0xff] %v408_v45 }
  0xe5   :  { %v447_v46 = vpop.f32.mrf.mxu2  ;;  %v487_v47 = vpop.f32.mrf.mxu3 }
  0xe6   :  { %v448_v48 = vadd.f32 %v943_v40, %v447_v46  ;;  %v488_v49 = vadd.f32 %v943_v40, %v487_v47  ;;  %v369_v50 = vpop.f32.mrf.mxu0  ;;  %v409_v51 = vpop.f32.mrf.mxu1 }
  0xe7   :  { %v370_v52 = vadd.f32 %v943_v40, %v369_v50  ;;  %v410_v53 = vadd.f32 %v943_v40, %v409_v51 }
  0xe8   :  { %547 = vst [vmem:[%s1204_s3 + $0x140] sm:$0xff] %v448_v48 }
  0xe9   :  { %563 = vst [vmem:[%s1204_s3 + $0x1c0] sm:$0xff] %v488_v49 }
  0xea   :  { %516 = vst [vmem:[%s1204_s3 + $0x48] sm:$0xff] %v370_v52 }
  0xeb   :  { %532 = vst [vmem:[%s1204_s3 + $0xc8] sm:$0xff] %v410_v53 }
  0xed   :  { %v449_v54 = vpop.f32.mrf.mxu2  ;;  %v489_v55 = vpop.f32.mrf.mxu3 }
  0xee   :  { %v450_v56 = vadd.f32 %v943_v40, %v449_v54  ;;  %v490_v57 = vadd.f32 %v943_v40, %v489_v55  ;;  %v372_v58 = vpop.f32.mrf.mxu0  ;;  %v412_v59 = vpop.f32.mrf.mxu1 }
  0xef   :  { %v373_v60 = vadd.f32 %v943_v40, %v372_v58  ;;  %v413_v61 = vadd.f32 %v943_v40, %v412_v59 }
  0xf0   :  { %548 = vst [vmem:[%s1204_s3 + $0x148] sm:$0xff] %v450_v56 }
  0xf1   :  { %564 = vst [vmem:[%s1204_s3 + $0x1c8] sm:$0xff] %v490_v57 }
  0xf2   :  { %517 = vst [vmem:[%s1204_s3 + $0x50] sm:$0xff] %v373_v60 }
  0xf3   :  { %533 = vst [vmem:[%s1204_s3 + $0xd0] sm:$0xff] %v413_v61 }
  0xf5   :  { %v452_v62 = vpop.f32.mrf.mxu2  ;;  %v492_v63 = vpop.f32.mrf.mxu3 }
  0xf6   :  { %v453_v0 = vadd.f32 %v943_v40, %v452_v62  ;;  %v493_v1 = vadd.f32 %v943_v40, %v492_v63  ;;  %v374_v2 = vpop.f32.mrf.mxu0  ;;  %v414_v3 = vpop.f32.mrf.mxu1 }
  0xf7   :  { %v375_v4 = vadd.f32 %v943_v40, %v374_v2  ;;  %v415_v5 = vadd.f32 %v943_v40, %v414_v3 }
  0xf8   :  { %549 = vst [vmem:[%s1204_s3 + $0x150] sm:$0xff] %v453_v0 }
  0xf9   :  { %565 = vst [vmem:[%s1204_s3 + $0x1d0] sm:$0xff] %v493_v1 }
  0xfa   :  { %518 = vst [vmem:[%s1204_s3 + $0x58] sm:$0xff] %v375_v4 }
  0xfb   :  { %534 = vst [vmem:[%s1204_s3 + $0xd8] sm:$0xff] %v415_v5 }
  0xfd   :  { %v454_v6 = vpop.f32.mrf.mxu2  ;;  %v494_v7 = vpop.f32.mrf.mxu3 }
  0xfe   :  { %v455_v8 = vadd.f32 %v943_v40, %v454_v6  ;;  %v495_v9 = vadd.f32 %v943_v40, %v494_v7  ;;  %v377_v10 = vpop.f32.mrf.mxu0  ;;  %v417_v11 = vpop.f32.mrf.mxu1 }
  0xff   :  { %v378_v12 = vadd.f32 %v943_v40, %v377_v10  ;;  %v418_v13 = vadd.f32 %v943_v40, %v417_v11 }
 0x100   :  { %550 = vst [vmem:[%s1204_s3 + $0x158] sm:$0xff] %v455_v8 }
 0x101   :  { %566 = vst [vmem:[%s1204_s3 + $0x1d8] sm:$0xff] %v495_v9 }
 0x102   :  { %519 = vst [vmem:[%s1204_s3 + $0x60] sm:$0xff] %v378_v12 }
 0x103   :  { %535 = vst [vmem:[%s1204_s3 + $0xe0] sm:$0xff] %v418_v13 }
 0x105   :  { %v457_v14 = vpop.f32.mrf.mxu2  ;;  %v497_v15 = vpop.f32.mrf.mxu3 }
 0x106   :  { %v458_v16 = vadd.f32 %v943_v40, %v457_v14  ;;  %v498_v17 = vadd.f32 %v943_v40, %v497_v15  ;;  %v379_v18 = vpop.f32.mrf.mxu0  ;;  %v419_v19 = vpop.f32.mrf.mxu1 }
 0x107   :  { %v380_v20 = vadd.f32 %v943_v40, %v379_v18  ;;  %v420_v21 = vadd.f32 %v943_v40, %v419_v19 }
 0x108   :  { %551 = vst [vmem:[%s1204_s3 + $0x160] sm:$0xff] %v458_v16 }
 0x109   :  { %567 = vst [vmem:[%s1204_s3 + $0x1e0] sm:$0xff] %v498_v17 }
 0x10a   :  { %520 = vst [vmem:[%s1204_s3 + $0x68] sm:$0xff] %v380_v20 }
 0x10b   :  { %536 = vst [vmem:[%s1204_s3 + $0xe8] sm:$0xff] %v420_v21 }
 0x10d   :  { %v459_v22 = vpop.f32.mrf.mxu2  ;;  %v499_v23 = vpop.f32.mrf.mxu3 }
 0x10e   :  { %v460_v24 = vadd.f32 %v943_v40, %v459_v22  ;;  %v500_v25 = vadd.f32 %v943_v40, %v499_v23  ;;  %v382_v26 = vpop.f32.mrf.mxu0  ;;  %v422_v27 = vpop.f32.mrf.mxu1 }
 0x10f   :  { %v383_v28 = vadd.f32 %v943_v40, %v382_v26  ;;  %v423_v29 = vadd.f32 %v943_v40, %v422_v27 }
 0x110   :  { %552 = vst [vmem:[%s1204_s3 + $0x168] sm:$0xff] %v460_v24 }
 0x111   :  { %568 = vst [vmem:[%s1204_s3 + $0x1e8] sm:$0xff] %v500_v25 }
 0x112   :  { %521 = vst [vmem:[%s1204_s3 + $0x70] sm:$0xff] %v383_v28 }
 0x113   :  { %537 = vst [vmem:[%s1204_s3 + $0xf0] sm:$0xff] %v423_v29 }
 0x115   :  { %v462_v30 = vpop.f32.mrf.mxu2  ;;  %v502_v31 = vpop.f32.mrf.mxu3 }
 0x116   :  { %v463_v32 = vadd.f32 %v943_v40, %v462_v30  ;;  %v503_v33 = vadd.f32 %v943_v40, %v502_v31  ;;  %v384_v34 = vpop.f32.mrf.mxu0  ;;  %v424_v35 = vpop.f32.mrf.mxu1 }
 0x117   :  { %v385_v36 = vadd.f32 %v943_v40, %v384_v34  ;;  %v425_v37 = vadd.f32 %v943_v40, %v424_v35 }
 0x118   :  { %553 = vst [vmem:[%s1204_s3 + $0x170] sm:$0xff] %v463_v32 }
 0x119   :  { %569 = vst [vmem:[%s1204_s3 + $0x1f0] sm:$0xff] %v503_v33 }
 0x11a   :  { %522 = vst [vmem:[%s1204_s3 + $0x78] sm:$0xff] %v385_v36 }
 0x11b   :  { %538 = vst [vmem:[%s1204_s3 + $0xf8] sm:$0xff] %v425_v37 }
 0x11d   :  { %v464_v38 = vpop.f32.mrf.mxu2  ;;  %v504_v39 = vpop.f32.mrf.mxu3 }
 0x11e   :  { %v465_v41 = vadd.f32 %v943_v40, %v464_v38  ;;  %v505_v42 = vadd.f32 %v943_v40, %v504_v39 }
 0x120   :  { %554 = vst [vmem:[%s1204_s3 + $0x178] sm:$0xff] %v465_v41 }
 0x121   :  { %570 = vst [vmem:[%s1204_s3 + $0x1f8] sm:$0xff] %v505_v42 }

</bundles_post_ra>
